<compile_context>
chip_gen: v7x
topology: tpu7x:2x2x1
jax: 0.10.0
libtpu: 0.0.40
codegen_flags: <defaults>
</compile_context>

<pallas_src>
import jax
import jax.numpy as jnp
from jax.experimental import pallas as pl
from jax.experimental.pallas import tpu as pltpu

IMG_CHANNELS = 3
IMG_SIZE = 28
NUM_CLASSES = 8

IMG_FLAT = IMG_CHANNELS * IMG_SIZE * IMG_SIZE      # 2352
LAB_FLAT = IMG_SIZE * IMG_SIZE                     # 784
IN_DIM = IMG_FLAT + LAB_FLAT                       # 3136
H1 = 512
H2 = 256
OUT_DIM = 1
OUT_PAD = 128                                      # lane-dense final layer (logit = col 0)
MAX_TILE_M = 512                                   # multiple of 16 (bf16 sublane packing)


def _round_up(x, m):
    return (x + m - 1) // m * m


def _choose_tile_m(B):
    """Batch tile: large (amortize ~0.35us/step), >=2 grid steps when possible (v7x)."""
    b = _round_up(B, 16)                  # bf16 sublane granularity
    tile = min(MAX_TILE_M, b)
    if b // tile < 2 and b >= 32:         # give the 2nd TensorCore work on v7x
        tile = _round_up(-(-b // 2), 16)
    return tile


def disc_mlp_kernel(xi_ref, xl_ref, w1a_ref, w1b_ref, b1_ref,
                    w2_ref, b2_ref, w3_ref, b3_ref, out_ref):
    # Layer 1: split GEMM over (img_flat || label_emb); bf16 operands, f32 accumulate.
    h = jnp.dot(xi_ref[...], w1a_ref[...], preferred_element_type=jnp.float32)
    h = h + jnp.dot(xl_ref[...], w1b_ref[...], preferred_element_type=jnp.float32)
    h = h + b1_ref[...]
    h = jnp.where(h > 0, h, 0.2 * h)                       # LeakyReLU(0.2) in f32

    # Layer 2
    h = jnp.dot(h.astype(jnp.bfloat16), w2_ref[...],
                preferred_element_type=jnp.float32) + b2_ref[...]
    h = jnp.where(h > 0, h, 0.2 * h)

    # Layer 3 (padded to 128 output lanes) + sigmoid via exp + EUP approx reciprocal.
    logit = jnp.dot(h.astype(jnp.bfloat16), w3_ref[...],
                    preferred_element_type=jnp.float32) + b3_ref[...]
    out_ref[...] = pl.reciprocal(1.0 + jnp.exp(-logit), approx=True)


def discriminator_forward(img, labels, params):
    """img: (B, 3, 28, 28) float32, labels: (B,) int32 -> (B, 1) float32."""
    B = img.shape[0]
    emb, w1, b1, w2, b2, w3, b3 = params

    # PyTorch glue: label_emb(labels).view(B,-1) == row gather; img.view(B,-1).
    # torch.cat((img_flat, label_input), dim=1) is realized implicitly by keeping
    # the two halves as separate kernel inputs and splitting w1 — no (B, 3136)
    # activation matrix is ever materialized in HBM.
    x_img = img.reshape(B, IMG_FLAT).astype(jnp.bfloat16)
    x_lab = jnp.take(emb, labels, axis=0).astype(jnp.bfloat16)

    w1a = w1[:IMG_FLAT]                                       # (2352, 512) bf16
    w1b = w1[IMG_FLAT:]                                       # (784, 512)  bf16
    w3p = jnp.pad(w3, ((0, 0), (0, OUT_PAD - OUT_DIM)))       # (256, 128)  bf16
    b3p = jnp.pad(b3, ((0, 0), (0, OUT_PAD - OUT_DIM)))       # (1, 128)    f32

    tile_m = _choose_tile_m(B)
    grid = (pl.cdiv(B, tile_m),)

    def stream(cols):
        # Streamed x tiles keep default double-buffering (bump to Buffered(3) if
        # the DMA shows exposed gaps on v6e).
        return pl.BlockSpec((tile_m, cols), lambda i: (i, 0))

    def resident(shape):
        # Constant index_map: block is VMEM-resident for the whole grid; one buffer.
        return pl.BlockSpec(shape, lambda i: (0, 0), pipeline_mode=pl.Buffered(1))

    flops = 2 * B * (IN_DIM * H1 + H1 * H2 + H2 * OUT_PAD)
    bytes_accessed = (2 * B * IN_DIM                                   # bf16 x stream
                      + 2 * (IN_DIM * H1 + H1 * H2 + H2 * OUT_PAD)     # bf16 weights
                      + 4 * (H1 + H2 + OUT_PAD)                        # f32 biases
                      + 4 * B * OUT_PAD)                               # f32 output

    out = pl.pallas_call(
        disc_mlp_kernel,
        out_shape=jax.ShapeDtypeStruct((B, OUT_PAD), jnp.float32),
        grid=grid,
        in_specs=[
            stream(IMG_FLAT),                 # img_flat tiles
            stream(LAB_FLAT),                 # label-embedding tiles
            resident((IMG_FLAT, H1)),         # w1a
            resident((LAB_FLAT, H1)),         # w1b
            resident((1, H1)),                # b1
            resident((H1, H2)),               # w2
            resident((1, H2)),                # b2
            resident((H2, OUT_PAD)),          # w3 (padded)
            resident((1, OUT_PAD)),           # b3 (padded)
        ],
        out_specs=pl.BlockSpec((tile_m, OUT_PAD), lambda i: (i, 0)),
        compiler_params=pltpu.CompilerParams(
            dimension_semantics=("parallel",),       # shards grid across TCs on v7x
            vmem_limit_bytes=40 * 1024 * 1024,       # bf16 footprint ~<20 MiB; headroom
        ),
        cost_estimate=pl.CostEstimate(
            flops=flops,
            transcendentals=2 * B * OUT_PAD,
            bytes_accessed=bytes_accessed),
    )(x_img, x_lab, w1a, w1b, b1, w2, b2, w3p, b3p)

    # Drop the 127 zero-weight output lanes; only column 0 is the real logit.
    return out[:, :OUT_DIM]


def init_params(key):
    """Deterministic synthetic parameters with the module's shapes.

    Weights are stored in bf16 (MXU-native, half the HBM bytes); biases and the
    embedding table stay f32 so all elementwise math remains f32.
    """
    ks = jax.random.split(key, 4)
    emb = jax.random.normal(ks[0], (NUM_CLASSES, LAB_FLAT), jnp.float32)

    def lin(k, fan_in, fan_out):
        kw, kb = jax.random.split(k)
        bound = 1.0 / jnp.sqrt(fan_in)
        w = jax.random.uniform(kw, (fan_in, fan_out), jnp.float32, -bound, bound)
        b = jax.random.uniform(kb, (1, fan_out), jnp.float32, -bound, bound)
        return w.astype(jnp.bfloat16), b

    w1, b1 = lin(ks[1], IN_DIM, H1)
    w2, b2 = lin(ks[2], H1, H2)
    w3, b3 = lin(ks[3], H2, OUT_DIM)
    return (emb, w1, b1, w2, b2, w3, b3)


if __name__ == "__main__":
    key = jax.random.PRNGKey(0)
    k_img, k_lab, k_par = jax.random.split(key, 3)

    B = 4
    img = jax.random.normal(k_img, (B, IMG_CHANNELS, IMG_SIZE, IMG_SIZE), jnp.float32)
    labels = jax.random.randint(k_lab, (B,), 0, NUM_CLASSES, dtype=jnp.int32)
    params = init_params(k_par)

    fwd = jax.jit(discriminator_forward)
    validity = jax.block_until_ready(fwd(img, labels, params))

    # Pure-JAX reference with matching numerics (bf16 MXU operands, f32 accumulate,
    # f32 elementwise) — validates kernel wiring; tolerance covers the approx
    # reciprocal in the sigmoid and the split-GEMM accumulation order.
    emb, w1, b1, w2, b2, w3, b3 = params
    x = jnp.concatenate([img.reshape(B, -1), jnp.take(emb, labels, axis=0)],
                        axis=1).astype(jnp.bfloat16)
    h = jnp.dot(x, w1, preferred_element_type=jnp.float32) + b1
    h = jnp.where(h > 0, h, 0.2 * h)
    h = jnp.dot(h.astype(jnp.bfloat16), w2, preferred_element_type=jnp.float32) + b2
    h = jnp.where(h > 0, h, 0.2 * h)
    ref = jax.nn.sigmoid(
        jnp.dot(h.astype(jnp.bfloat16), w3, preferred_element_type=jnp.float32) + b3)

    assert validity.shape == (B, OUT_DIM)
    max_err = float(jnp.max(jnp.abs(validity - ref)))
    assert jnp.allclose(validity, ref, atol=5e-3, rtol=5e-3), max_err
    print("KERNEL_OK")
</pallas_src>

<mosaic_0001>
module attributes {stable_mosaic.version = 11 : i64} {
  func.func @disc_mlp_kernel(%arg0: i32, %arg1: memref<16x2352xbf16, #tpu.memory_space<vmem>>, %arg2: memref<16x784xbf16, #tpu.memory_space<vmem>>, %arg3: memref<2352x512xbf16, #tpu.memory_space<vmem>>, %arg4: memref<784x512xbf16, #tpu.memory_space<vmem>>, %arg5: memref<1x512xf32, #tpu.memory_space<vmem>>, %arg6: memref<512x256xbf16, #tpu.memory_space<vmem>>, %arg7: memref<1x256xf32, #tpu.memory_space<vmem>>, %arg8: memref<256x128xbf16, #tpu.memory_space<vmem>>, %arg9: memref<1x128xf32, #tpu.memory_space<vmem>>, %arg10: memref<16x128xf32, #tpu.memory_space<vmem>>) attributes {dimension_semantics = [#tpu.dimension_semantics<parallel>], iteration_bounds = array<i64: 1>, scalar_prefetch = 0 : i64, scratch_operands = 0 : i64, tpu.core_type = #tpu.core_type<tc>, window_params = [{transform_indices = @transform_0, window_bounds = array<i64: 16, 2352>}, {transform_indices = @transform_1, window_bounds = array<i64: 16, 784>}, {pipeline_mode = #tpu.pipeline_mode<synchronous>, transform_indices = @transform_2, window_bounds = array<i64: 2352, 512>}, {pipeline_mode = #tpu.pipeline_mode<synchronous>, transform_indices = @transform_3, window_bounds = array<i64: 784, 512>}, {pipeline_mode = #tpu.pipeline_mode<synchronous>, transform_indices = @transform_4, window_bounds = array<i64: 1, 512>}, {pipeline_mode = #tpu.pipeline_mode<synchronous>, transform_indices = @transform_5, window_bounds = array<i64: 512, 256>}, {pipeline_mode = #tpu.pipeline_mode<synchronous>, transform_indices = @transform_6, window_bounds = array<i64: 1, 256>}, {pipeline_mode = #tpu.pipeline_mode<synchronous>, transform_indices = @transform_7, window_bounds = array<i64: 256, 128>}, {pipeline_mode = #tpu.pipeline_mode<synchronous>, transform_indices = @transform_8, window_bounds = array<i64: 1, 128>}, {transform_indices = @transform_9, window_bounds = array<i64: 16, 128>}]} {
    %c0 = arith.constant 0 : index
    %c0_0 = arith.constant 0 : index
    %0 = vector.load %arg1[%c0, %c0_0] : memref<16x2352xbf16, #tpu.memory_space<vmem>>, vector<16x2352xbf16>
    %c0_1 = arith.constant 0 : index
    %c0_2 = arith.constant 0 : index
    %1 = vector.load %arg3[%c0_1, %c0_2] : memref<2352x512xbf16, #tpu.memory_space<vmem>>, vector<2352x512xbf16>
    %cst = arith.constant dense<0.000000e+00> : vector<16x512xf32>
    %2 = tpu.matmul %0, %1, %cst {dimension_numbers = #tpu.dot_dimension_numbers<[1], [0], [0], [1], [0, 0, 1, 1], [], []>} : vector<16x2352xbf16>, vector<2352x512xbf16>, vector<16x512xf32> -> vector<16x512xf32>
    %c0_3 = arith.constant 0 : index
    %c0_4 = arith.constant 0 : index
    %3 = vector.load %arg2[%c0_3, %c0_4] : memref<16x784xbf16, #tpu.memory_space<vmem>>, vector<16x784xbf16>
    %c0_5 = arith.constant 0 : index
    %c0_6 = arith.constant 0 : index
    %4 = vector.load %arg4[%c0_5, %c0_6] : memref<784x512xbf16, #tpu.memory_space<vmem>>, vector<784x512xbf16>
    %cst_7 = arith.constant dense<0.000000e+00> : vector<16x512xf32>
    %5 = tpu.matmul %3, %4, %cst_7 {dimension_numbers = #tpu.dot_dimension_numbers<[1], [0], [0], [1], [0, 0, 1, 1], [], []>} : vector<16x784xbf16>, vector<784x512xbf16>, vector<16x512xf32> -> vector<16x512xf32>
    %6 = arith.addf %2, %5 : vector<16x512xf32>
    %c0_8 = arith.constant 0 : index
    %c0_9 = arith.constant 0 : index
    %7 = vector.load %arg5[%c0_8, %c0_9] : memref<1x512xf32, #tpu.memory_space<vmem>>, vector<1x512xf32>
    %8 = vector.broadcast %7 : vector<1x512xf32> to vector<16x512xf32>
    %9 = arith.addf %6, %8 : vector<16x512xf32>
    %cst_10 = arith.constant 0.000000e+00 : f32
    %10 = vector.broadcast %cst_10 : f32 to vector<16x512xf32>
    %11 = arith.cmpf ogt, %9, %10 : vector<16x512xf32>
    %cst_11 = arith.constant 2.000000e-01 : f32
    %12 = vector.broadcast %cst_11 : f32 to vector<16x512xf32>
    %13 = arith.mulf %12, %9 : vector<16x512xf32>
    %14 = arith.select %11, %9, %13 : vector<16x512xi1>, vector<16x512xf32>
    %15 = arith.truncf %14 : vector<16x512xf32> to vector<16x512xbf16>
    %c0_12 = arith.constant 0 : index
    %c0_13 = arith.constant 0 : index
    %16 = vector.load %arg6[%c0_12, %c0_13] : memref<512x256xbf16, #tpu.memory_space<vmem>>, vector<512x256xbf16>
    %cst_14 = arith.constant dense<0.000000e+00> : vector<16x256xf32>
    %17 = tpu.matmul %15, %16, %cst_14 {dimension_numbers = #tpu.dot_dimension_numbers<[1], [0], [0], [1], [0, 0, 1, 1], [], []>} : vector<16x512xbf16>, vector<512x256xbf16>, vector<16x256xf32> -> vector<16x256xf32>
    %c0_15 = arith.constant 0 : index
    %c0_16 = arith.constant 0 : index
    %18 = vector.load %arg7[%c0_15, %c0_16] : memref<1x256xf32, #tpu.memory_space<vmem>>, vector<1x256xf32>
    %19 = vector.broadcast %18 : vector<1x256xf32> to vector<16x256xf32>
    %20 = arith.addf %17, %19 : vector<16x256xf32>
    %cst_17 = arith.constant 0.000000e+00 : f32
    %21 = vector.broadcast %cst_17 : f32 to vector<16x256xf32>
    %22 = arith.cmpf ogt, %20, %21 : vector<16x256xf32>
    %cst_18 = arith.constant 2.000000e-01 : f32
    %23 = vector.broadcast %cst_18 : f32 to vector<16x256xf32>
    %24 = arith.mulf %23, %20 : vector<16x256xf32>
    %25 = arith.select %22, %20, %24 : vector<16x256xi1>, vector<16x256xf32>
    %26 = arith.truncf %25 : vector<16x256xf32> to vector<16x256xbf16>
    %c0_19 = arith.constant 0 : index
    %c0_20 = arith.constant 0 : index
    %27 = vector.load %arg8[%c0_19, %c0_20] : memref<256x128xbf16, #tpu.memory_space<vmem>>, vector<256x128xbf16>
    %cst_21 = arith.constant dense<0.000000e+00> : vector<16x128xf32>
    %28 = tpu.matmul %26, %27, %cst_21 {dimension_numbers = #tpu.dot_dimension_numbers<[1], [0], [0], [1], [0, 0, 1, 1], [], []>} : vector<16x256xbf16>, vector<256x128xbf16>, vector<16x128xf32> -> vector<16x128xf32>
    %c0_22 = arith.constant 0 : index
    %c0_23 = arith.constant 0 : index
    %29 = vector.load %arg9[%c0_22, %c0_23] : memref<1x128xf32, #tpu.memory_space<vmem>>, vector<1x128xf32>
    %30 = vector.broadcast %29 : vector<1x128xf32> to vector<16x128xf32>
    %31 = arith.addf %28, %30 : vector<16x128xf32>
    %cst_24 = arith.constant 0.000000e+00 : f32
    %32 = vector.broadcast %cst_24 : f32 to vector<16x128xf32>
    %33 = arith.subf %32, %31 : vector<16x128xf32>
    %34 = math.exp %33 : vector<16x128xf32>
    %cst_25 = arith.constant 1.000000e+00 : f32
    %35 = vector.broadcast %cst_25 : f32 to vector<16x128xf32>
    %36 = arith.addf %35, %34 : vector<16x128xf32>
    %37 = tpu.reciprocal %36 {approx = true} : vector<16x128xf32> -> vector<16x128xf32>
    %c0_26 = arith.constant 0 : index
    %c0_27 = arith.constant 0 : index
    %38 = vector.load %arg10[%c0_26, %c0_27] : memref<16x128xf32, #tpu.memory_space<vmem>>, vector<16x128xf32>
    tpu.vector_store %arg10[%c0_26, %c0_27], %37 {strides = array<i32>} : memref<16x128xf32, #tpu.memory_space<vmem>>, vector<16x128xf32>,
    return
  }
  func.func @transform_0(%arg0: i32) -> (i32, i32) {
    %c0_i32 = arith.constant 0 : i32
    %c0_i32_0 = arith.constant 0 : i32
    return %arg0, %c0_i32 : i32, i32
  }
  func.func @transform_1(%arg0: i32) -> (i32, i32) {
    %c0_i32 = arith.constant 0 : i32
    %c0_i32_0 = arith.constant 0 : i32
    return %arg0, %c0_i32 : i32, i32
  }
  func.func @transform_2(%arg0: i32) -> (i32, i32) {
    %c0_i32 = arith.constant 0 : i32
    %c0_i32_0 = arith.constant 0 : i32
    %c0_i32_1 = arith.constant 0 : i32
    return %c0_i32, %c0_i32_0 : i32, i32
  }
  func.func @transform_3(%arg0: i32) -> (i32, i32) {
    %c0_i32 = arith.constant 0 : i32
    %c0_i32_0 = arith.constant 0 : i32
    %c0_i32_1 = arith.constant 0 : i32
    return %c0_i32, %c0_i32_0 : i32, i32
  }
  func.func @transform_4(%arg0: i32) -> (i32, i32) {
    %c0_i32 = arith.constant 0 : i32
    %c0_i32_0 = arith.constant 0 : i32
    %c0_i32_1 = arith.constant 0 : i32
    return %c0_i32, %c0_i32_0 : i32, i32
  }
  func.func @transform_5(%arg0: i32) -> (i32, i32) {
    %c0_i32 = arith.constant 0 : i32
    %c0_i32_0 = arith.constant 0 : i32
    %c0_i32_1 = arith.constant 0 : i32
    return %c0_i32, %c0_i32_0 : i32, i32
  }
  func.func @transform_6(%arg0: i32) -> (i32, i32) {
    %c0_i32 = arith.constant 0 : i32
    %c0_i32_0 = arith.constant 0 : i32
    %c0_i32_1 = arith.constant 0 : i32
    return %c0_i32, %c0_i32_0 : i32, i32
  }
  func.func @transform_7(%arg0: i32) -> (i32, i32) {
    %c0_i32 = arith.constant 0 : i32
    %c0_i32_0 = arith.constant 0 : i32
    %c0_i32_1 = arith.constant 0 : i32
    return %c0_i32, %c0_i32_0 : i32, i32
  }
  func.func @transform_8(%arg0: i32) -> (i32, i32) {
    %c0_i32 = arith.constant 0 : i32
    %c0_i32_0 = arith.constant 0 : i32
    %c0_i32_1 = arith.constant 0 : i32
    return %c0_i32, %c0_i32_0 : i32, i32
  }
  func.func @transform_9(%arg0: i32) -> (i32, i32) {
    %c0_i32 = arith.constant 0 : i32
    %c0_i32_0 = arith.constant 0 : i32
    return %arg0, %c0_i32 : i32, i32
  }
}

</mosaic_0001>

<bundles_post_ra>
// kernel: discriminator_forward.1
= control target key start
LH: loop header
LB: loop body
LE: loop exit
PB: predicated region body
PF: predicated region fallthrough
CT: control target
= control target key end

     0   :  { %v9403_v38 = vmov 1983009808   ;;  %v860_v40 = vlaneseq  ;;  %vm1910_vm0 = vcmask 130048   ;;  %vm5415_vm1 = vcmask 392192   ;;  %s12402_s0 = inlined_call_operand.vmem [shape: bf16[4,2352], index: 0, kind: input, shape index: {}]   ;;  %s12403_s1 = inlined_call_operand.vmem [shape: bf16[4,784], index: 1, kind: input, shape index: {}]   ;;  %s12404_s2 = inlined_call_operand.vmem [shape: bf16[2352,512], index: 2, kind: input, shape index: {}]   ;;  %s12405_s3 = inlined_call_operand.vmem [shape: bf16[784,512], index: 3, kind: input, shape index: {}]   ;;  %s12406_s4 = inlined_call_operand.vmem [shape: f32[1,512], index: 4, kind: input, shape index: {}]   ;;  %s12407_s5 = inlined_call_operand.vmem [shape: bf16[512,256], index: 5, kind: input, shape index: {}]   ;;  %s12408_s6 = inlined_call_operand.vmem [shape: f32[1,256], index: 6, kind: input, shape index: {}]   ;;  %s12409_s7 = inlined_call_operand.vmem [shape: bf16[256,128], index: 7, kind: input, shape index: {}]   ;;  %s12410_s8 = inlined_call_operand.vmem [shape: f32[1,128], index: 8, kind: input, shape index: {}]   ;;  %s12411_s9 = inlined_call_operand.vmem [shape: f32[4,128], index: 9, kind: output, shape index: {}]  }
   0x1   :  { %v8065_v0 = vld [vmem:[%s12405_s3 + $0x4] ss:$16 sps:$4 sm:$0xff]   ;;  %v8069_v2 = vld [vmem:[%s12405_s3] ss:$16 sps:$4 sm:$0xff]   ;;  %v858_v39 = vunpack.c.l.s4 %v9403_v38  ;;  %v8163_v57 = vld [vmem:[%s12403_s1 + $0x1c] ss:$14 sps:$4 sm:$0xff]  }
   0x2   :  { %v8067_v1 = vld [vmem:[%s12405_s3 + $0x204] ss:$16 sps:$4 sm:$0xff]   ;;  %1914 = vmatprep.subr.bf16.mxu1 %v8065_v0  ;;  %v8070_v3 = vld [vmem:[%s12405_s3 + $0x200] ss:$16 sps:$4 sm:$0xff]   ;;  %v9581_v46 = vshrl.u32 %v860_v40, 7 }
   0x3   :  { %1957 = vmatprep.subr.bf16.mxu0 %v8067_v1  ;;  %v8071_v4 = vld [vmem:[%s12405_s3 + $0x24] ss:$16 sps:$4 sm:$0xff]   ;;  %1915 = vmatpush1.bf16.msra.mxu1 %v8069_v2  ;;  %v8075_v6 = vld [vmem:[%s12405_s3 + $0x20] ss:$16 sps:$4 sm:$0xff]   ;;  %v859_v45 = vunpack.c.0.s8 %v858_v39  ;;  %v8202_v39 = vld [vmem:[%s12405_s3 + $0xac] ss:$16 sps:$4 sm:$0xff]  }
   0x4   :  { %1958 = vmatpush1.bf16.msra.mxu0 %v8070_v3  ;;  %v8073_v5 = vld [vmem:[%s12405_s3 + $0x224] ss:$16 sps:$4 sm:$0xff]   ;;  %1916 = vmatprep.subr.bf16.mxu1 %v8071_v4  ;;  %v8076_v7 = vld [vmem:[%s12405_s3 + $0x220] ss:$16 sps:$4 sm:$0xff]  }
   0x5   :  { %1959 = vmatprep.subr.bf16.mxu0 %v8073_v5  ;;  %v8077_v8 = vld [vmem:[%s12405_s3 + $0x44] ss:$16 sps:$4 sm:$0xff]   ;;  %v8081_v10 = vld [vmem:[%s12405_s3 + $0x40] ss:$16 sps:$4 sm:$0xff]   ;;  %v9602_v53 = vsub.s32 %v859_v45, %v9581_v46  ;;  %v8206_v45 = vld [vmem:[%s12405_s3 + $0xc8] ss:$16 sps:$4 sm:$0xff]  }
   0x6   :  { %v8079_v9 = vld [vmem:[%s12405_s3 + $0x244] ss:$16 sps:$4 sm:$0xff]   ;;  %v8082_v11 = vld [vmem:[%s12405_s3 + $0x240] ss:$16 sps:$4 sm:$0xff]  }
   0x7   :  { %1917 = vmatpush1.bf16.msra.mxu1 %v8075_v6  ;;  %v8083_v12 = vld [vmem:[%s12405_s3 + $0x64] ss:$16 sps:$4 sm:$0xff]   ;;  %v8087_v14 = vld [vmem:[%s12405_s3 + $0x60] ss:$16 sps:$4 sm:$0xff]   ;;  %v877_v61 = vrot.slane %v8163_v57, %v9602_v53  ;;  %v8220_v57 = vld [vmem:[%s12405_s3 + $0x10c] ss:$16 sps:$4 sm:$0xff]  }
   0x8   :  { %1960 = vmatpush1.bf16.msra.mxu0 %v8076_v7  ;;  %1918 = vmatprep.subr.bf16.mxu1 %v8077_v8  ;;  %v8085_v13 = vld [vmem:[%s12405_s3 + $0x264] ss:$16 sps:$4 sm:$0xff]   ;;  %v8088_v15 = vld [vmem:[%s12405_s3 + $0x260] ss:$16 sps:$4 sm:$0xff]  }
   0x9   :  { %1961 = vmatprep.subr.bf16.mxu0 %v8079_v9  ;;  %v8089_v16 = vld [vmem:[%s12405_s3 + $0x84] ss:$16 sps:$4 sm:$0xff]   ;;  %v8093_v18 = vld [vmem:[%s12405_s3 + $0x80] ss:$16 sps:$4 sm:$0xff]  }
   0xa   :  { %v8091_v17 = vld [vmem:[%s12405_s3 + $0x284] ss:$16 sps:$4 sm:$0xff]   ;;  %v8094_v19 = vld [vmem:[%s12405_s3 + $0x280] ss:$16 sps:$4 sm:$0xff]  }
   0xb   :  { %1919 = vmatpush1.bf16.msra.mxu1 %v8081_v10  ;;  %v8095_v20 = vld [vmem:[%s12405_s3 + $0xa4] ss:$16 sps:$4 sm:$0xff]   ;;  %v8099_v22 = vld [vmem:[%s12405_s3 + $0xa0] ss:$16 sps:$4 sm:$0xff]  }
   0xc   :  { %1962 = vmatpush1.bf16.msra.mxu0 %v8082_v11  ;;  %1920 = vmatprep.subr.bf16.mxu1 %v8083_v12  ;;  %v8097_v21 = vld [vmem:[%s12405_s3 + $0x2a4] ss:$16 sps:$4 sm:$0xff]   ;;  %v8100_v23 = vld [vmem:[%s12405_s3 + $0x2a0] ss:$16 sps:$4 sm:$0xff]  }
   0xd   :  { %1963 = vmatprep.subr.bf16.mxu0 %v8085_v13  ;;  %v8101_v24 = vld [vmem:[%s12405_s3 + $0xc4] ss:$16 sps:$4 sm:$0xff]   ;;  %v8105_v26 = vld [vmem:[%s12405_s3 + $0xc0] ss:$16 sps:$4 sm:$0xff]  }
   0xe   :  { %v8103_v25 = vld [vmem:[%s12405_s3 + $0x2c4] ss:$16 sps:$4 sm:$0xff]   ;;  %v8106_v27 = vld [vmem:[%s12405_s3 + $0x2c0] ss:$16 sps:$4 sm:$0xff]  }
   0xf   :  { %1921 = vmatpush1.bf16.msra.mxu1 %v8087_v14  ;;  %v8107_v28 = vld [vmem:[%s12405_s3 + $0xe4] ss:$16 sps:$4 sm:$0xff]   ;;  %v8111_v30 = vld [vmem:[%s12405_s3 + $0xe0] ss:$16 sps:$4 sm:$0xff]  }
  0x10   :  { %1964 = vmatpush1.bf16.msra.mxu0 %v8088_v15  ;;  %1922 = vmatprep.subr.bf16.mxu1 %v8089_v16  ;;  %v8109_v29 = vld [vmem:[%s12405_s3 + $0x2e4] ss:$16 sps:$4 sm:$0xff]   ;;  %v8112_v31 = vld [vmem:[%s12405_s3 + $0x2e0] ss:$16 sps:$4 sm:$0xff]  }
  0x11   :  { %1965 = vmatprep.subr.bf16.mxu0 %v8091_v17  ;;  %v8113_v32 = vld [vmem:[%s12405_s3 + $0x104] ss:$16 sps:$4 sm:$0xff]   ;;  %v8117_v34 = vld [vmem:[%s12405_s3 + $0x100] ss:$16 sps:$4 sm:$0xff]   ;;  %v8172_v17 = vld [vmem:[%s12405_s3 + $0xc] ss:$16 sps:$4 sm:$0xff]  }
  0x12   :  { %v8115_v33 = vld [vmem:[%s12405_s3 + $0x304] ss:$16 sps:$4 sm:$0xff]   ;;  %v8118_v35 = vld [vmem:[%s12405_s3 + $0x300] ss:$16 sps:$4 sm:$0xff]  }
  0x13   :  { %1923 = vmatpush1.bf16.msra.mxu1 %v8093_v18  ;;  %v8119_v36 = vld [vmem:[%s12405_s3 + $0x124] ss:$16 sps:$4 sm:$0xff]   ;;  %v8123_v41 = vld [vmem:[%s12405_s3 + $0x120] ss:$16 sps:$4 sm:$0xff]  }
  0x14   :  { %1966 = vmatpush1.bf16.msra.mxu0 %v8094_v19  ;;  %1924 = vmatprep.subr.bf16.mxu1 %v8095_v20  ;;  %v8121_v37 = vld [vmem:[%s12405_s3 + $0x324] ss:$16 sps:$4 sm:$0xff]   ;;  %v8124_v42 = vld [vmem:[%s12405_s3 + $0x320] ss:$16 sps:$4 sm:$0xff]   ;;  %v8170_v20 = vld [vmem:[%s12405_s3 + $0x8] ss:$16 sps:$4 sm:$0xff]  }
  0x15   :  { %1967 = vmatprep.subr.bf16.mxu0 %v8097_v21  ;;  %v8125_v43 = vld [vmem:[%s12405_s3 + $0x144] ss:$16 sps:$4 sm:$0xff]   ;;  %v8129_v47 = vld [vmem:[%s12405_s3 + $0x140] ss:$16 sps:$4 sm:$0xff]  }
  0x16   :  { %v8127_v44 = vld [vmem:[%s12405_s3 + $0x344] ss:$16 sps:$4 sm:$0xff]   ;;  %v8130_v48 = vld [vmem:[%s12405_s3 + $0x340] ss:$16 sps:$4 sm:$0xff]  }
  0x17   :  { %1925 = vmatpush1.bf16.msra.mxu1 %v8099_v22  ;;  %v8131_v49 = vld [vmem:[%s12405_s3 + $0x164] ss:$16 sps:$4 sm:$0xff]   ;;  %v8135_v51 = vld [vmem:[%s12405_s3 + $0x160] ss:$16 sps:$4 sm:$0xff]  }
  0x18   :  { %1968 = vmatpush1.bf16.msra.mxu0 %v8100_v23  ;;  %1926 = vmatprep.subr.bf16.mxu1 %v8101_v24  ;;  %v8133_v50 = vld [vmem:[%s12405_s3 + $0x364] ss:$16 sps:$4 sm:$0xff]   ;;  %v8136_v52 = vld [vmem:[%s12405_s3 + $0x360] ss:$16 sps:$4 sm:$0xff]   ;;  %v8178_v23 = vld [vmem:[%s12405_s3 + $0x2c] ss:$16 sps:$4 sm:$0xff]  }
  0x19   :  { %1969 = vmatprep.subr.bf16.mxu0 %v8103_v25  ;;  %v8137_v54 = vld [vmem:[%s12405_s3 + $0x184] ss:$16 sps:$4 sm:$0xff]   ;;  %v8161_v56 = vld [vmem:[%s12403_s1] ss:$14 sps:$4 sm:$0xff]   ;;  %v8176_v25 = vld [vmem:[%s12405_s3 + $0x28] ss:$16 sps:$4 sm:$0xff]  }
  0x1a   :  { %v8139_v55 = vld [vmem:[%s12405_s3 + $0x384] ss:$16 sps:$4 sm:$0xff]   ;;  %v8166_v59 = vld [vmem:[%s12403_s1 + $0x20] ss:$14 sps:$4 sm:$0xff]   ;;  %v863_v60 = vrot.slane %v8161_v56, %v9602_v53 }
  0x1b   :  { %1927 = vmatpush1.bf16.msra.mxu1 %v8105_v26  ;;  %v8165_v58 = vld [vmem:[%s12403_s1 + $0x4] ss:$14 sps:$4 sm:$0xff]   ;;  %v884_v1 = vrot.slane %v8166_v59, %v9602_v53 }
  0x1c   :  { %1970 = vmatpush1.bf16.msra.mxu0 %v8106_v27  ;;  %1928 = vmatprep.subr.bf16.mxu1 %v8107_v28  ;;  %v870_v62 = vrot.slane %v8165_v58, %v9602_v53  ;;  %v8141_v63 = vld [vmem:[%s12405_s3 + $0x180] ss:$16 sps:$4 sm:$0xff]   ;;  %v8143_v2 = vld [vmem:[%s12405_s3 + $0x1a4] ss:$16 sps:$4 sm:$0xff]   ;;  %v886_v3 = vcombine.high %v863_v60, %v877_v61  ;;  %v9677_v18 = vcombine.low %v863_v60, %v877_v61  ;;  %v8184_v27 = vld [vmem:[%s12405_s3 + $0x4c] ss:$16 sps:$4 sm:$0xff]  }
  0x1d   :  { %1971 = vmatprep.subr.bf16.mxu0 %v8109_v29  ;;  %v8142_v0 = vld [vmem:[%s12405_s3 + $0x380] ss:$16 sps:$4 sm:$0xff]   ;;  %v8145_v4 = vld [vmem:[%s12405_s3 + $0x3a4] ss:$16 sps:$4 sm:$0xff]   ;;  %v8182_v29 = vld [vmem:[%s12405_s3 + $0x48] ss:$16 sps:$4 sm:$0xff]  }
  0x1e   :  { %v9638_v5 = vcombine.high %v870_v62, %v884_v1  ;;  %1946 = vmatprep.mubr.bf16.mxu1 %v886_v3  ;;  %v8147_v6 = vld [vmem:[%s12405_s3 + $0x1a0] ss:$16 sps:$4 sm:$0xff]   ;;  %v8149_v8 = vld [vmem:[%s12405_s3 + $0x1c4] ss:$16 sps:$4 sm:$0xff]   ;;  %v9685_v21 = vcombine.low %v870_v62, %v884_v1  ;;  %v8218_v60 = vld [vmem:[%s12405_s3 + $0x108] ss:$16 sps:$4 sm:$0xff]  }
  0x1f   :  { %1929 = vmatpush1.bf16.msra.mxu1 %v8111_v30  ;;  %v8148_v7 = vld [vmem:[%s12405_s3 + $0x3a0] ss:$16 sps:$4 sm:$0xff]   ;;  %v8151_v9 = vld [vmem:[%s12405_s3 + $0x3c4] ss:$16 sps:$4 sm:$0xff]   ;;  %v8226_v62 = vld [vmem:[%s12405_s3 + $0x12c] ss:$16 sps:$4 sm:$0xff]  }
  0x20   :  { %1972 = vmatpush1.bf16.msra.mxu0 %v8112_v31  ;;  %1930 = vmatprep.subr.bf16.mxu1 %v8113_v32  ;;  %v8153_v10 = vld [vmem:[%s12405_s3 + $0x1c0] ss:$16 sps:$4 sm:$0xff]   ;;  %v8155_v12 = vld [vmem:[%s12405_s3 + $0x1e4] ss:$16 sps:$4 sm:$0xff]   ;;  %v8190_v31 = vld [vmem:[%s12405_s3 + $0x6c] ss:$16 sps:$4 sm:$0xff]  }
  0x21   :  { %1973 = vmatprep.subr.bf16.mxu0 %v8115_v33  ;;  %1989 = vmatprep.mubr.bf16.mxu0 %v9638_v5  ;;  %v8154_v11 = vld [vmem:[%s12405_s3 + $0x3c0] ss:$16 sps:$4 sm:$0xff]   ;;  %v8157_v13 = vld [vmem:[%s12405_s3 + $0x3e4] ss:$16 sps:$4 sm:$0xff]   ;;  %v8188_v33 = vld [vmem:[%s12405_s3 + $0x68] ss:$16 sps:$4 sm:$0xff]  }
  0x22   :  { %v8159_v14 = vld [vmem:[%s12405_s3 + $0x1e0] ss:$16 sps:$4 sm:$0xff]   ;;  %v8169_v16 = vld [vmem:[%s12405_s3 + $0x404] ss:$16 sps:$4 sm:$0xff]  }
  0x23   :  { %1931 = vmatpush1.bf16.msra.mxu1 %v8117_v34  ;;  %v8160_v15 = vld [vmem:[%s12405_s3 + $0x3e0] ss:$16 sps:$4 sm:$0xff]   ;;  %v8175_v22 = vld [vmem:[%s12405_s3 + $0x424] ss:$16 sps:$4 sm:$0xff]  }
  0x24   :  { %1974 = vmatpush1.bf16.msra.mxu0 %v8118_v35  ;;  %1932 = vmatprep.subr.bf16.mxu1 %v8119_v36  ;;  %v8167_v19 = vld [vmem:[%s12405_s3 + $0x400] ss:$16 sps:$4 sm:$0xff]   ;;  %v8181_v26 = vld [vmem:[%s12405_s3 + $0x444] ss:$16 sps:$4 sm:$0xff]   ;;  %v8196_v35 = vld [vmem:[%s12405_s3 + $0x8c] ss:$16 sps:$4 sm:$0xff]  }
  0x25   :  { %1975 = vmatprep.subr.bf16.mxu0 %v8121_v37  ;;  %v8173_v24 = vld [vmem:[%s12405_s3 + $0x420] ss:$16 sps:$4 sm:$0xff]   ;;  %v8187_v30 = vld [vmem:[%s12405_s3 + $0x464] ss:$16 sps:$4 sm:$0xff]   ;;  %v8194_v37 = vld [vmem:[%s12405_s3 + $0x88] ss:$16 sps:$4 sm:$0xff]  }
  0x26   :  { %v8179_v28 = vld [vmem:[%s12405_s3 + $0x440] ss:$16 sps:$4 sm:$0xff]   ;;  %v8193_v34 = vld [vmem:[%s12405_s3 + $0x484] ss:$16 sps:$4 sm:$0xff]  }
  0x27   :  { %1933 = vmatpush1.bf16.msra.mxu1 %v8123_v41  ;;  %v8185_v32 = vld [vmem:[%s12405_s3 + $0x460] ss:$16 sps:$4 sm:$0xff]   ;;  %v8199_v38 = vld [vmem:[%s12405_s3 + $0x4a4] ss:$16 sps:$4 sm:$0xff]   ;;  %v8200_v41 = vld [vmem:[%s12405_s3 + $0xa8] ss:$16 sps:$4 sm:$0xff]  }
  0x28   :  { %1976 = vmatpush1.bf16.msra.mxu0 %v8124_v42  ;;  %1934 = vmatprep.subr.bf16.mxu1 %v8125_v43  ;;  %v8191_v36 = vld [vmem:[%s12405_s3 + $0x480] ss:$16 sps:$4 sm:$0xff]   ;;  %v8205_v42 = vld [vmem:[%s12405_s3 + $0x4c4] ss:$16 sps:$4 sm:$0xff]   ;;  %v8208_v43 = vld [vmem:[%s12405_s3 + $0xcc] ss:$16 sps:$4 sm:$0xff]  }
  0x29   :  { %1977 = vmatprep.subr.bf16.mxu0 %v8127_v44  ;;  %v8197_v40 = vld [vmem:[%s12405_s3 + $0x4a0] ss:$16 sps:$4 sm:$0xff]   ;;  %v8217_v56 = vld [vmem:[%s12405_s3 + $0x504] ss:$16 sps:$4 sm:$0xff]  }
  0x2a   :  { %v8203_v44 = vld [vmem:[%s12405_s3 + $0x4c0] ss:$16 sps:$4 sm:$0xff]   ;;  %v8223_v61 = vld [vmem:[%s12405_s3 + $0x524] ss:$16 sps:$4 sm:$0xff]  }
  0x2b   :  { %1935 = vmatpush1.bf16.msra.mxu1 %v8129_v47  ;;  %v8211_v47 = vld [vmem:[%s12405_s3 + $0x4e4] ss:$16 sps:$4 sm:$0xff]   ;;  %v8215_v59 = vld [vmem:[%s12405_s3 + $0x500] ss:$16 sps:$4 sm:$0xff]  }
  0x2c   :  { %1978 = vmatpush1.bf16.msra.mxu0 %v8130_v48  ;;  %1936 = vmatprep.subr.bf16.mxu1 %v8131_v49  ;;  %v8214_v48 = vld [vmem:[%s12405_s3 + $0xec] ss:$16 sps:$4 sm:$0xff]   ;;  %v8263_v49 = vld [vmem:[%s12403_s1 + $0x8] ss:$14 sps:$4 sm:$0xff]  }
  0x2d   :  { %1979 = vmatprep.subr.bf16.mxu0 %v8133_v50  ;;  %v8266_v50 = vld [vmem:[%s12403_s1 + $0x24] ss:$14 sps:$4 sm:$0xff]  }
  0x2e   :  { %v8229_v1 = vld [vmem:[%s12405_s3 + $0x544] ss:$16 sps:$4 sm:$0xff]  }
  0x2f   :  { %1937 = vmatpush1.bf16.msra.mxu1 %v8135_v51  ;;  %v8209_v51 = vld [vmem:[%s12405_s3 + $0x4e0] ss:$16 sps:$4 sm:$0xff]  }
  0x30   :  { %1980 = vmatpush1.bf16.msra.mxu0 %v8136_v52  ;;  %1938 = vmatprep.subr.bf16.mxu1 %v8137_v54  ;;  %v9777_v52 = vrot.slane %v8263_v49, %v9602_v53  ;;  %v9780_v54 = vrot.slane %v8266_v50, %v9602_v53  ;;  %v8292_v49 = vld [vmem:[%s12405_s3 + $0x28c] ss:$16 sps:$4 sm:$0xff]  }
  0x31   :  { %1981 = vmatprep.subr.bf16.mxu0 %v8139_v55  ;;  %v8212_v55 = vld [vmem:[%s12405_s3 + $0xe8] ss:$16 sps:$4 sm:$0xff]  }
  0x32   :  { %v9793_v58 = vcombine.high %v9777_v52, %v9780_v54 }
  0x33   :  { %1939 = vmatpush1.bf16.msra.mxu1 %v8141_v63  ;;  %v8221_v63 = vld [vmem:[%s12405_s3 + $0x520] ss:$16 sps:$4 sm:$0xff]  }
  0x34   :  { %1982 = vmatpush1.bf16.msra.mxu0 %v8142_v0  ;;  %1940 = vmatprep.subr.bf16.mxu1 %v8143_v2  ;;  %v8224_v0 = vld [vmem:[%s12405_s3 + $0x128] ss:$16 sps:$4 sm:$0xff]   ;;  %v8232_v2 = vld [vmem:[%s12405_s3 + $0x14c] ss:$16 sps:$4 sm:$0xff]  }
  0x35   :  { %1983 = vmatprep.subr.bf16.mxu0 %v8145_v4  ;;  %v8230_v4 = vld [vmem:[%s12405_s3 + $0x148] ss:$16 sps:$4 sm:$0xff]  }
  0x37   :  { %1941 = vmatpush1.bf16.msra.mxu1 %v8147_v6  ;;  %v8235_v6 = vld [vmem:[%s12405_s3 + $0x564] ss:$16 sps:$4 sm:$0xff]  }
  0x38   :  { %1984 = vmatpush1.bf16.msra.mxu0 %v8148_v7  ;;  %1942 = vmatprep.subr.bf16.mxu1 %v8149_v8  ;;  %v8238_v7 = vld [vmem:[%s12405_s3 + $0x16c] ss:$16 sps:$4 sm:$0xff]   ;;  %v8233_v8 = vld [vmem:[%s12405_s3 + $0x560] ss:$16 sps:$4 sm:$0xff]  }
  0x39   :  { %1985 = vmatprep.subr.bf16.mxu0 %v8151_v9  ;;  %v8236_v9 = vld [vmem:[%s12405_s3 + $0x168] ss:$16 sps:$4 sm:$0xff]  }
  0x3b   :  { %1943 = vmatpush1.bf16.msra.mxu1 %v8153_v10  ;;  %v8241_v10 = vld [vmem:[%s12405_s3 + $0x584] ss:$16 sps:$4 sm:$0xff]  }
  0x3c   :  { %1986 = vmatpush1.bf16.msra.mxu0 %v8154_v11  ;;  %1944 = vmatprep.subr.bf16.mxu1 %v8155_v12  ;;  %v8244_v11 = vld [vmem:[%s12405_s3 + $0x18c] ss:$16 sps:$4 sm:$0xff]   ;;  %v8239_v12 = vld [vmem:[%s12405_s3 + $0x580] ss:$16 sps:$4 sm:$0xff]  }
  0x3d   :  { %1987 = vmatprep.subr.bf16.mxu0 %v8157_v13  ;;  %v8242_v13 = vld [vmem:[%s12405_s3 + $0x188] ss:$16 sps:$4 sm:$0xff]  }
  0x3f   :  { %1945 = vmatpush1.bf16.msra.mxu1 %v8159_v14  ;;  %v8247_v14 = vld [vmem:[%s12405_s3 + $0x5a4] ss:$16 sps:$4 sm:$0xff]  }
  0x40   :  { %1988 = vmatpush1.bf16.msra.mxu0 %v8160_v15  ;;  %2086 = vmatprep.subr.bf16.mxu1 %v8172_v17  ;;  %v8250_v15 = vld [vmem:[%s12405_s3 + $0x1ac] ss:$16 sps:$4 sm:$0xff]   ;;  %v8248_v17 = vld [vmem:[%s12405_s3 + $0x1a8] ss:$16 sps:$4 sm:$0xff]  }
  0x41   :  { %2000 = vmatprep.subr.bf16.mxu0 %v8169_v16  ;;  %v8245_v16 = vld [vmem:[%s12405_s3 + $0x5a0] ss:$16 sps:$4 sm:$0xff]  }
  0x42   :  { %1947 = vmatmul.mubr.bf16.vlgmr.msra.gmra.mrb[0].mxu1 %v9677_v18 }
  0x43   :  { %1990 = vmatmul.mubr.bf16.vlgmr.msra.gmra.mrb[0].mxu0 %v9685_v21  ;;  %2087 = vmatpush1.bf16.msra.mxu1 %v8170_v20  ;;  %v8256_v20 = vld [vmem:[%s12405_s3 + $0x1cc] ss:$16 sps:$4 sm:$0xff]  }
  0x44   :  { %2001 = vmatpush1.bf16.msra.mxu0 %v8167_v19  ;;  %2088 = vmatprep.subr.bf16.mxu1 %v8178_v23  ;;  %v8253_v19 = vld [vmem:[%s12405_s3 + $0x5c4] ss:$16 sps:$4 sm:$0xff]   ;;  %v8254_v23 = vld [vmem:[%s12405_s3 + $0x1c8] ss:$16 sps:$4 sm:$0xff]  }
  0x45   :  { %2002 = vmatprep.subr.bf16.mxu0 %v8175_v22  ;;  %2118 = vmatprep.mubr.bf16.mxu1 %v886_v3  ;;  %v8227_v3 = vld [vmem:[%s12405_s3 + $0x540] ss:$16 sps:$4 sm:$0xff]  }
  0x46   :  { %2032 = vmatprep.mubr.bf16.mxu0 %v9793_v58  ;;  %v8251_v22 = vld [vmem:[%s12405_s3 + $0x5c0] ss:$16 sps:$4 sm:$0xff]  }
  0x47   :  { %2089 = vmatpush1.bf16.msra.mxu1 %v8176_v25  ;;  %v8262_v25 = vld [vmem:[%s12405_s3 + $0x1ec] ss:$16 sps:$4 sm:$0xff]  }
  0x48   :  { %2003 = vmatpush1.bf16.msra.mxu0 %v8173_v24  ;;  %2090 = vmatprep.subr.bf16.mxu1 %v8184_v27  ;;  %v8259_v24 = vld [vmem:[%s12405_s3 + $0x5e4] ss:$16 sps:$4 sm:$0xff]   ;;  %v8260_v27 = vld [vmem:[%s12405_s3 + $0x1e8] ss:$16 sps:$4 sm:$0xff]  }
  0x49   :  { %2004 = vmatprep.subr.bf16.mxu0 %v8181_v26  ;;  %v8257_v26 = vld [vmem:[%s12405_s3 + $0x5e0] ss:$16 sps:$4 sm:$0xff]  }
  0x4b   :  { %2091 = vmatpush1.bf16.msra.mxu1 %v8182_v29  ;;  %v8277_v29 = vld [vmem:[%s12405_s3 + $0x604] ss:$16 sps:$4 sm:$0xff]  }
  0x4c   :  { %2005 = vmatpush1.bf16.msra.mxu0 %v8179_v28  ;;  %2092 = vmatprep.subr.bf16.mxu1 %v8190_v31  ;;  %v8271_v28 = vld [vmem:[%s12405_s3 + $0x20c] ss:$16 sps:$4 sm:$0xff]   ;;  %v8269_v31 = vld [vmem:[%s12405_s3 + $0x208] ss:$16 sps:$4 sm:$0xff]  }
  0x4d   :  { %2006 = vmatprep.subr.bf16.mxu0 %v8187_v30  ;;  %v9894_v30 = vcombine.low %v9777_v52, %v9780_v54  ;;  %v8287_v52 = vld [vmem:[%s12404_s2 + $0x20] ss:$16 sps:$4 sm:$0xff]   ;;  %v8290_v54 = vld [vmem:[%s12405_s3 + $0x288] ss:$16 sps:$4 sm:$0xff]  }
  0x4f   :  { %2093 = vmatpush1.bf16.msra.mxu1 %v8188_v33  ;;  %v8274_v33 = vld [vmem:[%s12405_s3 + $0x22c] ss:$16 sps:$4 sm:$0xff]  }
  0x50   :  { %2007 = vmatpush1.bf16.msra.mxu0 %v8185_v32  ;;  %2094 = vmatprep.subr.bf16.mxu1 %v8196_v35  ;;  %v8275_v32 = vld [vmem:[%s12405_s3 + $0x600] ss:$16 sps:$4 sm:$0xff]   ;;  %v8283_v35 = vld [vmem:[%s12404_s2 + $0x4] ss:$16 sps:$4 sm:$0xff]  }
  0x51   :  { %2008 = vmatprep.subr.bf16.mxu0 %v8193_v34  ;;  %v8265_v34 = vld [vmem:[%s12403_s1 + $0xc] ss:$14 sps:$4 sm:$0x33]  }
  0x53   :  { %2095 = vmatpush1.bf16.msra.mxu1 %v8194_v37  ;;  %v8272_v37 = vld [vmem:[%s12405_s3 + $0x228] ss:$16 sps:$4 sm:$0xff]  }
  0x54   :  { %2009 = vmatpush1.bf16.msra.mxu0 %v8191_v36  ;;  %2096 = vmatprep.subr.bf16.mxu1 %v8202_v39  ;;  %v8268_v36 = vld [vmem:[%s12403_s1 + $0x28] ss:$14 sps:$4 sm:$0x33]   ;;  %v9404_v39 = vmov 0  }
  0x55   :  { %2010 = vmatprep.subr.bf16.mxu0 %v8199_v38  ;;  %v8280_v38 = vld [vmem:[%s12405_s3 + $0x24c] ss:$16 sps:$4 sm:$0xff]  }
  0x57   :  { %2097 = vmatpush1.bf16.msra.mxu1 %v8200_v41  ;;  %v8278_v41 = vld [vmem:[%s12405_s3 + $0x248] ss:$16 sps:$4 sm:$0xff]  }
  0x58   :  { %2011 = vmatpush1.bf16.msra.mxu0 %v8197_v40  ;;  %2098 = vmatprep.subr.bf16.mxu1 %v8208_v43  ;;  %v906_v40 = vrot.slane %v8265_v34, %v9602_v53  ;;  %v8281_v43 = vld [vmem:[%s12404_s2] ss:$16 sps:$4 sm:$0xff]   ;;  %v8352_v34 = vld [vmem:[%s12405_s3 + $0x3cc] ss:$16 sps:$4 sm:$0xff]  }
  0x59   :  { %2012 = vmatprep.subr.bf16.mxu0 %v8205_v42  ;;  %v8286_v42 = vld [vmem:[%s12405_s3 + $0x26c] ss:$16 sps:$4 sm:$0xff]  }
  0x5b   :  { %2099 = vmatpush1.bf16.msra.mxu1 %v8206_v45  ;;  %v8289_v45 = vld [vmem:[%s12404_s2 + $0x24] ss:$16 sps:$4 sm:$0xff]  }
  0x5c   :  { %2013 = vmatpush1.bf16.msra.mxu0 %v8203_v44  ;;  %2100 = vmatprep.subr.bf16.mxu1 %v8214_v48  ;;  %v8379_v48 = vld [vmem:[%s12402_s0 + $0x4c] ss:$38 sps:$4 sm:$0xff]  }
  0x5d   :  { %2014 = vmatprep.subr.bf16.mxu0 %v8211_v47  ;;  %v8377_v47 = vld [vmem:[%s12402_s0] ss:$38 sps:$4 sm:$0xff]  }
  0x5e   :  { %v9953_v50 = vrot.slane %v8377_v47, %v9602_v53  ;;  %v8370_v47 = vld [vmem:[%s12405_s3 + $0x42c] ss:$16 sps:$4 sm:$0xff]  }
  0x5f   :  { %2101 = vmatpush1.bf16.msra.mxu1 %v8212_v55  ;;  %v8295_v55 = vld [vmem:[%s12404_s2 + $0x44] ss:$16 sps:$4 sm:$0xff]  }
  0x60   :  { %2015 = vmatpush1.bf16.msra.mxu0 %v8209_v51  ;;  %2102 = vmatprep.subr.bf16.mxu1 %v8220_v57  ;;  %v9956_v51 = vrot.slane %v8379_v48, %v9602_v53  ;;  %v8298_v57 = vld [vmem:[%s12405_s3 + $0x2ac] ss:$16 sps:$4 sm:$0xff]   ;;  %v8365_v48 = vld [vmem:[%s12404_s2 + $0x1c0] ss:$16 sps:$4 sm:$0xff]  }
  0x61   :  { %2016 = vmatprep.subr.bf16.mxu0 %v8217_v56 }
  0x62   :  { %v9971_v56 = vcombine.high %v9953_v50, %v9956_v51 }
  0x63   :  { %2103 = vmatpush1.bf16.msra.mxu1 %v8218_v60  ;;  %v8296_v60 = vld [vmem:[%s12405_s3 + $0x2a8] ss:$16 sps:$4 sm:$0xff]  }
  0x64   :  { %2017 = vmatpush1.bf16.msra.mxu0 %v8215_v59  ;;  %2104 = vmatprep.subr.bf16.mxu1 %v8226_v62  ;;  %v8293_v59 = vld [vmem:[%s12404_s2 + $0x40] ss:$16 sps:$4 sm:$0xff]   ;;  %v8304_v62 = vld [vmem:[%s12405_s3 + $0x2cc] ss:$16 sps:$4 sm:$0xff]  }
  0x65   :  { %2018 = vmatprep.subr.bf16.mxu0 %v8223_v61  ;;  %v8301_v61 = vld [vmem:[%s12404_s2 + $0x64] ss:$16 sps:$4 sm:$0xff]  }
  0x67   :  { %2105 = vmatpush1.bf16.msra.mxu1 %v8224_v0  ;;  %v8302_v0 = vld [vmem:[%s12405_s3 + $0x2c8] ss:$16 sps:$4 sm:$0xff]  }
  0x68   :  { %2019 = vmatpush1.bf16.msra.mxu0 %v8221_v63  ;;  %2106 = vmatprep.subr.bf16.mxu1 %v8232_v2  ;;  %v8299_v63 = vld [vmem:[%s12404_s2 + $0x60] ss:$16 sps:$4 sm:$0xff]   ;;  %v8310_v2 = vld [vmem:[%s12405_s3 + $0x2ec] ss:$16 sps:$4 sm:$0xff]  }
  0x69   :  { %2020 = vmatprep.subr.bf16.mxu0 %v8229_v1  ;;  %v8307_v1 = vld [vmem:[%s12404_s2 + $0x84] ss:$16 sps:$4 sm:$0xff]  }
  0x6b   :  { %2107 = vmatpush1.bf16.msra.mxu1 %v8230_v4  ;;  %v8308_v4 = vld [vmem:[%s12405_s3 + $0x2e8] ss:$16 sps:$4 sm:$0xff]  }
  0x6c   :  { %2021 = vmatpush1.bf16.msra.mxu0 %v8227_v3  ;;  %2108 = vmatprep.subr.bf16.mxu1 %v8238_v7  ;;  %v8305_v3 = vld [vmem:[%s12404_s2 + $0x80] ss:$16 sps:$4 sm:$0xff]   ;;  %v8316_v7 = vld [vmem:[%s12405_s3 + $0x30c] ss:$16 sps:$4 sm:$0xff]  }
  0x6d   :  { %2022 = vmatprep.subr.bf16.mxu0 %v8235_v6  ;;  %v8313_v6 = vld [vmem:[%s12404_s2 + $0xa4] ss:$16 sps:$4 sm:$0xff]  }
  0x6f   :  { %2109 = vmatpush1.bf16.msra.mxu1 %v8236_v9  ;;  %v8314_v9 = vld [vmem:[%s12405_s3 + $0x308] ss:$16 sps:$4 sm:$0xff]  }
  0x70   :  { %2023 = vmatpush1.bf16.msra.mxu0 %v8233_v8  ;;  %2110 = vmatprep.subr.bf16.mxu1 %v8244_v11  ;;  %v8311_v8 = vld [vmem:[%s12404_s2 + $0xa0] ss:$16 sps:$4 sm:$0xff]   ;;  %v8322_v11 = vld [vmem:[%s12405_s3 + $0x32c] ss:$16 sps:$4 sm:$0xff]  }
  0x71   :  { %2024 = vmatprep.subr.bf16.mxu0 %v8241_v10  ;;  %v8319_v10 = vld [vmem:[%s12404_s2 + $0xc4] ss:$16 sps:$4 sm:$0xff]  }
  0x73   :  { %2111 = vmatpush1.bf16.msra.mxu1 %v8242_v13  ;;  %v8320_v13 = vld [vmem:[%s12405_s3 + $0x328] ss:$16 sps:$4 sm:$0xff]  }
  0x74   :  { %2025 = vmatpush1.bf16.msra.mxu0 %v8239_v12  ;;  %2112 = vmatprep.subr.bf16.mxu1 %v8250_v15  ;;  %v8317_v12 = vld [vmem:[%s12404_s2 + $0xc0] ss:$16 sps:$4 sm:$0xff]   ;;  %v8328_v15 = vld [vmem:[%s12405_s3 + $0x34c] ss:$16 sps:$4 sm:$0xff]  }
  0x75   :  { %2026 = vmatprep.subr.bf16.mxu0 %v8247_v14  ;;  %v8325_v14 = vld [vmem:[%s12404_s2 + $0xe4] ss:$16 sps:$4 sm:$0xff]  }
  0x77   :  { %2113 = vmatpush1.bf16.msra.mxu1 %v8248_v17  ;;  %v8326_v17 = vld [vmem:[%s12405_s3 + $0x348] ss:$16 sps:$4 sm:$0xff]  }
  0x78   :  { %2027 = vmatpush1.bf16.msra.mxu0 %v8245_v16  ;;  %2114 = vmatprep.subr.bf16.mxu1 %v8256_v20  ;;  %v8323_v16 = vld [vmem:[%s12404_s2 + $0xe0] ss:$16 sps:$4 sm:$0xff]   ;;  %v8334_v20 = vld [vmem:[%s12405_s3 + $0x36c] ss:$16 sps:$4 sm:$0xff]  }
  0x79   :  { %2028 = vmatprep.subr.bf16.mxu0 %v8253_v19  ;;  %v8331_v19 = vld [vmem:[%s12404_s2 + $0x104] ss:$16 sps:$4 sm:$0xff]  }
  0x7b   :  { %2115 = vmatpush1.bf16.msra.mxu1 %v8254_v23  ;;  %v8332_v23 = vld [vmem:[%s12405_s3 + $0x368] ss:$16 sps:$4 sm:$0xff]  }
  0x7c   :  { %2029 = vmatpush1.bf16.msra.mxu0 %v8251_v22  ;;  %2116 = vmatprep.subr.bf16.mxu1 %v8262_v25  ;;  %v8329_v22 = vld [vmem:[%s12404_s2 + $0x100] ss:$16 sps:$4 sm:$0xff]   ;;  %v8340_v25 = vld [vmem:[%s12405_s3 + $0x38c] ss:$16 sps:$4 sm:$0xff]  }
  0x7d   :  { %2030 = vmatprep.subr.bf16.mxu0 %v8259_v24  ;;  %v8337_v24 = vld [vmem:[%s12404_s2 + $0x124] ss:$16 sps:$4 sm:$0xff]  }
  0x7f   :  { %2117 = vmatpush1.bf16.msra.mxu1 %v8260_v27  ;;  %v8338_v27 = vld [vmem:[%s12405_s3 + $0x388] ss:$16 sps:$4 sm:$0xff]  }
  0x80   :  { %2031 = vmatpush1.bf16.msra.mxu0 %v8257_v26  ;;  %2129 = vmatprep.subr.bf16.mxu1 %v8271_v28  ;;  %v8335_v26 = vld [vmem:[%s12404_s2 + $0x120] ss:$16 sps:$4 sm:$0xff]   ;;  %v8343_v28 = vld [vmem:[%s12404_s2 + $0x144] ss:$16 sps:$4 sm:$0xff]  }
  0x81   :  { %2043 = vmatprep.subr.bf16.mxu0 %v8277_v29  ;;  %v8346_v29 = vld [vmem:[%s12405_s3 + $0x3ac] ss:$16 sps:$4 sm:$0xff]  }
  0x82   :  { %2119 = vmatmul.mubr.bf16.vlgmr.msra.gmra.mrb[4].mxu1 %v9677_v18  ;;  %v920_v18 = vrot.slane %v8268_v36, %v9602_v53  ;;  %v8350_v36 = vld [vmem:[%s12405_s3 + $0x3c8] ss:$16 sps:$4 sm:$0xff]  }
  0x83   :  { %2033 = vmatmul.mubr.bf16.vlgmr.msra.gmra.mrb[0].mxu0 %v9894_v30  ;;  %2130 = vmatpush1.bf16.msra.mxu1 %v8269_v31  ;;  %v8341_v31 = vld [vmem:[%s12404_s2 + $0x140] ss:$16 sps:$4 sm:$0xff]  }
  0x84   :  { %2044 = vmatpush1.bf16.msra.mxu0 %v8275_v32  ;;  %2131 = vmatprep.subr.bf16.mxu1 %v8274_v33  ;;  %v9938_v44 = vcombine.low %v906_v40, %v920_v18  ;;  %v8344_v32 = vld [vmem:[%s12405_s3 + $0x3a8] ss:$16 sps:$4 sm:$0xff]   ;;  %v8349_v33 = vld [vmem:[%s12404_s2 + $0x164] ss:$16 sps:$4 sm:$0xff]   ;;  %v8353_v40 = vld [vmem:[%s12404_s2 + $0x180] ss:$16 sps:$4 sm:$0xff]  }
  0x85   :  { %2075 = vmatprep.mubr.bf16.mxu0 %v9404_v39  ;;  %5419 = vmatprep.subr.bf16.mxu0 %v8283_v35  ;;  %v8347_v35 = vld [vmem:[%s12404_s2 + $0x160] ss:$16 sps:$4 sm:$0xff]   ;;  %v8356_v18 = vld [vmem:[%s12405_s3 + $0x3e8] ss:$16 sps:$4 sm:$0xff]  }
  0x86   :  { %2161 = vmatprep.mubr.bf16.mxu1 %v9638_v5  ;;  %v8284_v5 = vld [vmem:[%s12405_s3 + $0x268] ss:$16 sps:$4 sm:$0xff]  }
  0x87   :  { %2132 = vmatpush1.bf16.msra.mxu1 %v8272_v37  ;;  %v8355_v37 = vld [vmem:[%s12404_s2 + $0x184] ss:$16 sps:$4 sm:$0xff]  }
  0x88   :  { %2133 = vmatprep.subr.bf16.mxu1 %v8280_v38  ;;  %v8358_v38 = vld [vmem:[%s12405_s3 + $0x3ec] ss:$16 sps:$4 sm:$0xff]  }
  0x8b   :  { %2134 = vmatpush1.bf16.msra.mxu1 %v8278_v41  ;;  %v8361_v41 = vld [vmem:[%s12404_s2 + $0x1a4] ss:$16 sps:$4 sm:$0xff]  }
  0x8c   :  { %2135 = vmatprep.subr.bf16.mxu1 %v8286_v42  ;;  %v8364_v42 = vld [vmem:[%s12405_s3 + $0x40c] ss:$16 sps:$4 sm:$0xff]  }
  0x8f   :  { %7256 = vmatmul.mubr.msk.bf16.vlgmr.msra.gmra.mrb[0].mxu0 %vm1910_vm0, %v9938_v44  ;;  %2136 = vmatpush1.bf16.msra.mxu1 %v8284_v5  ;;  %v8362_v5 = vld [vmem:[%s12405_s3 + $0x408] ss:$16 sps:$4 sm:$0xff]  }
  0x90   :  { %5420 = vmatpush1.bf16.msra.mxu0 %v8281_v43  ;;  %2137 = vmatprep.subr.bf16.mxu1 %v8292_v49  ;;  %v8359_v43 = vld [vmem:[%s12404_s2 + $0x1a0] ss:$16 sps:$4 sm:$0xff]   ;;  %v8368_v49 = vld [vmem:[%s12405_s3 + $0x428] ss:$16 sps:$4 sm:$0xff]  }
  0x91   :  { %5421 = vmatprep.subr.bf16.mxu0 %v8289_v45  ;;  %5451 = vmatprep.mubr.bf16.mxu0 %v9971_v56  ;;  %v8367_v45 = vld [vmem:[%s12404_s2 + $0x1c4] ss:$16 sps:$4 sm:$0xff]  }
  0x93   :  { %2138 = vmatpush1.bf16.msra.mxu1 %v8290_v54  ;;  %v8471_v54 = vld [vmem:[%s12402_s0 + $0x4] ss:$38 sps:$4 sm:$0xff]  }
  0x94   :  { %5422 = vmatpush1.bf16.msra.mxu0 %v8287_v52  ;;  %2139 = vmatprep.subr.bf16.mxu1 %v8298_v57  ;;  %v8373_v52 = vld [vmem:[%s12404_s2 + $0x1e4] ss:$16 sps:$4 sm:$0xff]   ;;  %v8371_v57 = vld [vmem:[%s12404_s2 + $0x1e0] ss:$16 sps:$4 sm:$0xff]  }
  0x95   :  { %5423 = vmatprep.subr.bf16.mxu0 %v8295_v55  ;;  %v8472_v55 = vld [vmem:[%s12402_s0 + $0x50] ss:$38 sps:$4 sm:$0xff]  }
  0x97   :  { %2140 = vmatpush1.bf16.msra.mxu1 %v8296_v60  ;;  %v8386_v60 = vld [vmem:[%s12405_s3 + $0x46c] ss:$16 sps:$4 sm:$0xff]  }
  0x98   :  { %5424 = vmatpush1.bf16.msra.mxu0 %v8293_v59  ;;  %2141 = vmatprep.subr.bf16.mxu1 %v8304_v62  ;;  %v8374_v59 = vld [vmem:[%s12405_s3 + $0x448] ss:$16 sps:$4 sm:$0xff]   ;;  %v10157_v62 = vrot.slane %v8472_v55, %v9602_v53 }
  0x99   :  { %5425 = vmatprep.subr.bf16.mxu0 %v8301_v61  ;;  %v10154_v61 = vrot.slane %v8471_v54, %v9602_v53  ;;  %v8453_v54 = vld [vmem:[%s12404_s2 + $0x380] ss:$16 sps:$4 sm:$0xff]   ;;  %v8456_v55 = vld [vmem:[%s12405_s3 + $0x5e8] ss:$16 sps:$4 sm:$0xff]  }
  0x9b   :  { %2142 = vmatpush1.bf16.msra.mxu1 %v8302_v0  ;;  %v10164_v0 = vcombine.low %v9953_v50, %v9956_v51  ;;  %v10177_v50 = vcombine.high %v10154_v61, %v10157_v62  ;;  %v8387_v51 = vld [vmem:[%s12404_s2 + $0x220] ss:$16 sps:$4 sm:$0xff]  }
  0x9c   :  { %5426 = vmatpush1.bf16.msra.mxu0 %v8299_v63  ;;  %2143 = vmatprep.subr.bf16.mxu1 %v8310_v2  ;;  %v8381_v63 = vld [vmem:[%s12404_s2 + $0x200] ss:$16 sps:$4 sm:$0xff]   ;;  %v8389_v2 = vld [vmem:[%s12404_s2 + $0x224] ss:$16 sps:$4 sm:$0xff]  }
  0x9d   :  { %5427 = vmatprep.subr.bf16.mxu0 %v8307_v1  ;;  %v8384_v1 = vld [vmem:[%s12405_s3 + $0x468] ss:$16 sps:$4 sm:$0xff]  }
  0x9f   :  { %2144 = vmatpush1.bf16.msra.mxu1 %v8308_v4  ;;  %v8390_v4 = vld [vmem:[%s12405_s3 + $0x488] ss:$16 sps:$4 sm:$0xff]  }
  0xa0   :  { %5428 = vmatpush1.bf16.msra.mxu0 %v8305_v3  ;;  %2145 = vmatprep.subr.bf16.mxu1 %v8316_v7  ;;  %v8392_v3 = vld [vmem:[%s12405_s3 + $0x48c] ss:$16 sps:$4 sm:$0xff]  }
  0xa1   :  { %5429 = vmatprep.subr.bf16.mxu0 %v8313_v6  ;;  %v8395_v6 = vld [vmem:[%s12404_s2 + $0x244] ss:$16 sps:$4 sm:$0xff]   ;;  %v8398_v7 = vld [vmem:[%s12405_s3 + $0x4ac] ss:$16 sps:$4 sm:$0xff]  }
  0xa3   :  { %2146 = vmatpush1.bf16.msra.mxu1 %v8314_v9  ;;  %v8396_v9 = vld [vmem:[%s12405_s3 + $0x4a8] ss:$16 sps:$4 sm:$0xff]  }
  0xa4   :  { %5430 = vmatpush1.bf16.msra.mxu0 %v8311_v8  ;;  %2147 = vmatprep.subr.bf16.mxu1 %v8322_v11  ;;  %v8393_v8 = vld [vmem:[%s12404_s2 + $0x240] ss:$16 sps:$4 sm:$0xff]   ;;  %v8404_v11 = vld [vmem:[%s12405_s3 + $0x4cc] ss:$16 sps:$4 sm:$0xff]  }
  0xa5   :  { %5431 = vmatprep.subr.bf16.mxu0 %v8319_v10  ;;  %v8401_v10 = vld [vmem:[%s12404_s2 + $0x264] ss:$16 sps:$4 sm:$0xff]  }
  0xa7   :  { %2148 = vmatpush1.bf16.msra.mxu1 %v8320_v13  ;;  %v8402_v13 = vld [vmem:[%s12405_s3 + $0x4c8] ss:$16 sps:$4 sm:$0xff]  }
  0xa8   :  { %5432 = vmatpush1.bf16.msra.mxu0 %v8317_v12  ;;  %2149 = vmatprep.subr.bf16.mxu1 %v8328_v15  ;;  %v8399_v12 = vld [vmem:[%s12404_s2 + $0x260] ss:$16 sps:$4 sm:$0xff]   ;;  %v8410_v15 = vld [vmem:[%s12405_s3 + $0x4ec] ss:$16 sps:$4 sm:$0xff]  }
  0xa9   :  { %5433 = vmatprep.subr.bf16.mxu0 %v8325_v14  ;;  %v8407_v14 = vld [vmem:[%s12404_s2 + $0x284] ss:$16 sps:$4 sm:$0xff]  }
  0xab   :  { %2150 = vmatpush1.bf16.msra.mxu1 %v8326_v17  ;;  %v8408_v17 = vld [vmem:[%s12405_s3 + $0x4e8] ss:$16 sps:$4 sm:$0xff]  }
  0xac   :  { %5434 = vmatpush1.bf16.msra.mxu0 %v8323_v16  ;;  %2151 = vmatprep.subr.bf16.mxu1 %v8334_v20  ;;  %v8405_v16 = vld [vmem:[%s12404_s2 + $0x280] ss:$16 sps:$4 sm:$0xff]   ;;  %v8416_v20 = vld [vmem:[%s12405_s3 + $0x50c] ss:$16 sps:$4 sm:$0xff]  }
  0xad   :  { %5435 = vmatprep.subr.bf16.mxu0 %v8331_v19  ;;  %v8413_v19 = vld [vmem:[%s12404_s2 + $0x2a4] ss:$16 sps:$4 sm:$0xff]  }
  0xaf   :  { %2152 = vmatpush1.bf16.msra.mxu1 %v8332_v23  ;;  %v8414_v23 = vld [vmem:[%s12405_s3 + $0x508] ss:$16 sps:$4 sm:$0xff]  }
  0xb0   :  { %5436 = vmatpush1.bf16.msra.mxu0 %v8329_v22  ;;  %2153 = vmatprep.subr.bf16.mxu1 %v8340_v25  ;;  %v8411_v22 = vld [vmem:[%s12404_s2 + $0x2a0] ss:$16 sps:$4 sm:$0xff]   ;;  %v8422_v25 = vld [vmem:[%s12405_s3 + $0x52c] ss:$16 sps:$4 sm:$0xff]  }
  0xb1   :  { %5437 = vmatprep.subr.bf16.mxu0 %v8337_v24  ;;  %v8419_v24 = vld [vmem:[%s12404_s2 + $0x2c4] ss:$16 sps:$4 sm:$0xff]  }
  0xb3   :  { %2154 = vmatpush1.bf16.msra.mxu1 %v8338_v27  ;;  %v8420_v27 = vld [vmem:[%s12405_s3 + $0x528] ss:$16 sps:$4 sm:$0xff]  }
  0xb4   :  { %5438 = vmatpush1.bf16.msra.mxu0 %v8335_v26  ;;  %2155 = vmatprep.subr.bf16.mxu1 %v8346_v29  ;;  %v8417_v26 = vld [vmem:[%s12404_s2 + $0x2c0] ss:$16 sps:$4 sm:$0xff]   ;;  %v8428_v29 = vld [vmem:[%s12405_s3 + $0x54c] ss:$16 sps:$4 sm:$0xff]  }
  0xb5   :  { %5439 = vmatprep.subr.bf16.mxu0 %v8343_v28  ;;  %v8425_v28 = vld [vmem:[%s12404_s2 + $0x2e4] ss:$16 sps:$4 sm:$0xff]  }
  0xb7   :  { %2156 = vmatpush1.bf16.msra.mxu1 %v8344_v32  ;;  %v8426_v32 = vld [vmem:[%s12405_s3 + $0x548] ss:$16 sps:$4 sm:$0xff]  }
  0xb8   :  { %5440 = vmatpush1.bf16.msra.mxu0 %v8341_v31  ;;  %2157 = vmatprep.subr.bf16.mxu1 %v8352_v34  ;;  %v8423_v31 = vld [vmem:[%s12404_s2 + $0x2e0] ss:$16 sps:$4 sm:$0xff]   ;;  %v8434_v34 = vld [vmem:[%s12405_s3 + $0x56c] ss:$16 sps:$4 sm:$0xff]  }
  0xb9   :  { %5441 = vmatprep.subr.bf16.mxu0 %v8349_v33  ;;  %v8431_v33 = vld [vmem:[%s12404_s2 + $0x304] ss:$16 sps:$4 sm:$0xff]  }
  0xbb   :  { %2158 = vmatpush1.bf16.msra.mxu1 %v8350_v36  ;;  %v8432_v36 = vld [vmem:[%s12405_s3 + $0x568] ss:$16 sps:$4 sm:$0xff]  }
  0xbc   :  { %5442 = vmatpush1.bf16.msra.mxu0 %v8347_v35  ;;  %2159 = vmatprep.subr.bf16.mxu1 %v8358_v38  ;;  %v8429_v35 = vld [vmem:[%s12404_s2 + $0x300] ss:$16 sps:$4 sm:$0xff]   ;;  %v8440_v38 = vld [vmem:[%s12405_s3 + $0x58c] ss:$16 sps:$4 sm:$0xff]  }
  0xbd   :  { %5443 = vmatprep.subr.bf16.mxu0 %v8355_v37  ;;  %v8437_v37 = vld [vmem:[%s12404_s2 + $0x324] ss:$16 sps:$4 sm:$0xff]  }
  0xbf   :  { %2160 = vmatpush1.bf16.msra.mxu1 %v8356_v18  ;;  %v8438_v18 = vld [vmem:[%s12405_s3 + $0x588] ss:$16 sps:$4 sm:$0xff]  }
  0xc0   :  { %5444 = vmatpush1.bf16.msra.mxu0 %v8353_v40  ;;  %2172 = vmatprep.subr.bf16.mxu1 %v8364_v42  ;;  %v8435_v40 = vld [vmem:[%s12404_s2 + $0x320] ss:$16 sps:$4 sm:$0xff]   ;;  %v8446_v42 = vld [vmem:[%s12405_s3 + $0x5ac] ss:$16 sps:$4 sm:$0xff]  }
  0xc1   :  { %5445 = vmatprep.subr.bf16.mxu0 %v8361_v41  ;;  %v8443_v41 = vld [vmem:[%s12404_s2 + $0x344] ss:$16 sps:$4 sm:$0xff]  }
  0xc2   :  { %2162 = vmatmul.mubr.bf16.vlgmr.msra.gmra.mrb[4].mxu1 %v9685_v21  ;;  %v8376_v21 = vld [vmem:[%s12405_s3 + $0x44c] ss:$16 sps:$4 sm:$0xff]  }
  0xc3   :  { %2173 = vmatpush1.bf16.msra.mxu1 %v8362_v5  ;;  %2204 = vmatprep.mubr.bf16.mxu1 %v9793_v58  ;;  %v8383_v58 = vld [vmem:[%s12404_s2 + $0x204] ss:$16 sps:$4 sm:$0xff]   ;;  %v8444_v5 = vld [vmem:[%s12405_s3 + $0x5a8] ss:$16 sps:$4 sm:$0xff]  }
  0xc4   :  { %5446 = vmatpush1.bf16.msra.mxu0 %v8359_v43  ;;  %2174 = vmatprep.subr.bf16.mxu1 %v8370_v47  ;;  %v8441_v43 = vld [vmem:[%s12404_s2 + $0x340] ss:$16 sps:$4 sm:$0xff]   ;;  %v8452_v47 = vld [vmem:[%s12405_s3 + $0x5cc] ss:$16 sps:$4 sm:$0xff]  }
  0xc5   :  { %5447 = vmatprep.subr.bf16.mxu0 %v8367_v45  ;;  %v8449_v45 = vld [vmem:[%s12404_s2 + $0x364] ss:$16 sps:$4 sm:$0xff]  }
  0xc7   :  { %2175 = vmatpush1.bf16.msra.mxu1 %v8368_v49  ;;  %v8450_v49 = vld [vmem:[%s12405_s3 + $0x5c8] ss:$16 sps:$4 sm:$0xff]  }
  0xc8   :  { %5448 = vmatpush1.bf16.msra.mxu0 %v8365_v48  ;;  %2176 = vmatprep.subr.bf16.mxu1 %v8376_v21  ;;  %v8447_v48 = vld [vmem:[%s12404_s2 + $0x360] ss:$16 sps:$4 sm:$0xff]   ;;  %v8458_v21 = vld [vmem:[%s12405_s3 + $0x5ec] ss:$16 sps:$4 sm:$0xff]  }
  0xc9   :  { %5449 = vmatprep.subr.bf16.mxu0 %v8373_v52  ;;  %v8455_v52 = vld [vmem:[%s12404_s2 + $0x384] ss:$16 sps:$4 sm:$0xff]  }
  0xcb   :  { %2177 = vmatpush1.bf16.msra.mxu1 %v8374_v59  ;;  %v8464_v59 = vld [vmem:[%s12405_s3 + $0x60c] ss:$16 sps:$4 sm:$0xff]  }
  0xcc   :  { %5450 = vmatpush1.bf16.msra.mxu0 %v8371_v57  ;;  %2178 = vmatprep.subr.bf16.mxu1 %v8386_v60  ;;  %v8461_v57 = vld [vmem:[%s12404_s2 + $0x3a4] ss:$16 sps:$4 sm:$0xff]   ;;  %v8462_v60 = vld [vmem:[%s12405_s3 + $0x608] ss:$16 sps:$4 sm:$0xff]  }
  0xcd   :  { %5462 = vmatprep.subr.bf16.mxu0 %v8383_v58  ;;  %v8459_v58 = vld [vmem:[%s12404_s2 + $0x3a0] ss:$16 sps:$4 sm:$0xff]  }
  0xcf   :  { %5452 = vmatmul.mubr.bf16.vlgmr.msra.gmra.mrb[0].mxu0 %v10164_v0  ;;  %2179 = vmatpush1.bf16.msra.mxu1 %v8384_v1  ;;  %v8478_v1 = vld [vmem:[%s12404_s2 + $0xc] ss:$16 sps:$4 sm:$0xff]  }
  0xd0   :  { %5463 = vmatpush1.bf16.msra.mxu0 %v8381_v63  ;;  %2180 = vmatprep.subr.bf16.mxu1 %v8392_v3  ;;  %v8467_v63 = vld [vmem:[%s12404_s2 + $0x3c4] ss:$16 sps:$4 sm:$0xff]  }
  0xd1   :  { %5464 = vmatprep.subr.bf16.mxu0 %v8389_v2  ;;  %5494 = vmatprep.mubr.bf16.mxu0 %v10177_v50  ;;  %v8465_v2 = vld [vmem:[%s12404_s2 + $0x3c0] ss:$16 sps:$4 sm:$0xff]   ;;  %v8470_v3 = vld [vmem:[%s12404_s2 + $0x3e4] ss:$16 sps:$4 sm:$0xff]  }
  0xd3   :  { %2181 = vmatpush1.bf16.msra.mxu1 %v8390_v4  ;;  %v8468_v4 = vld [vmem:[%s12404_s2 + $0x3e0] ss:$16 sps:$4 sm:$0xff]  }
  0xd4   :  { %5465 = vmatpush1.bf16.msra.mxu0 %v8387_v51  ;;  %2182 = vmatprep.subr.bf16.mxu1 %v8398_v7  ;;  %v8569_v51 = vld [vmem:[%s12402_s0 + $0x8] ss:$38 sps:$4 sm:$0xff]  }
  0xd5   :  { %5466 = vmatprep.subr.bf16.mxu0 %v8395_v6  ;;  %v8475_v6 = vld [vmem:[%s12404_s2 + $0x404] ss:$16 sps:$4 sm:$0xff]   ;;  %v10358_v7 = vrot.slane %v8569_v51, %v9602_v53  ;;  %v8550_v51 = vld [vmem:[%s12404_s2 + $0x18c] ss:$16 sps:$4 sm:$0xff]  }
  0xd7   :  { %2183 = vmatpush1.bf16.msra.mxu1 %v8396_v9  ;;  %v10365_v9 = vcombine.low %v10154_v61, %v10157_v62  ;;  %v8479_v62 = vld [vmem:[%s12404_s2 + $0x420] ss:$16 sps:$4 sm:$0xff]  }
  0xd8   :  { %5467 = vmatpush1.bf16.msra.mxu0 %v8393_v8  ;;  %2184 = vmatprep.subr.bf16.mxu1 %v8404_v11  ;;  %v8476_v11 = vld [vmem:[%s12404_s2 + $0x8] ss:$16 sps:$4 sm:$0xff]  }
  0xd9   :  { %5468 = vmatprep.subr.bf16.mxu0 %v8401_v10  ;;  %v8473_v10 = vld [vmem:[%s12404_s2 + $0x400] ss:$16 sps:$4 sm:$0xff]  }
  0xdb   :  { %2185 = vmatpush1.bf16.msra.mxu1 %v8402_v13  ;;  %v8484_v13 = vld [vmem:[%s12404_s2 + $0x2c] ss:$16 sps:$4 sm:$0xff]  }
  0xdc   :  { %5469 = vmatpush1.bf16.msra.mxu0 %v8399_v12  ;;  %2186 = vmatprep.subr.bf16.mxu1 %v8410_v15  ;;  %v8481_v12 = vld [vmem:[%s12404_s2 + $0x424] ss:$16 sps:$4 sm:$0xff]  }
  0xdd   :  { %5470 = vmatprep.subr.bf16.mxu0 %v8407_v14  ;;  %v8482_v14 = vld [vmem:[%s12404_s2 + $0x28] ss:$16 sps:$4 sm:$0xff]   ;;  %v8487_v15 = vld [vmem:[%s12404_s2 + $0x444] ss:$16 sps:$4 sm:$0xff]  }
  0xdf   :  { %2187 = vmatpush1.bf16.msra.mxu1 %v8408_v17  ;;  %v8488_v17 = vld [vmem:[%s12404_s2 + $0x48] ss:$16 sps:$4 sm:$0xff]  }
  0xe0   :  { %5471 = vmatpush1.bf16.msra.mxu0 %v8405_v16  ;;  %2188 = vmatprep.subr.bf16.mxu1 %v8416_v20  ;;  %v8485_v16 = vld [vmem:[%s12404_s2 + $0x440] ss:$16 sps:$4 sm:$0xff]  }
  0xe1   :  { %5472 = vmatprep.subr.bf16.mxu0 %v8413_v19  ;;  %v8493_v19 = vld [vmem:[%s12404_s2 + $0x464] ss:$16 sps:$4 sm:$0xff]  }
  0xe3   :  { %2189 = vmatpush1.bf16.msra.mxu1 %v8414_v23 }
  0xe4   :  { %5473 = vmatpush1.bf16.msra.mxu0 %v8411_v22  ;;  %2190 = vmatprep.subr.bf16.mxu1 %v8422_v25  ;;  %v8494_v25 = vld [vmem:[%s12404_s2 + $0x68] ss:$16 sps:$4 sm:$0xff]  }
  0xe5   :  { %5474 = vmatprep.subr.bf16.mxu0 %v8419_v24  ;;  %v8491_v24 = vld [vmem:[%s12404_s2 + $0x460] ss:$16 sps:$4 sm:$0xff]  }
  0xe7   :  { %2191 = vmatpush1.bf16.msra.mxu1 %v8420_v27  ;;  %v8499_v27 = vld [vmem:[%s12404_s2 + $0x484] ss:$16 sps:$4 sm:$0xff]  }
  0xe8   :  { %5475 = vmatpush1.bf16.msra.mxu0 %v8417_v26  ;;  %2192 = vmatprep.subr.bf16.mxu1 %v8428_v29  ;;  %v8497_v29 = vld [vmem:[%s12404_s2 + $0x480] ss:$16 sps:$4 sm:$0xff]  }
  0xe9   :  { %5476 = vmatprep.subr.bf16.mxu0 %v8425_v28  ;;  %v8502_v28 = vld [vmem:[%s12404_s2 + $0x8c] ss:$16 sps:$4 sm:$0xff]  }
  0xeb   :  { %2193 = vmatpush1.bf16.msra.mxu1 %v8426_v32  ;;  %v8505_v32 = vld [vmem:[%s12404_s2 + $0x4a4] ss:$16 sps:$4 sm:$0xff]  }
  0xec   :  { %5477 = vmatpush1.bf16.msra.mxu0 %v8423_v31  ;;  %2194 = vmatprep.subr.bf16.mxu1 %v8434_v34  ;;  %v8500_v31 = vld [vmem:[%s12404_s2 + $0x88] ss:$16 sps:$4 sm:$0xff]   ;;  %v8503_v34 = vld [vmem:[%s12404_s2 + $0x4a0] ss:$16 sps:$4 sm:$0xff]  }
  0xed   :  { %5478 = vmatprep.subr.bf16.mxu0 %v8431_v33  ;;  %v8508_v33 = vld [vmem:[%s12404_s2 + $0xac] ss:$16 sps:$4 sm:$0xff]  }
  0xef   :  { %2195 = vmatpush1.bf16.msra.mxu1 %v8432_v36  ;;  %v8511_v36 = vld [vmem:[%s12404_s2 + $0x4c4] ss:$16 sps:$4 sm:$0xff]  }
  0xf0   :  { %5479 = vmatpush1.bf16.msra.mxu0 %v8429_v35  ;;  %2196 = vmatprep.subr.bf16.mxu1 %v8440_v38  ;;  %v8506_v35 = vld [vmem:[%s12404_s2 + $0xa8] ss:$16 sps:$4 sm:$0xff]   ;;  %v8509_v38 = vld [vmem:[%s12404_s2 + $0x4c0] ss:$16 sps:$4 sm:$0xff]  }
  0xf1   :  { %5480 = vmatprep.subr.bf16.mxu0 %v8437_v37  ;;  %v8514_v37 = vld [vmem:[%s12404_s2 + $0xcc] ss:$16 sps:$4 sm:$0xff]  }
  0xf3   :  { %2197 = vmatpush1.bf16.msra.mxu1 %v8438_v18  ;;  %v8517_v18 = vld [vmem:[%s12404_s2 + $0x4e4] ss:$16 sps:$4 sm:$0xff]  }
  0xf4   :  { %5481 = vmatpush1.bf16.msra.mxu0 %v8435_v40  ;;  %2198 = vmatprep.subr.bf16.mxu1 %v8446_v42  ;;  %v8512_v40 = vld [vmem:[%s12404_s2 + $0xc8] ss:$16 sps:$4 sm:$0xff]   ;;  %v8515_v42 = vld [vmem:[%s12404_s2 + $0x4e0] ss:$16 sps:$4 sm:$0xff]  }
  0xf5   :  { %5482 = vmatprep.subr.bf16.mxu0 %v8443_v41  ;;  %v8520_v41 = vld [vmem:[%s12404_s2 + $0xec] ss:$16 sps:$4 sm:$0xff]  }
  0xf7   :  { %2199 = vmatpush1.bf16.msra.mxu1 %v8444_v5  ;;  %v8523_v5 = vld [vmem:[%s12404_s2 + $0x504] ss:$16 sps:$4 sm:$0xff]  }
  0xf8   :  { %5483 = vmatpush1.bf16.msra.mxu0 %v8441_v43  ;;  %2200 = vmatprep.subr.bf16.mxu1 %v8452_v47  ;;  %v8518_v43 = vld [vmem:[%s12404_s2 + $0xe8] ss:$16 sps:$4 sm:$0xff]   ;;  %v8521_v47 = vld [vmem:[%s12404_s2 + $0x500] ss:$16 sps:$4 sm:$0xff]  }
  0xf9   :  { %5484 = vmatprep.subr.bf16.mxu0 %v8449_v45  ;;  %v8526_v45 = vld [vmem:[%s12404_s2 + $0x10c] ss:$16 sps:$4 sm:$0xff]  }
  0xfb   :  { %2201 = vmatpush1.bf16.msra.mxu1 %v8450_v49  ;;  %v8529_v49 = vld [vmem:[%s12404_s2 + $0x524] ss:$16 sps:$4 sm:$0xff]  }
  0xfc   :  { %5485 = vmatpush1.bf16.msra.mxu0 %v8447_v48  ;;  %2202 = vmatprep.subr.bf16.mxu1 %v8458_v21  ;;  %v8524_v48 = vld [vmem:[%s12404_s2 + $0x108] ss:$16 sps:$4 sm:$0xff]   ;;  %v8527_v21 = vld [vmem:[%s12404_s2 + $0x520] ss:$16 sps:$4 sm:$0xff]  }
  0xfd   :  { %5486 = vmatprep.subr.bf16.mxu0 %v8455_v52  ;;  %v8532_v52 = vld [vmem:[%s12404_s2 + $0x12c] ss:$16 sps:$4 sm:$0xff]  }
  0xff   :  { %2203 = vmatpush1.bf16.msra.mxu1 %v8456_v55  ;;  %v8535_v55 = vld [vmem:[%s12404_s2 + $0x544] ss:$16 sps:$4 sm:$0xff]  }
 0x100   :  { %5487 = vmatpush1.bf16.msra.mxu0 %v8453_v54  ;;  %2215 = vmatprep.subr.bf16.mxu1 %v8464_v59  ;;  %v8530_v54 = vld [vmem:[%s12404_s2 + $0x128] ss:$16 sps:$4 sm:$0xff]   ;;  %v8533_v59 = vld [vmem:[%s12404_s2 + $0x540] ss:$16 sps:$4 sm:$0xff]  }
 0x101   :  { %5488 = vmatprep.subr.bf16.mxu0 %v8461_v57  ;;  %v8538_v57 = vld [vmem:[%s12404_s2 + $0x14c] ss:$16 sps:$4 sm:$0xff]  }
 0x102   :  { %2205 = vmatmul.mubr.bf16.vlgmr.msra.gmra.mrb[4].mxu1 %v9894_v30  ;;  %v8571_v30 = vld [vmem:[%s12402_s0 + $0x54] ss:$38 sps:$4 sm:$0xff]  }
 0x103   :  { %2216 = vmatpush1.bf16.msra.mxu1 %v8462_v60  ;;  %2247 = vmatprep.mubr.bf16.mxu1 %v9404_v39  ;;  %v10361_v8 = vrot.slane %v8571_v30, %v9602_v53  ;;  %v8541_v60 = vld [vmem:[%s12404_s2 + $0x564] ss:$16 sps:$4 sm:$0xff]   ;;  %v8545_v30 = vld [vmem:[%s12404_s2 + $0x580] ss:$16 sps:$4 sm:$0xff]  }
 0x104   :  { %5489 = vmatpush1.bf16.msra.mxu0 %v8459_v58  ;;  %5849 = vmatprep.subr.bf16.mxu1 %v8478_v1  ;;  %v8536_v58 = vld [vmem:[%s12404_s2 + $0x148] ss:$16 sps:$4 sm:$0xff]   ;;  %v8539_v1 = vld [vmem:[%s12404_s2 + $0x560] ss:$16 sps:$4 sm:$0xff]  }
 0x105   :  { %5490 = vmatprep.subr.bf16.mxu0 %v8467_v63  ;;  %v10381_v61 = vcombine.high %v10358_v7, %v10361_v8  ;;  %v8544_v63 = vld [vmem:[%s12404_s2 + $0x16c] ss:$16 sps:$4 sm:$0xff]  }
 0x108   :  { %5491 = vmatpush1.bf16.msra.mxu0 %v8465_v2  ;;  %v8542_v2 = vld [vmem:[%s12404_s2 + $0x168] ss:$16 sps:$4 sm:$0xff]  }
 0x109   :  { %5492 = vmatprep.subr.bf16.mxu0 %v8470_v3  ;;  %v8547_v3 = vld [vmem:[%s12404_s2 + $0x584] ss:$16 sps:$4 sm:$0xff]  }
 0x10c   :  { %5493 = vmatpush1.bf16.msra.mxu0 %v8468_v4  ;;  %v8548_v4 = vld [vmem:[%s12404_s2 + $0x188] ss:$16 sps:$4 sm:$0xff]  }
 0x10d   :  { %5505 = vmatprep.subr.bf16.mxu0 %v8475_v6  ;;  %v8553_v6 = vld [vmem:[%s12404_s2 + $0x5a4] ss:$16 sps:$4 sm:$0xff]  }
 0x10e   :  { %7257 = vmatmul.mubr.msk.bf16.vlgmr.msra.gmra.mrb[4].mxu1 %vm1910_vm0, %v9938_v44  ;;  %v8490_v44 = vld [vmem:[%s12404_s2 + $0x4c] ss:$16 sps:$4 sm:$0xff]  }
 0x10f   :  { %5495 = vmatmul.mubr.bf16.vlgmr.msra.gmra.mrb[0].mxu0 %v10365_v9  ;;  %5850 = vmatpush1.bf16.msra.mxu1 %v8476_v11  ;;  %v8551_v11 = vld [vmem:[%s12404_s2 + $0x5a0] ss:$16 sps:$4 sm:$0xff]  }
 0x110   :  { %5506 = vmatpush1.bf16.msra.mxu0 %v8473_v10  ;;  %5851 = vmatprep.subr.bf16.mxu1 %v8484_v13  ;;  %v8556_v10 = vld [vmem:[%s12404_s2 + $0x1ac] ss:$16 sps:$4 sm:$0xff]   ;;  %v8559_v13 = vld [vmem:[%s12404_s2 + $0x5c4] ss:$16 sps:$4 sm:$0xff]  }
 0x111   :  { %5507 = vmatprep.subr.bf16.mxu0 %v8481_v12  ;;  %5537 = vmatprep.mubr.bf16.mxu0 %v10381_v61  ;;  %v8554_v12 = vld [vmem:[%s12404_s2 + $0x1a8] ss:$16 sps:$4 sm:$0xff]  }
 0x112   :  { %5881 = vmatprep.mubr.bf16.mxu1 %v9971_v56  ;;  %v8496_v56 = vld [vmem:[%s12404_s2 + $0x6c] ss:$16 sps:$4 sm:$0xff]  }
 0x113   :  { %5852 = vmatpush1.bf16.msra.mxu1 %v8482_v14  ;;  %v8557_v14 = vld [vmem:[%s12404_s2 + $0x5c0] ss:$16 sps:$4 sm:$0xff]  }
 0x114   :  { %5508 = vmatpush1.bf16.msra.mxu0 %v8479_v62  ;;  %5853 = vmatprep.subr.bf16.mxu1 %v8490_v44  ;;  %v8562_v62 = vld [vmem:[%s12404_s2 + $0x1cc] ss:$16 sps:$4 sm:$0xff]   ;;  %v8565_v44 = vld [vmem:[%s12404_s2 + $0x5e4] ss:$16 sps:$4 sm:$0xff]  }
 0x115   :  { %5509 = vmatprep.subr.bf16.mxu0 %v8487_v15  ;;  %v10412_v20 = vpop.f32.mrb[0].mxu1  ;;  %v8560_v15 = vld [vmem:[%s12404_s2 + $0x1c8] ss:$16 sps:$4 sm:$0xff]  }
 0x116   :  { %v10414_v22 = vpop.f32.mrb[1].mxu1 }
 0x117   :  { %5854 = vmatpush1.bf16.msra.mxu1 %v8488_v17  ;;  %v10416_v23 = vpop.f32.mrb[2].mxu1  ;;  %v8669_v17 = vld [vmem:[%s12402_s0 + $0xc] ss:$38 sps:$4 sm:$0xff]  }
 0x118   :  { %5510 = vmatpush1.bf16.msra.mxu0 %v8485_v16  ;;  %v10424_v26 = vpop.f32.mrb[3].mxu1  ;;  %5855 = vmatprep.subr.bf16.mxu1 %v8496_v56  ;;  %v8568_v16 = vld [vmem:[%s12404_s2 + $0x1ec] ss:$16 sps:$4 sm:$0xff]   ;;  %v8563_v56 = vld [vmem:[%s12404_s2 + $0x5e0] ss:$16 sps:$4 sm:$0xff]  }
 0x119   :  { %5511 = vmatprep.subr.bf16.mxu0 %v8493_v19  ;;  %v8670_v19 = vld [vmem:[%s12402_s0 + $0x58] ss:$38 sps:$4 sm:$0xff]  }
 0x11b   :  { %5856 = vmatpush1.bf16.msra.mxu1 %v8494_v25  ;;  %v8575_v25 = vld [vmem:[%s12404_s2 + $0x604] ss:$16 sps:$4 sm:$0xff]  }
 0x11c   :  { %5512 = vmatpush1.bf16.msra.mxu0 %v8491_v24  ;;  %5857 = vmatprep.subr.bf16.mxu1 %v8502_v28  ;;  %v8566_v24 = vld [vmem:[%s12404_s2 + $0x1e8] ss:$16 sps:$4 sm:$0xff]   ;;  %v10583_v28 = vrot.slane %v8669_v17, %v9602_v53 }
 0x11d   :  { %5513 = vmatprep.subr.bf16.mxu0 %v8499_v27  ;;  %v8578_v27 = vld [vmem:[%s12404_s2 + $0x20c] ss:$16 sps:$4 sm:$0xff]   ;;  %v8642_v17 = vld [vmem:[%s12404_s2 + $0x368] ss:$16 sps:$4 sm:$0xff]  }
 0x11f   :  { %5858 = vmatpush1.bf16.msra.mxu1 %v8500_v31  ;;  %v10590_v31 = vcombine.low %v10358_v7, %v10361_v8  ;;  %v8584_v7 = vld [vmem:[%s12404_s2 + $0x22c] ss:$16 sps:$4 sm:$0xff]  }
 0x120   :  { %5514 = vmatpush1.bf16.msra.mxu0 %v8497_v29  ;;  %5859 = vmatprep.subr.bf16.mxu1 %v8508_v33  ;;  %v10586_v29 = vrot.slane %v8670_v19, %v9602_v53  ;;  %v8576_v33 = vld [vmem:[%s12404_s2 + $0x208] ss:$16 sps:$4 sm:$0xff]   ;;  %v8647_v19 = vld [vmem:[%s12404_s2 + $0x784] ss:$16 sps:$4 sm:$0xff]  }
 0x121   :  { %5515 = vmatprep.subr.bf16.mxu0 %v8505_v32  ;;  %v8573_v32 = vld [vmem:[%s12404_s2 + $0x600] ss:$16 sps:$4 sm:$0xff]  }
 0x122   :  { %v10606_v8 = vcombine.high %v10583_v28, %v10586_v29 }
 0x123   :  { %5860 = vmatpush1.bf16.msra.mxu1 %v8506_v35  ;;  %v8579_v35 = vld [vmem:[%s12404_s2 + $0x620] ss:$16 sps:$4 sm:$0xff]  }
 0x124   :  { %5516 = vmatpush1.bf16.msra.mxu0 %v8503_v34  ;;  %5861 = vmatprep.subr.bf16.mxu1 %v8514_v37  ;;  %v8581_v34 = vld [vmem:[%s12404_s2 + $0x624] ss:$16 sps:$4 sm:$0xff]  }
 0x125   :  { %5517 = vmatprep.subr.bf16.mxu0 %v8511_v36  ;;  %v8582_v36 = vld [vmem:[%s12404_s2 + $0x228] ss:$16 sps:$4 sm:$0xff]   ;;  %v8587_v37 = vld [vmem:[%s12404_s2 + $0x644] ss:$16 sps:$4 sm:$0xff]  }
 0x127   :  { %5862 = vmatpush1.bf16.msra.mxu1 %v8512_v40  ;;  %v8588_v40 = vld [vmem:[%s12404_s2 + $0x248] ss:$16 sps:$4 sm:$0xff]  }
 0x128   :  { %5518 = vmatpush1.bf16.msra.mxu0 %v8509_v38  ;;  %5863 = vmatprep.subr.bf16.mxu1 %v8520_v41  ;;  %v8585_v38 = vld [vmem:[%s12404_s2 + $0x640] ss:$16 sps:$4 sm:$0xff]  }
 0x129   :  { %5519 = vmatprep.subr.bf16.mxu0 %v8517_v18  ;;  %v8593_v18 = vld [vmem:[%s12404_s2 + $0x664] ss:$16 sps:$4 sm:$0xff]   ;;  %v8591_v41 = vld [vmem:[%s12404_s2 + $0x660] ss:$16 sps:$4 sm:$0xff]  }
 0x12b   :  { %5864 = vmatpush1.bf16.msra.mxu1 %v8518_v43  ;;  %v8599_v43 = vld [vmem:[%s12404_s2 + $0x684] ss:$16 sps:$4 sm:$0xff]  }
 0x12c   :  { %5520 = vmatpush1.bf16.msra.mxu0 %v8515_v42  ;;  %5865 = vmatprep.subr.bf16.mxu1 %v8526_v45  ;;  %v8594_v42 = vld [vmem:[%s12404_s2 + $0x268] ss:$16 sps:$4 sm:$0xff]   ;;  %v8597_v45 = vld [vmem:[%s12404_s2 + $0x680] ss:$16 sps:$4 sm:$0xff]  }
 0x12d   :  { %5521 = vmatprep.subr.bf16.mxu0 %v8523_v5  ;;  %v8602_v5 = vld [vmem:[%s12404_s2 + $0x28c] ss:$16 sps:$4 sm:$0xff]  }
 0x12f   :  { %5866 = vmatpush1.bf16.msra.mxu1 %v8524_v48  ;;  %v8605_v48 = vld [vmem:[%s12404_s2 + $0x6a4] ss:$16 sps:$4 sm:$0xff]  }
 0x130   :  { %5522 = vmatpush1.bf16.msra.mxu0 %v8521_v47  ;;  %5867 = vmatprep.subr.bf16.mxu1 %v8532_v52  ;;  %v8600_v47 = vld [vmem:[%s12404_s2 + $0x288] ss:$16 sps:$4 sm:$0xff]   ;;  %v8603_v52 = vld [vmem:[%s12404_s2 + $0x6a0] ss:$16 sps:$4 sm:$0xff]  }
 0x131   :  { %5523 = vmatprep.subr.bf16.mxu0 %v8529_v49  ;;  %v8608_v49 = vld [vmem:[%s12404_s2 + $0x2ac] ss:$16 sps:$4 sm:$0xff]  }
 0x133   :  { %5868 = vmatpush1.bf16.msra.mxu1 %v8530_v54  ;;  %v8611_v54 = vld [vmem:[%s12404_s2 + $0x6c4] ss:$16 sps:$4 sm:$0xff]  }
 0x134   :  { %5524 = vmatpush1.bf16.msra.mxu0 %v8527_v21  ;;  %5869 = vmatprep.subr.bf16.mxu1 %v8538_v57  ;;  %v8606_v21 = vld [vmem:[%s12404_s2 + $0x2a8] ss:$16 sps:$4 sm:$0xff]   ;;  %v8609_v57 = vld [vmem:[%s12404_s2 + $0x6c0] ss:$16 sps:$4 sm:$0xff]  }
 0x135   :  { %5525 = vmatprep.subr.bf16.mxu0 %v8535_v55  ;;  %v8614_v55 = vld [vmem:[%s12404_s2 + $0x2cc] ss:$16 sps:$4 sm:$0xff]  }
 0x137   :  { %5870 = vmatpush1.bf16.msra.mxu1 %v8536_v58  ;;  %v8617_v58 = vld [vmem:[%s12404_s2 + $0x6e4] ss:$16 sps:$4 sm:$0xff]  }
 0x138   :  { %5526 = vmatpush1.bf16.msra.mxu0 %v8533_v59  ;;  %5871 = vmatprep.subr.bf16.mxu1 %v8544_v63  ;;  %v8612_v59 = vld [vmem:[%s12404_s2 + $0x2c8] ss:$16 sps:$4 sm:$0xff]   ;;  %v8615_v63 = vld [vmem:[%s12404_s2 + $0x6e0] ss:$16 sps:$4 sm:$0xff]  }
 0x139   :  { %5527 = vmatprep.subr.bf16.mxu0 %v8541_v60  ;;  %v8620_v60 = vld [vmem:[%s12404_s2 + $0x2ec] ss:$16 sps:$4 sm:$0xff]  }
 0x13b   :  { %5872 = vmatpush1.bf16.msra.mxu1 %v8542_v2  ;;  %v8623_v2 = vld [vmem:[%s12404_s2 + $0x704] ss:$16 sps:$4 sm:$0xff]  }
 0x13c   :  { %5528 = vmatpush1.bf16.msra.mxu0 %v8539_v1  ;;  %5873 = vmatprep.subr.bf16.mxu1 %v8550_v51  ;;  %v8618_v1 = vld [vmem:[%s12404_s2 + $0x2e8] ss:$16 sps:$4 sm:$0xff]   ;;  %v8621_v51 = vld [vmem:[%s12404_s2 + $0x700] ss:$16 sps:$4 sm:$0xff]  }
 0x13d   :  { %5529 = vmatprep.subr.bf16.mxu0 %v8547_v3  ;;  %v8626_v3 = vld [vmem:[%s12404_s2 + $0x30c] ss:$16 sps:$4 sm:$0xff]  }
 0x13f   :  { %5874 = vmatpush1.bf16.msra.mxu1 %v8548_v4  ;;  %v8629_v4 = vld [vmem:[%s12404_s2 + $0x724] ss:$16 sps:$4 sm:$0xff]  }
 0x140   :  { %5530 = vmatpush1.bf16.msra.mxu0 %v8545_v30  ;;  %5875 = vmatprep.subr.bf16.mxu1 %v8556_v10  ;;  %v8624_v30 = vld [vmem:[%s12404_s2 + $0x308] ss:$16 sps:$4 sm:$0xff]   ;;  %v8627_v10 = vld [vmem:[%s12404_s2 + $0x720] ss:$16 sps:$4 sm:$0xff]  }
 0x141   :  { %5531 = vmatprep.subr.bf16.mxu0 %v8553_v6  ;;  %v8632_v6 = vld [vmem:[%s12404_s2 + $0x32c] ss:$16 sps:$4 sm:$0xff]  }
 0x143   :  { %5876 = vmatpush1.bf16.msra.mxu1 %v8554_v12  ;;  %v8635_v12 = vld [vmem:[%s12404_s2 + $0x744] ss:$16 sps:$4 sm:$0xff]  }
 0x144   :  { %5532 = vmatpush1.bf16.msra.mxu0 %v8551_v11  ;;  %5877 = vmatprep.subr.bf16.mxu1 %v8562_v62  ;;  %v8630_v11 = vld [vmem:[%s12404_s2 + $0x328] ss:$16 sps:$4 sm:$0xff]   ;;  %v8633_v62 = vld [vmem:[%s12404_s2 + $0x740] ss:$16 sps:$4 sm:$0xff]  }
 0x145   :  { %5533 = vmatprep.subr.bf16.mxu0 %v8559_v13  ;;  %v8638_v13 = vld [vmem:[%s12404_s2 + $0x34c] ss:$16 sps:$4 sm:$0xff]  }
 0x147   :  { %5878 = vmatpush1.bf16.msra.mxu1 %v8560_v15  ;;  %v8641_v15 = vld [vmem:[%s12404_s2 + $0x764] ss:$16 sps:$4 sm:$0xff]  }
 0x148   :  { %5534 = vmatpush1.bf16.msra.mxu0 %v8557_v14  ;;  %5879 = vmatprep.subr.bf16.mxu1 %v8568_v16  ;;  %v8636_v14 = vld [vmem:[%s12404_s2 + $0x348] ss:$16 sps:$4 sm:$0xff]   ;;  %v8639_v16 = vld [vmem:[%s12404_s2 + $0x760] ss:$16 sps:$4 sm:$0xff]  }
 0x149   :  { %5535 = vmatprep.subr.bf16.mxu0 %v8565_v44  ;;  %v8644_v44 = vld [vmem:[%s12404_s2 + $0x36c] ss:$16 sps:$4 sm:$0xff]  }
 0x14b   :  { %5880 = vmatpush1.bf16.msra.mxu1 %v8566_v24  ;;  %v8645_v24 = vld [vmem:[%s12404_s2 + $0x780] ss:$16 sps:$4 sm:$0xff]  }
 0x14c   :  { %5536 = vmatpush1.bf16.msra.mxu0 %v8563_v56  ;;  %5892 = vmatprep.subr.bf16.mxu1 %v8578_v27  ;;  %v8650_v56 = vld [vmem:[%s12404_s2 + $0x38c] ss:$16 sps:$4 sm:$0xff]   ;;  %v8653_v27 = vld [vmem:[%s12404_s2 + $0x7a4] ss:$16 sps:$4 sm:$0xff]  }
 0x14d   :  { %5548 = vmatprep.subr.bf16.mxu0 %v8575_v25  ;;  %v8648_v25 = vld [vmem:[%s12404_s2 + $0x388] ss:$16 sps:$4 sm:$0xff]  }
 0x14e   :  { %5882 = vmatmul.mubr.bf16.vlgmr.msra.gmra.mrb[4].mxu1 %v10164_v0  ;;  %v8590_v0 = vld [vmem:[%s12404_s2 + $0x24c] ss:$16 sps:$4 sm:$0xff]  }
 0x14f   :  { %5538 = vmatmul.mubr.bf16.vlgmr.msra.gmra.mrb[0].mxu0 %v10590_v31  ;;  %5893 = vmatpush1.bf16.msra.mxu1 %v8576_v33  ;;  %v8651_v33 = vld [vmem:[%s12404_s2 + $0x7a0] ss:$16 sps:$4 sm:$0xff]  }
 0x150   :  { %5549 = vmatpush1.bf16.msra.mxu0 %v8573_v32  ;;  %5894 = vmatprep.subr.bf16.mxu1 %v8584_v7  ;;  %v8656_v32 = vld [vmem:[%s12404_s2 + $0x3ac] ss:$16 sps:$4 sm:$0xff]   ;;  %v8659_v7 = vld [vmem:[%s12404_s2 + $0x7c4] ss:$16 sps:$4 sm:$0xff]  }
 0x151   :  { %5550 = vmatprep.subr.bf16.mxu0 %v8581_v34  ;;  %5580 = vmatprep.mubr.bf16.mxu0 %v10606_v8  ;;  %v8654_v34 = vld [vmem:[%s12404_s2 + $0x3a8] ss:$16 sps:$4 sm:$0xff]  }
 0x152   :  { %5924 = vmatprep.mubr.bf16.mxu1 %v10177_v50  ;;  %v8596_v50 = vld [vmem:[%s12404_s2 + $0x26c] ss:$16 sps:$4 sm:$0xff]  }
 0x153   :  { %5895 = vmatpush1.bf16.msra.mxu1 %v8582_v36  ;;  %v8657_v36 = vld [vmem:[%s12404_s2 + $0x7c0] ss:$16 sps:$4 sm:$0xff]  }
 0x154   :  { %5551 = vmatpush1.bf16.msra.mxu0 %v8579_v35  ;;  %5896 = vmatprep.subr.bf16.mxu1 %v8590_v0  ;;  %v8662_v35 = vld [vmem:[%s12404_s2 + $0x3cc] ss:$16 sps:$4 sm:$0xff]   ;;  %v8665_v0 = vld [vmem:[%s12404_s2 + $0x7e4] ss:$16 sps:$4 sm:$0xff]  }
 0x155   :  { %5552 = vmatprep.subr.bf16.mxu0 %v8587_v37  ;;  %v8660_v37 = vld [vmem:[%s12404_s2 + $0x3c8] ss:$16 sps:$4 sm:$0xff]  }
 0x157   :  { %5897 = vmatpush1.bf16.msra.mxu1 %v8588_v40  ;;  %v8767_v40 = vld [vmem:[%s12402_s0 + $0x10] ss:$38 sps:$4 sm:$0xff]  }
 0x158   :  { %5553 = vmatpush1.bf16.msra.mxu0 %v8585_v38  ;;  %5898 = vmatprep.subr.bf16.mxu1 %v8596_v50  ;;  %v8668_v38 = vld [vmem:[%s12404_s2 + $0x3ec] ss:$16 sps:$4 sm:$0xff]   ;;  %v8663_v50 = vld [vmem:[%s12404_s2 + $0x7e0] ss:$16 sps:$4 sm:$0xff]  }
 0x159   :  { %5554 = vmatprep.subr.bf16.mxu0 %v8593_v18  ;;  %v8769_v18 = vld [vmem:[%s12402_s0 + $0x5c] ss:$38 sps:$4 sm:$0xff]  }
 0x15b   :  { %5899 = vmatpush1.bf16.msra.mxu1 %v8594_v42  ;;  %v8673_v42 = vld [vmem:[%s12404_s2 + $0x804] ss:$16 sps:$4 sm:$0xff]  }
 0x15c   :  { %5555 = vmatpush1.bf16.msra.mxu0 %v8591_v41  ;;  %5900 = vmatprep.subr.bf16.mxu1 %v8602_v5  ;;  %v8666_v41 = vld [vmem:[%s12404_s2 + $0x3e8] ss:$16 sps:$4 sm:$0xff]   ;;  %v10799_v5 = vrot.slane %v8767_v40, %v9602_v53 }
 0x15d   :  { %5556 = vmatprep.subr.bf16.mxu0 %v8599_v43  ;;  %v8676_v43 = vld [vmem:[%s12404_s2 + $0x40c] ss:$16 sps:$4 sm:$0xff]   ;;  %v8740_v40 = vld [vmem:[%s12404_s2 + $0x568] ss:$16 sps:$4 sm:$0xff]  }
 0x15f   :  { %5901 = vmatpush1.bf16.msra.mxu1 %v8600_v47  ;;  %v10806_v47 = vcombine.low %v10583_v28, %v10586_v29  ;;  %v8682_v28 = vld [vmem:[%s12404_s2 + $0x42c] ss:$16 sps:$4 sm:$0xff]  }
 0x160   :  { %5557 = vmatpush1.bf16.msra.mxu0 %v8597_v45  ;;  %5902 = vmatprep.subr.bf16.mxu1 %v8608_v49  ;;  %v10802_v45 = vrot.slane %v8769_v18, %v9602_v53  ;;  %v8674_v49 = vld [vmem:[%s12404_s2 + $0x408] ss:$16 sps:$4 sm:$0xff]   ;;  %v8745_v18 = vld [vmem:[%s12404_s2 + $0x984] ss:$16 sps:$4 sm:$0xff]  }
 0x161   :  { %5558 = vmatprep.subr.bf16.mxu0 %v8605_v48  ;;  %v8671_v48 = vld [vmem:[%s12404_s2 + $0x800] ss:$16 sps:$4 sm:$0xff]  }
 0x162   :  { %v10822_v29 = vcombine.high %v10799_v5, %v10802_v45 }
 0x163   :  { %5903 = vmatpush1.bf16.msra.mxu1 %v8606_v21  ;;  %v8677_v21 = vld [vmem:[%s12404_s2 + $0x820] ss:$16 sps:$4 sm:$0xff]  }
 0x164   :  { %5559 = vmatpush1.bf16.msra.mxu0 %v8603_v52  ;;  %5904 = vmatprep.subr.bf16.mxu1 %v8614_v55  ;;  %v8679_v52 = vld [vmem:[%s12404_s2 + $0x824] ss:$16 sps:$4 sm:$0xff]  }
 0x165   :  { %5560 = vmatprep.subr.bf16.mxu0 %v8611_v54  ;;  %v8680_v54 = vld [vmem:[%s12404_s2 + $0x428] ss:$16 sps:$4 sm:$0xff]   ;;  %v8685_v55 = vld [vmem:[%s12404_s2 + $0x844] ss:$16 sps:$4 sm:$0xff]  }
 0x167   :  { %5905 = vmatpush1.bf16.msra.mxu1 %v8612_v59  ;;  %v8686_v59 = vld [vmem:[%s12404_s2 + $0x448] ss:$16 sps:$4 sm:$0xff]  }
 0x168   :  { %5561 = vmatpush1.bf16.msra.mxu0 %v8609_v57  ;;  %5906 = vmatprep.subr.bf16.mxu1 %v8620_v60  ;;  %v8683_v57 = vld [vmem:[%s12404_s2 + $0x840] ss:$16 sps:$4 sm:$0xff]  }
 0x169   :  { %5562 = vmatprep.subr.bf16.mxu0 %v8617_v58  ;;  %v8691_v58 = vld [vmem:[%s12404_s2 + $0x864] ss:$16 sps:$4 sm:$0xff]   ;;  %v8689_v60 = vld [vmem:[%s12404_s2 + $0x860] ss:$16 sps:$4 sm:$0xff]  }
 0x16b   :  { %5907 = vmatpush1.bf16.msra.mxu1 %v8618_v1  ;;  %v8697_v1 = vld [vmem:[%s12404_s2 + $0x884] ss:$16 sps:$4 sm:$0xff]  }
 0x16c   :  { %5563 = vmatpush1.bf16.msra.mxu0 %v8615_v63  ;;  %5908 = vmatprep.subr.bf16.mxu1 %v8626_v3  ;;  %v8692_v63 = vld [vmem:[%s12404_s2 + $0x468] ss:$16 sps:$4 sm:$0xff]   ;;  %v8695_v3 = vld [vmem:[%s12404_s2 + $0x880] ss:$16 sps:$4 sm:$0xff]  }
 0x16d   :  { %5564 = vmatprep.subr.bf16.mxu0 %v8623_v2  ;;  %v8700_v2 = vld [vmem:[%s12404_s2 + $0x48c] ss:$16 sps:$4 sm:$0xff]  }
 0x16f   :  { %5909 = vmatpush1.bf16.msra.mxu1 %v8624_v30  ;;  %v8703_v30 = vld [vmem:[%s12404_s2 + $0x8a4] ss:$16 sps:$4 sm:$0xff]  }
 0x170   :  { %5565 = vmatpush1.bf16.msra.mxu0 %v8621_v51  ;;  %5910 = vmatprep.subr.bf16.mxu1 %v8632_v6  ;;  %v8698_v51 = vld [vmem:[%s12404_s2 + $0x488] ss:$16 sps:$4 sm:$0xff]   ;;  %v8701_v6 = vld [vmem:[%s12404_s2 + $0x8a0] ss:$16 sps:$4 sm:$0xff]  }
 0x171   :  { %5566 = vmatprep.subr.bf16.mxu0 %v8629_v4  ;;  %v8706_v4 = vld [vmem:[%s12404_s2 + $0x4ac] ss:$16 sps:$4 sm:$0xff]  }
 0x173   :  { %5911 = vmatpush1.bf16.msra.mxu1 %v8630_v11  ;;  %v8709_v11 = vld [vmem:[%s12404_s2 + $0x8c4] ss:$16 sps:$4 sm:$0xff]  }
 0x174   :  { %5567 = vmatpush1.bf16.msra.mxu0 %v8627_v10  ;;  %5912 = vmatprep.subr.bf16.mxu1 %v8638_v13  ;;  %v8704_v10 = vld [vmem:[%s12404_s2 + $0x4a8] ss:$16 sps:$4 sm:$0xff]   ;;  %v8707_v13 = vld [vmem:[%s12404_s2 + $0x8c0] ss:$16 sps:$4 sm:$0xff]  }
 0x175   :  { %5568 = vmatprep.subr.bf16.mxu0 %v8635_v12  ;;  %v8712_v12 = vld [vmem:[%s12404_s2 + $0x4cc] ss:$16 sps:$4 sm:$0xff]  }
 0x177   :  { %5913 = vmatpush1.bf16.msra.mxu1 %v8636_v14  ;;  %v8715_v14 = vld [vmem:[%s12404_s2 + $0x8e4] ss:$16 sps:$4 sm:$0xff]  }
 0x178   :  { %5569 = vmatpush1.bf16.msra.mxu0 %v8633_v62  ;;  %5914 = vmatprep.subr.bf16.mxu1 %v8644_v44  ;;  %v8710_v62 = vld [vmem:[%s12404_s2 + $0x4c8] ss:$16 sps:$4 sm:$0xff]   ;;  %v8713_v44 = vld [vmem:[%s12404_s2 + $0x8e0] ss:$16 sps:$4 sm:$0xff]  }
 0x179   :  { %5570 = vmatprep.subr.bf16.mxu0 %v8641_v15  ;;  %v8718_v15 = vld [vmem:[%s12404_s2 + $0x4ec] ss:$16 sps:$4 sm:$0xff]  }
 0x17b   :  { %5915 = vmatpush1.bf16.msra.mxu1 %v8642_v17  ;;  %v8721_v17 = vld [vmem:[%s12404_s2 + $0x904] ss:$16 sps:$4 sm:$0xff]  }
 0x17c   :  { %5571 = vmatpush1.bf16.msra.mxu0 %v8639_v16  ;;  %5916 = vmatprep.subr.bf16.mxu1 %v8650_v56  ;;  %v8716_v16 = vld [vmem:[%s12404_s2 + $0x4e8] ss:$16 sps:$4 sm:$0xff]   ;;  %v8719_v56 = vld [vmem:[%s12404_s2 + $0x900] ss:$16 sps:$4 sm:$0xff]  }
 0x17d   :  { %5572 = vmatprep.subr.bf16.mxu0 %v8647_v19  ;;  %v8724_v19 = vld [vmem:[%s12404_s2 + $0x50c] ss:$16 sps:$4 sm:$0xff]  }
 0x17f   :  { %5917 = vmatpush1.bf16.msra.mxu1 %v8648_v25  ;;  %v8727_v25 = vld [vmem:[%s12404_s2 + $0x924] ss:$16 sps:$4 sm:$0xff]  }
 0x180   :  { %5573 = vmatpush1.bf16.msra.mxu0 %v8645_v24  ;;  %5918 = vmatprep.subr.bf16.mxu1 %v8656_v32  ;;  %v8722_v24 = vld [vmem:[%s12404_s2 + $0x508] ss:$16 sps:$4 sm:$0xff]   ;;  %v8725_v32 = vld [vmem:[%s12404_s2 + $0x920] ss:$16 sps:$4 sm:$0xff]  }
 0x181   :  { %5574 = vmatprep.subr.bf16.mxu0 %v8653_v27  ;;  %v8730_v27 = vld [vmem:[%s12404_s2 + $0x52c] ss:$16 sps:$4 sm:$0xff]  }
 0x183   :  { %5919 = vmatpush1.bf16.msra.mxu1 %v8654_v34  ;;  %v8733_v34 = vld [vmem:[%s12404_s2 + $0x944] ss:$16 sps:$4 sm:$0xff]  }
 0x184   :  { %5575 = vmatpush1.bf16.msra.mxu0 %v8651_v33  ;;  %5920 = vmatprep.subr.bf16.mxu1 %v8662_v35  ;;  %v8728_v33 = vld [vmem:[%s12404_s2 + $0x528] ss:$16 sps:$4 sm:$0xff]   ;;  %v8731_v35 = vld [vmem:[%s12404_s2 + $0x940] ss:$16 sps:$4 sm:$0xff]  }
 0x185   :  { %5576 = vmatprep.subr.bf16.mxu0 %v8659_v7  ;;  %v8736_v7 = vld [vmem:[%s12404_s2 + $0x54c] ss:$16 sps:$4 sm:$0xff]  }
 0x187   :  { %5921 = vmatpush1.bf16.msra.mxu1 %v8660_v37  ;;  %v8739_v37 = vld [vmem:[%s12404_s2 + $0x964] ss:$16 sps:$4 sm:$0xff]  }
 0x188   :  { %5577 = vmatpush1.bf16.msra.mxu0 %v8657_v36  ;;  %5922 = vmatprep.subr.bf16.mxu1 %v8668_v38  ;;  %v8734_v36 = vld [vmem:[%s12404_s2 + $0x548] ss:$16 sps:$4 sm:$0xff]   ;;  %v8737_v38 = vld [vmem:[%s12404_s2 + $0x960] ss:$16 sps:$4 sm:$0xff]  }
 0x189   :  { %5578 = vmatprep.subr.bf16.mxu0 %v8665_v0  ;;  %v8742_v0 = vld [vmem:[%s12404_s2 + $0x56c] ss:$16 sps:$4 sm:$0xff]  }
 0x18b   :  { %5923 = vmatpush1.bf16.msra.mxu1 %v8666_v41  ;;  %v8743_v41 = vld [vmem:[%s12404_s2 + $0x980] ss:$16 sps:$4 sm:$0xff]  }
 0x18c   :  { %5579 = vmatpush1.bf16.msra.mxu0 %v8663_v50  ;;  %5935 = vmatprep.subr.bf16.mxu1 %v8676_v43  ;;  %v8748_v50 = vld [vmem:[%s12404_s2 + $0x58c] ss:$16 sps:$4 sm:$0xff]   ;;  %v8751_v43 = vld [vmem:[%s12404_s2 + $0x9a4] ss:$16 sps:$4 sm:$0xff]  }
 0x18d   :  { %5591 = vmatprep.subr.bf16.mxu0 %v8673_v42  ;;  %v8746_v42 = vld [vmem:[%s12404_s2 + $0x588] ss:$16 sps:$4 sm:$0xff]  }
 0x18e   :  { %5925 = vmatmul.mubr.bf16.vlgmr.msra.gmra.mrb[4].mxu1 %v10365_v9  ;;  %v8688_v9 = vld [vmem:[%s12404_s2 + $0x44c] ss:$16 sps:$4 sm:$0xff]  }
 0x18f   :  { %5581 = vmatmul.mubr.bf16.vlgmr.msra.gmra.mrb[0].mxu0 %v10806_v47  ;;  %5936 = vmatpush1.bf16.msra.mxu1 %v8674_v49  ;;  %v8749_v49 = vld [vmem:[%s12404_s2 + $0x9a0] ss:$16 sps:$4 sm:$0xff]  }
 0x190   :  { %5592 = vmatpush1.bf16.msra.mxu0 %v8671_v48  ;;  %5937 = vmatprep.subr.bf16.mxu1 %v8682_v28  ;;  %v8754_v48 = vld [vmem:[%s12404_s2 + $0x5ac] ss:$16 sps:$4 sm:$0xff]   ;;  %v8757_v28 = vld [vmem:[%s12404_s2 + $0x9c4] ss:$16 sps:$4 sm:$0xff]  }
 0x191   :  { %5593 = vmatprep.subr.bf16.mxu0 %v8679_v52  ;;  %5623 = vmatprep.mubr.bf16.mxu0 %v10822_v29  ;;  %v8752_v52 = vld [vmem:[%s12404_s2 + $0x5a8] ss:$16 sps:$4 sm:$0xff]  }
 0x192   :  { %5967 = vmatprep.mubr.bf16.mxu1 %v10381_v61  ;;  %v8694_v61 = vld [vmem:[%s12404_s2 + $0x46c] ss:$16 sps:$4 sm:$0xff]  }
 0x193   :  { %5938 = vmatpush1.bf16.msra.mxu1 %v8680_v54  ;;  %v8755_v54 = vld [vmem:[%s12404_s2 + $0x9c0] ss:$16 sps:$4 sm:$0xff]  }
 0x194   :  { %5594 = vmatpush1.bf16.msra.mxu0 %v8677_v21  ;;  %5939 = vmatprep.subr.bf16.mxu1 %v8688_v9  ;;  %v8760_v21 = vld [vmem:[%s12404_s2 + $0x5cc] ss:$16 sps:$4 sm:$0xff]   ;;  %v8763_v9 = vld [vmem:[%s12404_s2 + $0x9e4] ss:$16 sps:$4 sm:$0xff]  }
 0x195   :  { %5595 = vmatprep.subr.bf16.mxu0 %v8685_v55  ;;  %v8758_v55 = vld [vmem:[%s12404_s2 + $0x5c8] ss:$16 sps:$4 sm:$0xff]  }
 0x197   :  { %5940 = vmatpush1.bf16.msra.mxu1 %v8686_v59  ;;  %v8867_v59 = vld [vmem:[%s12402_s0 + $0x14] ss:$38 sps:$4 sm:$0xff]  }
 0x198   :  { %5596 = vmatpush1.bf16.msra.mxu0 %v8683_v57  ;;  %5941 = vmatprep.subr.bf16.mxu1 %v8694_v61  ;;  %v8766_v57 = vld [vmem:[%s12404_s2 + $0x5ec] ss:$16 sps:$4 sm:$0xff]   ;;  %v8761_v61 = vld [vmem:[%s12404_s2 + $0x9e0] ss:$16 sps:$4 sm:$0xff]  }
 0x199   :  { %5597 = vmatprep.subr.bf16.mxu0 %v8691_v58  ;;  %v8868_v58 = vld [vmem:[%s12402_s0 + $0x60] ss:$38 sps:$4 sm:$0xff]  }
 0x19b   :  { %5942 = vmatpush1.bf16.msra.mxu1 %v8692_v63  ;;  %v8773_v63 = vld [vmem:[%s12404_s2 + $0xa04] ss:$16 sps:$4 sm:$0xff]  }
 0x19c   :  { %5598 = vmatpush1.bf16.msra.mxu0 %v8689_v60  ;;  %5943 = vmatprep.subr.bf16.mxu1 %v8700_v2  ;;  %v8764_v60 = vld [vmem:[%s12404_s2 + $0x5e8] ss:$16 sps:$4 sm:$0xff]   ;;  %v11015_v2 = vrot.slane %v8867_v59, %v9602_v53 }
 0x19d   :  { %5599 = vmatprep.subr.bf16.mxu0 %v8697_v1  ;;  %v8776_v1 = vld [vmem:[%s12404_s2 + $0x60c] ss:$16 sps:$4 sm:$0xff]   ;;  %v8840_v59 = vld [vmem:[%s12404_s2 + $0x768] ss:$16 sps:$4 sm:$0xff]  }
 0x19f   :  { %5944 = vmatpush1.bf16.msra.mxu1 %v8698_v51  ;;  %v11022_v51 = vcombine.low %v10799_v5, %v10802_v45  ;;  %v8782_v5 = vld [vmem:[%s12404_s2 + $0x62c] ss:$16 sps:$4 sm:$0xff]  }
 0x1a0   :  { %5600 = vmatpush1.bf16.msra.mxu0 %v8695_v3  ;;  %5945 = vmatprep.subr.bf16.mxu1 %v8706_v4  ;;  %v11018_v3 = vrot.slane %v8868_v58, %v9602_v53  ;;  %v8774_v4 = vld [vmem:[%s12404_s2 + $0x608] ss:$16 sps:$4 sm:$0xff]   ;;  %v8845_v58 = vld [vmem:[%s12404_s2 + $0xb84] ss:$16 sps:$4 sm:$0xff]  }
 0x1a1   :  { %5601 = vmatprep.subr.bf16.mxu0 %v8703_v30  ;;  %v8771_v30 = vld [vmem:[%s12404_s2 + $0xa00] ss:$16 sps:$4 sm:$0xff]  }
 0x1a2   :  { %v11038_v45 = vcombine.high %v11015_v2, %v11018_v3 }
 0x1a3   :  { %5946 = vmatpush1.bf16.msra.mxu1 %v8704_v10  ;;  %v8777_v10 = vld [vmem:[%s12404_s2 + $0xa20] ss:$16 sps:$4 sm:$0xff]  }
 0x1a4   :  { %5602 = vmatpush1.bf16.msra.mxu0 %v8701_v6  ;;  %5947 = vmatprep.subr.bf16.mxu1 %v8712_v12  ;;  %v8779_v6 = vld [vmem:[%s12404_s2 + $0xa24] ss:$16 sps:$4 sm:$0xff]  }
 0x1a5   :  { %5603 = vmatprep.subr.bf16.mxu0 %v8709_v11  ;;  %v8780_v11 = vld [vmem:[%s12404_s2 + $0x628] ss:$16 sps:$4 sm:$0xff]   ;;  %v8785_v12 = vld [vmem:[%s12404_s2 + $0xa44] ss:$16 sps:$4 sm:$0xff]  }
 0x1a7   :  { %5948 = vmatpush1.bf16.msra.mxu1 %v8710_v62  ;;  %v8786_v62 = vld [vmem:[%s12404_s2 + $0x648] ss:$16 sps:$4 sm:$0xff]  }
 0x1a8   :  { %5604 = vmatpush1.bf16.msra.mxu0 %v8707_v13  ;;  %5949 = vmatprep.subr.bf16.mxu1 %v8718_v15  ;;  %v8783_v13 = vld [vmem:[%s12404_s2 + $0xa40] ss:$16 sps:$4 sm:$0xff]  }
 0x1a9   :  { %5605 = vmatprep.subr.bf16.mxu0 %v8715_v14  ;;  %v8791_v14 = vld [vmem:[%s12404_s2 + $0xa64] ss:$16 sps:$4 sm:$0xff]   ;;  %v8789_v15 = vld [vmem:[%s12404_s2 + $0xa60] ss:$16 sps:$4 sm:$0xff]  }
 0x1ab   :  { %5950 = vmatpush1.bf16.msra.mxu1 %v8716_v16  ;;  %v8797_v16 = vld [vmem:[%s12404_s2 + $0xa84] ss:$16 sps:$4 sm:$0xff]  }
 0x1ac   :  { %5606 = vmatpush1.bf16.msra.mxu0 %v8713_v44  ;;  %5951 = vmatprep.subr.bf16.mxu1 %v8724_v19  ;;  %v8792_v44 = vld [vmem:[%s12404_s2 + $0x668] ss:$16 sps:$4 sm:$0xff]   ;;  %v8795_v19 = vld [vmem:[%s12404_s2 + $0xa80] ss:$16 sps:$4 sm:$0xff]  }
 0x1ad   :  { %5607 = vmatprep.subr.bf16.mxu0 %v8721_v17  ;;  %v8800_v17 = vld [vmem:[%s12404_s2 + $0x68c] ss:$16 sps:$4 sm:$0xff]  }
 0x1af   :  { %5952 = vmatpush1.bf16.msra.mxu1 %v8722_v24  ;;  %v8803_v24 = vld [vmem:[%s12404_s2 + $0xaa4] ss:$16 sps:$4 sm:$0xff]  }
 0x1b0   :  { %5608 = vmatpush1.bf16.msra.mxu0 %v8719_v56  ;;  %5953 = vmatprep.subr.bf16.mxu1 %v8730_v27  ;;  %v8798_v56 = vld [vmem:[%s12404_s2 + $0x688] ss:$16 sps:$4 sm:$0xff]   ;;  %v8801_v27 = vld [vmem:[%s12404_s2 + $0xaa0] ss:$16 sps:$4 sm:$0xff]  }
 0x1b1   :  { %5609 = vmatprep.subr.bf16.mxu0 %v8727_v25  ;;  %v8806_v25 = vld [vmem:[%s12404_s2 + $0x6ac] ss:$16 sps:$4 sm:$0xff]  }
 0x1b3   :  { %5954 = vmatpush1.bf16.msra.mxu1 %v8728_v33  ;;  %v8809_v33 = vld [vmem:[%s12404_s2 + $0xac4] ss:$16 sps:$4 sm:$0xff]  }
 0x1b4   :  { %5610 = vmatpush1.bf16.msra.mxu0 %v8725_v32  ;;  %5955 = vmatprep.subr.bf16.mxu1 %v8736_v7  ;;  %v8804_v32 = vld [vmem:[%s12404_s2 + $0x6a8] ss:$16 sps:$4 sm:$0xff]   ;;  %v8807_v7 = vld [vmem:[%s12404_s2 + $0xac0] ss:$16 sps:$4 sm:$0xff]  }
 0x1b5   :  { %5611 = vmatprep.subr.bf16.mxu0 %v8733_v34  ;;  %v8812_v34 = vld [vmem:[%s12404_s2 + $0x6cc] ss:$16 sps:$4 sm:$0xff]  }
 0x1b7   :  { %5956 = vmatpush1.bf16.msra.mxu1 %v8734_v36  ;;  %v8815_v36 = vld [vmem:[%s12404_s2 + $0xae4] ss:$16 sps:$4 sm:$0xff]  }
 0x1b8   :  { %5612 = vmatpush1.bf16.msra.mxu0 %v8731_v35  ;;  %5957 = vmatprep.subr.bf16.mxu1 %v8742_v0  ;;  %v8810_v35 = vld [vmem:[%s12404_s2 + $0x6c8] ss:$16 sps:$4 sm:$0xff]   ;;  %v8813_v0 = vld [vmem:[%s12404_s2 + $0xae0] ss:$16 sps:$4 sm:$0xff]  }
 0x1b9   :  { %5613 = vmatprep.subr.bf16.mxu0 %v8739_v37  ;;  %v8818_v37 = vld [vmem:[%s12404_s2 + $0x6ec] ss:$16 sps:$4 sm:$0xff]  }
 0x1bb   :  { %5958 = vmatpush1.bf16.msra.mxu1 %v8740_v40  ;;  %v8821_v40 = vld [vmem:[%s12404_s2 + $0xb04] ss:$16 sps:$4 sm:$0xff]  }
 0x1bc   :  { %5614 = vmatpush1.bf16.msra.mxu0 %v8737_v38  ;;  %5959 = vmatprep.subr.bf16.mxu1 %v8748_v50  ;;  %v8816_v38 = vld [vmem:[%s12404_s2 + $0x6e8] ss:$16 sps:$4 sm:$0xff]   ;;  %v8819_v50 = vld [vmem:[%s12404_s2 + $0xb00] ss:$16 sps:$4 sm:$0xff]  }
 0x1bd   :  { %5615 = vmatprep.subr.bf16.mxu0 %v8745_v18  ;;  %v8824_v18 = vld [vmem:[%s12404_s2 + $0x70c] ss:$16 sps:$4 sm:$0xff]  }
 0x1bf   :  { %5960 = vmatpush1.bf16.msra.mxu1 %v8746_v42  ;;  %v8827_v42 = vld [vmem:[%s12404_s2 + $0xb24] ss:$16 sps:$4 sm:$0xff]  }
 0x1c0   :  { %5616 = vmatpush1.bf16.msra.mxu0 %v8743_v41  ;;  %5961 = vmatprep.subr.bf16.mxu1 %v8754_v48  ;;  %v8822_v41 = vld [vmem:[%s12404_s2 + $0x708] ss:$16 sps:$4 sm:$0xff]   ;;  %v8825_v48 = vld [vmem:[%s12404_s2 + $0xb20] ss:$16 sps:$4 sm:$0xff]  }
 0x1c1   :  { %5617 = vmatprep.subr.bf16.mxu0 %v8751_v43  ;;  %v8830_v43 = vld [vmem:[%s12404_s2 + $0x72c] ss:$16 sps:$4 sm:$0xff]  }
 0x1c3   :  { %5962 = vmatpush1.bf16.msra.mxu1 %v8752_v52  ;;  %v8833_v52 = vld [vmem:[%s12404_s2 + $0xb44] ss:$16 sps:$4 sm:$0xff]  }
 0x1c4   :  { %5618 = vmatpush1.bf16.msra.mxu0 %v8749_v49  ;;  %5963 = vmatprep.subr.bf16.mxu1 %v8760_v21  ;;  %v8828_v49 = vld [vmem:[%s12404_s2 + $0x728] ss:$16 sps:$4 sm:$0xff]   ;;  %v8831_v21 = vld [vmem:[%s12404_s2 + $0xb40] ss:$16 sps:$4 sm:$0xff]  }
 0x1c5   :  { %5619 = vmatprep.subr.bf16.mxu0 %v8757_v28  ;;  %v8836_v28 = vld [vmem:[%s12404_s2 + $0x74c] ss:$16 sps:$4 sm:$0xff]  }
 0x1c7   :  { %5964 = vmatpush1.bf16.msra.mxu1 %v8758_v55  ;;  %v8839_v55 = vld [vmem:[%s12404_s2 + $0xb64] ss:$16 sps:$4 sm:$0xff]  }
 0x1c8   :  { %5620 = vmatpush1.bf16.msra.mxu0 %v8755_v54  ;;  %5965 = vmatprep.subr.bf16.mxu1 %v8766_v57  ;;  %v8834_v54 = vld [vmem:[%s12404_s2 + $0x748] ss:$16 sps:$4 sm:$0xff]   ;;  %v8837_v57 = vld [vmem:[%s12404_s2 + $0xb60] ss:$16 sps:$4 sm:$0xff]  }
 0x1c9   :  { %5621 = vmatprep.subr.bf16.mxu0 %v8763_v9  ;;  %v8842_v9 = vld [vmem:[%s12404_s2 + $0x76c] ss:$16 sps:$4 sm:$0xff]  }
 0x1cb   :  { %5966 = vmatpush1.bf16.msra.mxu1 %v8764_v60  ;;  %v8843_v60 = vld [vmem:[%s12404_s2 + $0xb80] ss:$16 sps:$4 sm:$0xff]  }
 0x1cc   :  { %5622 = vmatpush1.bf16.msra.mxu0 %v8761_v61  ;;  %5978 = vmatprep.subr.bf16.mxu1 %v8776_v1  ;;  %v8848_v61 = vld [vmem:[%s12404_s2 + $0x78c] ss:$16 sps:$4 sm:$0xff]   ;;  %v8851_v1 = vld [vmem:[%s12404_s2 + $0xba4] ss:$16 sps:$4 sm:$0xff]  }
 0x1cd   :  { %5634 = vmatprep.subr.bf16.mxu0 %v8773_v63  ;;  %v8846_v63 = vld [vmem:[%s12404_s2 + $0x788] ss:$16 sps:$4 sm:$0xff]  }
 0x1ce   :  { %5968 = vmatmul.mubr.bf16.vlgmr.msra.gmra.mrb[4].mxu1 %v10590_v31  ;;  %v8788_v31 = vld [vmem:[%s12404_s2 + $0x64c] ss:$16 sps:$4 sm:$0xff]  }
 0x1cf   :  { %5624 = vmatmul.mubr.bf16.vlgmr.msra.gmra.mrb[0].mxu0 %v11022_v51  ;;  %5979 = vmatpush1.bf16.msra.mxu1 %v8774_v4  ;;  %v8849_v4 = vld [vmem:[%s12404_s2 + $0xba0] ss:$16 sps:$4 sm:$0xff]  }
 0x1d0   :  { %5635 = vmatpush1.bf16.msra.mxu0 %v8771_v30  ;;  %5980 = vmatprep.subr.bf16.mxu1 %v8782_v5  ;;  %v8854_v30 = vld [vmem:[%s12404_s2 + $0x7ac] ss:$16 sps:$4 sm:$0xff]   ;;  %v8857_v5 = vld [vmem:[%s12404_s2 + $0xbc4] ss:$16 sps:$4 sm:$0xff]  }
 0x1d1   :  { %5636 = vmatprep.subr.bf16.mxu0 %v8779_v6  ;;  %5666 = vmatprep.mubr.bf16.mxu0 %v11038_v45  ;;  %v8852_v6 = vld [vmem:[%s12404_s2 + $0x7a8] ss:$16 sps:$4 sm:$0xff]  }
 0x1d2   :  { %6010 = vmatprep.mubr.bf16.mxu1 %v10606_v8  ;;  %v8794_v8 = vld [vmem:[%s12404_s2 + $0x66c] ss:$16 sps:$4 sm:$0xff]  }
 0x1d3   :  { %5981 = vmatpush1.bf16.msra.mxu1 %v8780_v11  ;;  %v8855_v11 = vld [vmem:[%s12404_s2 + $0xbc0] ss:$16 sps:$4 sm:$0xff]  }
 0x1d4   :  { %5637 = vmatpush1.bf16.msra.mxu0 %v8777_v10  ;;  %5982 = vmatprep.subr.bf16.mxu1 %v8788_v31  ;;  %v8860_v10 = vld [vmem:[%s12404_s2 + $0x7cc] ss:$16 sps:$4 sm:$0xff]   ;;  %v8863_v31 = vld [vmem:[%s12404_s2 + $0xbe4] ss:$16 sps:$4 sm:$0xff]  }
 0x1d5   :  { %5638 = vmatprep.subr.bf16.mxu0 %v8785_v12  ;;  %v8858_v12 = vld [vmem:[%s12404_s2 + $0x7c8] ss:$16 sps:$4 sm:$0xff]  }
 0x1d7   :  { %5983 = vmatpush1.bf16.msra.mxu1 %v8786_v62  ;;  %v8965_v62 = vld [vmem:[%s12402_s0 + $0x18] ss:$38 sps:$4 sm:$0xff]  }
 0x1d8   :  { %5639 = vmatpush1.bf16.msra.mxu0 %v8783_v13  ;;  %5984 = vmatprep.subr.bf16.mxu1 %v8794_v8  ;;  %v8866_v13 = vld [vmem:[%s12404_s2 + $0x7ec] ss:$16 sps:$4 sm:$0xff]   ;;  %v8861_v8 = vld [vmem:[%s12404_s2 + $0xbe0] ss:$16 sps:$4 sm:$0xff]  }
 0x1d9   :  { %5640 = vmatprep.subr.bf16.mxu0 %v8791_v14  ;;  %v8967_v14 = vld [vmem:[%s12402_s0 + $0x64] ss:$38 sps:$4 sm:$0xff]  }
 0x1db   :  { %5985 = vmatpush1.bf16.msra.mxu1 %v8792_v44  ;;  %v8871_v44 = vld [vmem:[%s12404_s2 + $0xc04] ss:$16 sps:$4 sm:$0xff]  }
 0x1dc   :  { %5641 = vmatpush1.bf16.msra.mxu0 %v8789_v15  ;;  %5986 = vmatprep.subr.bf16.mxu1 %v8800_v17  ;;  %v8864_v15 = vld [vmem:[%s12404_s2 + $0x7e8] ss:$16 sps:$4 sm:$0xff]   ;;  %v11231_v17 = vrot.slane %v8965_v62, %v9602_v53 }
 0x1dd   :  { %5642 = vmatprep.subr.bf16.mxu0 %v8797_v16  ;;  %v8874_v16 = vld [vmem:[%s12404_s2 + $0x80c] ss:$16 sps:$4 sm:$0xff]   ;;  %v8938_v62 = vld [vmem:[%s12404_s2 + $0x968] ss:$16 sps:$4 sm:$0xff]  }
 0x1df   :  { %5987 = vmatpush1.bf16.msra.mxu1 %v8798_v56  ;;  %v11238_v56 = vcombine.low %v11015_v2, %v11018_v3  ;;  %v8880_v2 = vld [vmem:[%s12404_s2 + $0x82c] ss:$16 sps:$4 sm:$0xff]  }
 0x1e0   :  { %5643 = vmatpush1.bf16.msra.mxu0 %v8795_v19  ;;  %5988 = vmatprep.subr.bf16.mxu1 %v8806_v25  ;;  %v11234_v19 = vrot.slane %v8967_v14, %v9602_v53  ;;  %v8872_v25 = vld [vmem:[%s12404_s2 + $0x808] ss:$16 sps:$4 sm:$0xff]   ;;  %v8943_v14 = vld [vmem:[%s12404_s2 + $0xd84] ss:$16 sps:$4 sm:$0xff]  }
 0x1e1   :  { %5644 = vmatprep.subr.bf16.mxu0 %v8803_v24  ;;  %v8869_v24 = vld [vmem:[%s12404_s2 + $0xc00] ss:$16 sps:$4 sm:$0xff]  }
 0x1e2   :  { %v11254_v3 = vcombine.high %v11231_v17, %v11234_v19 }
 0x1e3   :  { %5989 = vmatpush1.bf16.msra.mxu1 %v8804_v32  ;;  %v8875_v32 = vld [vmem:[%s12404_s2 + $0xc20] ss:$16 sps:$4 sm:$0xff]  }
 0x1e4   :  { %5645 = vmatpush1.bf16.msra.mxu0 %v8801_v27  ;;  %5990 = vmatprep.subr.bf16.mxu1 %v8812_v34  ;;  %v8877_v27 = vld [vmem:[%s12404_s2 + $0xc24] ss:$16 sps:$4 sm:$0xff]  }
 0x1e5   :  { %5646 = vmatprep.subr.bf16.mxu0 %v8809_v33  ;;  %v8878_v33 = vld [vmem:[%s12404_s2 + $0x828] ss:$16 sps:$4 sm:$0xff]   ;;  %v8883_v34 = vld [vmem:[%s12404_s2 + $0xc44] ss:$16 sps:$4 sm:$0xff]  }
 0x1e7   :  { %5991 = vmatpush1.bf16.msra.mxu1 %v8810_v35  ;;  %v8884_v35 = vld [vmem:[%s12404_s2 + $0x848] ss:$16 sps:$4 sm:$0xff]  }
 0x1e8   :  { %5647 = vmatpush1.bf16.msra.mxu0 %v8807_v7  ;;  %5992 = vmatprep.subr.bf16.mxu1 %v8818_v37  ;;  %v8881_v7 = vld [vmem:[%s12404_s2 + $0xc40] ss:$16 sps:$4 sm:$0xff]  }
 0x1e9   :  { %5648 = vmatprep.subr.bf16.mxu0 %v8815_v36  ;;  %v8889_v36 = vld [vmem:[%s12404_s2 + $0xc64] ss:$16 sps:$4 sm:$0xff]   ;;  %v8887_v37 = vld [vmem:[%s12404_s2 + $0xc60] ss:$16 sps:$4 sm:$0xff]  }
 0x1eb   :  { %5993 = vmatpush1.bf16.msra.mxu1 %v8816_v38  ;;  %v8895_v38 = vld [vmem:[%s12404_s2 + $0xc84] ss:$16 sps:$4 sm:$0xff]  }
 0x1ec   :  { %5649 = vmatpush1.bf16.msra.mxu0 %v8813_v0  ;;  %5994 = vmatprep.subr.bf16.mxu1 %v8824_v18  ;;  %v8890_v0 = vld [vmem:[%s12404_s2 + $0x868] ss:$16 sps:$4 sm:$0xff]   ;;  %v8893_v18 = vld [vmem:[%s12404_s2 + $0xc80] ss:$16 sps:$4 sm:$0xff]  }
 0x1ed   :  { %5650 = vmatprep.subr.bf16.mxu0 %v8821_v40  ;;  %v8898_v40 = vld [vmem:[%s12404_s2 + $0x88c] ss:$16 sps:$4 sm:$0xff]  }
 0x1ef   :  { %5995 = vmatpush1.bf16.msra.mxu1 %v8822_v41  ;;  %v8901_v41 = vld [vmem:[%s12404_s2 + $0xca4] ss:$16 sps:$4 sm:$0xff]  }
 0x1f0   :  { %5651 = vmatpush1.bf16.msra.mxu0 %v8819_v50  ;;  %5996 = vmatprep.subr.bf16.mxu1 %v8830_v43  ;;  %v8896_v50 = vld [vmem:[%s12404_s2 + $0x888] ss:$16 sps:$4 sm:$0xff]   ;;  %v8899_v43 = vld [vmem:[%s12404_s2 + $0xca0] ss:$16 sps:$4 sm:$0xff]  }
 0x1f1   :  { %5652 = vmatprep.subr.bf16.mxu0 %v8827_v42  ;;  %v8904_v42 = vld [vmem:[%s12404_s2 + $0x8ac] ss:$16 sps:$4 sm:$0xff]  }
 0x1f3   :  { %5997 = vmatpush1.bf16.msra.mxu1 %v8828_v49  ;;  %v8907_v49 = vld [vmem:[%s12404_s2 + $0xcc4] ss:$16 sps:$4 sm:$0xff]  }
 0x1f4   :  { %5653 = vmatpush1.bf16.msra.mxu0 %v8825_v48  ;;  %5998 = vmatprep.subr.bf16.mxu1 %v8836_v28  ;;  %v8902_v48 = vld [vmem:[%s12404_s2 + $0x8a8] ss:$16 sps:$4 sm:$0xff]   ;;  %v8905_v28 = vld [vmem:[%s12404_s2 + $0xcc0] ss:$16 sps:$4 sm:$0xff]  }
 0x1f5   :  { %5654 = vmatprep.subr.bf16.mxu0 %v8833_v52  ;;  %v8910_v52 = vld [vmem:[%s12404_s2 + $0x8cc] ss:$16 sps:$4 sm:$0xff]  }
 0x1f7   :  { %5999 = vmatpush1.bf16.msra.mxu1 %v8834_v54  ;;  %v8913_v54 = vld [vmem:[%s12404_s2 + $0xce4] ss:$16 sps:$4 sm:$0xff]  }
 0x1f8   :  { %5655 = vmatpush1.bf16.msra.mxu0 %v8831_v21  ;;  %6000 = vmatprep.subr.bf16.mxu1 %v8842_v9  ;;  %v8908_v21 = vld [vmem:[%s12404_s2 + $0x8c8] ss:$16 sps:$4 sm:$0xff]   ;;  %v8911_v9 = vld [vmem:[%s12404_s2 + $0xce0] ss:$16 sps:$4 sm:$0xff]  }
 0x1f9   :  { %5656 = vmatprep.subr.bf16.mxu0 %v8839_v55  ;;  %v8916_v55 = vld [vmem:[%s12404_s2 + $0x8ec] ss:$16 sps:$4 sm:$0xff]  }
 0x1fb   :  { %6001 = vmatpush1.bf16.msra.mxu1 %v8840_v59  ;;  %v8919_v59 = vld [vmem:[%s12404_s2 + $0xd04] ss:$16 sps:$4 sm:$0xff]  }
 0x1fc   :  { %5657 = vmatpush1.bf16.msra.mxu0 %v8837_v57  ;;  %6002 = vmatprep.subr.bf16.mxu1 %v8848_v61  ;;  %v8914_v57 = vld [vmem:[%s12404_s2 + $0x8e8] ss:$16 sps:$4 sm:$0xff]   ;;  %v8917_v61 = vld [vmem:[%s12404_s2 + $0xd00] ss:$16 sps:$4 sm:$0xff]  }
 0x1fd   :  { %5658 = vmatprep.subr.bf16.mxu0 %v8845_v58  ;;  %v8922_v58 = vld [vmem:[%s12404_s2 + $0x90c] ss:$16 sps:$4 sm:$0xff]  }
 0x1ff   :  { %6003 = vmatpush1.bf16.msra.mxu1 %v8846_v63  ;;  %v8925_v63 = vld [vmem:[%s12404_s2 + $0xd24] ss:$16 sps:$4 sm:$0xff]  }
 0x200   :  { %5659 = vmatpush1.bf16.msra.mxu0 %v8843_v60  ;;  %6004 = vmatprep.subr.bf16.mxu1 %v8854_v30  ;;  %v8920_v60 = vld [vmem:[%s12404_s2 + $0x908] ss:$16 sps:$4 sm:$0xff]   ;;  %v8923_v30 = vld [vmem:[%s12404_s2 + $0xd20] ss:$16 sps:$4 sm:$0xff]  }
 0x201   :  { %5660 = vmatprep.subr.bf16.mxu0 %v8851_v1  ;;  %v8928_v1 = vld [vmem:[%s12404_s2 + $0x92c] ss:$16 sps:$4 sm:$0xff]  }
 0x203   :  { %6005 = vmatpush1.bf16.msra.mxu1 %v8852_v6  ;;  %v8931_v6 = vld [vmem:[%s12404_s2 + $0xd44] ss:$16 sps:$4 sm:$0xff]  }
 0x204   :  { %5661 = vmatpush1.bf16.msra.mxu0 %v8849_v4  ;;  %6006 = vmatprep.subr.bf16.mxu1 %v8860_v10  ;;  %v8926_v4 = vld [vmem:[%s12404_s2 + $0x928] ss:$16 sps:$4 sm:$0xff]   ;;  %v8929_v10 = vld [vmem:[%s12404_s2 + $0xd40] ss:$16 sps:$4 sm:$0xff]  }
 0x205   :  { %5662 = vmatprep.subr.bf16.mxu0 %v8857_v5  ;;  %v8934_v5 = vld [vmem:[%s12404_s2 + $0x94c] ss:$16 sps:$4 sm:$0xff]  }
 0x207   :  { %6007 = vmatpush1.bf16.msra.mxu1 %v8858_v12  ;;  %v8937_v12 = vld [vmem:[%s12404_s2 + $0xd64] ss:$16 sps:$4 sm:$0xff]  }
 0x208   :  { %5663 = vmatpush1.bf16.msra.mxu0 %v8855_v11  ;;  %6008 = vmatprep.subr.bf16.mxu1 %v8866_v13  ;;  %v8932_v11 = vld [vmem:[%s12404_s2 + $0x948] ss:$16 sps:$4 sm:$0xff]   ;;  %v8935_v13 = vld [vmem:[%s12404_s2 + $0xd60] ss:$16 sps:$4 sm:$0xff]  }
 0x209   :  { %5664 = vmatprep.subr.bf16.mxu0 %v8863_v31  ;;  %v8940_v31 = vld [vmem:[%s12404_s2 + $0x96c] ss:$16 sps:$4 sm:$0xff]  }
 0x20b   :  { %6009 = vmatpush1.bf16.msra.mxu1 %v8864_v15  ;;  %v8941_v15 = vld [vmem:[%s12404_s2 + $0xd80] ss:$16 sps:$4 sm:$0xff]  }
 0x20c   :  { %5665 = vmatpush1.bf16.msra.mxu0 %v8861_v8  ;;  %6021 = vmatprep.subr.bf16.mxu1 %v8874_v16  ;;  %v8946_v8 = vld [vmem:[%s12404_s2 + $0x98c] ss:$16 sps:$4 sm:$0xff]   ;;  %v8949_v16 = vld [vmem:[%s12404_s2 + $0xda4] ss:$16 sps:$4 sm:$0xff]  }
 0x20d   :  { %5677 = vmatprep.subr.bf16.mxu0 %v8871_v44  ;;  %v8944_v44 = vld [vmem:[%s12404_s2 + $0x988] ss:$16 sps:$4 sm:$0xff]  }
 0x20e   :  { %6011 = vmatmul.mubr.bf16.vlgmr.msra.gmra.mrb[4].mxu1 %v10806_v47  ;;  %v8886_v47 = vld [vmem:[%s12404_s2 + $0x84c] ss:$16 sps:$4 sm:$0xff]  }
 0x20f   :  { %5667 = vmatmul.mubr.bf16.vlgmr.msra.gmra.mrb[0].mxu0 %v11238_v56  ;;  %6022 = vmatpush1.bf16.msra.mxu1 %v8872_v25  ;;  %v8947_v25 = vld [vmem:[%s12404_s2 + $0xda0] ss:$16 sps:$4 sm:$0xff]  }
 0x210   :  { %5678 = vmatpush1.bf16.msra.mxu0 %v8869_v24  ;;  %6023 = vmatprep.subr.bf16.mxu1 %v8880_v2  ;;  %v8952_v24 = vld [vmem:[%s12404_s2 + $0x9ac] ss:$16 sps:$4 sm:$0xff]   ;;  %v8955_v2 = vld [vmem:[%s12404_s2 + $0xdc4] ss:$16 sps:$4 sm:$0xff]  }
 0x211   :  { %5679 = vmatprep.subr.bf16.mxu0 %v8877_v27  ;;  %5709 = vmatprep.mubr.bf16.mxu0 %v11254_v3  ;;  %v8950_v27 = vld [vmem:[%s12404_s2 + $0x9a8] ss:$16 sps:$4 sm:$0xff]  }
 0x212   :  { %6053 = vmatprep.mubr.bf16.mxu1 %v10822_v29  ;;  %v8892_v29 = vld [vmem:[%s12404_s2 + $0x86c] ss:$16 sps:$4 sm:$0xff]  }
 0x213   :  { %6024 = vmatpush1.bf16.msra.mxu1 %v8878_v33  ;;  %v8953_v33 = vld [vmem:[%s12404_s2 + $0xdc0] ss:$16 sps:$4 sm:$0xff]  }
 0x214   :  { %5680 = vmatpush1.bf16.msra.mxu0 %v8875_v32  ;;  %6025 = vmatprep.subr.bf16.mxu1 %v8886_v47  ;;  %v8958_v32 = vld [vmem:[%s12404_s2 + $0x9cc] ss:$16 sps:$4 sm:$0xff]   ;;  %v8961_v47 = vld [vmem:[%s12404_s2 + $0xde4] ss:$16 sps:$4 sm:$0xff]  }
 0x215   :  { %5681 = vmatprep.subr.bf16.mxu0 %v8883_v34  ;;  %v8956_v34 = vld [vmem:[%s12404_s2 + $0x9c8] ss:$16 sps:$4 sm:$0xff]  }
 0x217   :  { %6026 = vmatpush1.bf16.msra.mxu1 %v8884_v35  ;;  %v9065_v35 = vld [vmem:[%s12402_s0 + $0x1c] ss:$38 sps:$4 sm:$0xff]  }
 0x218   :  { %5682 = vmatpush1.bf16.msra.mxu0 %v8881_v7  ;;  %6027 = vmatprep.subr.bf16.mxu1 %v8892_v29  ;;  %v8964_v7 = vld [vmem:[%s12404_s2 + $0x9ec] ss:$16 sps:$4 sm:$0xff]   ;;  %v8959_v29 = vld [vmem:[%s12404_s2 + $0xde0] ss:$16 sps:$4 sm:$0xff]  }
 0x219   :  { %5683 = vmatprep.subr.bf16.mxu0 %v8889_v36  ;;  %v9066_v36 = vld [vmem:[%s12402_s0 + $0x68] ss:$38 sps:$4 sm:$0xff]  }
 0x21b   :  { %6028 = vmatpush1.bf16.msra.mxu1 %v8890_v0  ;;  %v8971_v0 = vld [vmem:[%s12404_s2 + $0xe04] ss:$16 sps:$4 sm:$0xff]  }
 0x21c   :  { %5684 = vmatpush1.bf16.msra.mxu0 %v8887_v37  ;;  %6029 = vmatprep.subr.bf16.mxu1 %v8898_v40  ;;  %v8962_v37 = vld [vmem:[%s12404_s2 + $0x9e8] ss:$16 sps:$4 sm:$0xff]   ;;  %v11447_v40 = vrot.slane %v9065_v35, %v9602_v53 }
 0x21d   :  { %5685 = vmatprep.subr.bf16.mxu0 %v8895_v38  ;;  %v8974_v38 = vld [vmem:[%s12404_s2 + $0xa0c] ss:$16 sps:$4 sm:$0xff]   ;;  %v9038_v35 = vld [vmem:[%s12404_s2 + $0xb68] ss:$16 sps:$4 sm:$0xff]  }
 0x21f   :  { %6030 = vmatpush1.bf16.msra.mxu1 %v8896_v50  ;;  %v11454_v50 = vcombine.low %v11231_v17, %v11234_v19  ;;  %v8980_v17 = vld [vmem:[%s12404_s2 + $0xa2c] ss:$16 sps:$4 sm:$0xff]  }
 0x220   :  { %5686 = vmatpush1.bf16.msra.mxu0 %v8893_v18  ;;  %6031 = vmatprep.subr.bf16.mxu1 %v8904_v42  ;;  %v11450_v18 = vrot.slane %v9066_v36, %v9602_v53  ;;  %v8972_v42 = vld [vmem:[%s12404_s2 + $0xa08] ss:$16 sps:$4 sm:$0xff]   ;;  %v9043_v36 = vld [vmem:[%s12404_s2 + $0xf84] ss:$16 sps:$4 sm:$0xff]  }
 0x221   :  { %5687 = vmatprep.subr.bf16.mxu0 %v8901_v41  ;;  %v8969_v41 = vld [vmem:[%s12404_s2 + $0xe00] ss:$16 sps:$4 sm:$0xff]  }
 0x222   :  { %v11470_v19 = vcombine.high %v11447_v40, %v11450_v18 }
 0x223   :  { %6032 = vmatpush1.bf16.msra.mxu1 %v8902_v48  ;;  %v8975_v48 = vld [vmem:[%s12404_s2 + $0xe20] ss:$16 sps:$4 sm:$0xff]  }
 0x224   :  { %5688 = vmatpush1.bf16.msra.mxu0 %v8899_v43  ;;  %6033 = vmatprep.subr.bf16.mxu1 %v8910_v52  ;;  %v8977_v43 = vld [vmem:[%s12404_s2 + $0xe24] ss:$16 sps:$4 sm:$0xff]  }
 0x225   :  { %5689 = vmatprep.subr.bf16.mxu0 %v8907_v49  ;;  %v8978_v49 = vld [vmem:[%s12404_s2 + $0xa28] ss:$16 sps:$4 sm:$0xff]   ;;  %v8983_v52 = vld [vmem:[%s12404_s2 + $0xe44] ss:$16 sps:$4 sm:$0xff]  }
 0x227   :  { %6034 = vmatpush1.bf16.msra.mxu1 %v8908_v21  ;;  %v8984_v21 = vld [vmem:[%s12404_s2 + $0xa48] ss:$16 sps:$4 sm:$0xff]  }
 0x228   :  { %5690 = vmatpush1.bf16.msra.mxu0 %v8905_v28  ;;  %6035 = vmatprep.subr.bf16.mxu1 %v8916_v55  ;;  %v8981_v28 = vld [vmem:[%s12404_s2 + $0xe40] ss:$16 sps:$4 sm:$0xff]  }
 0x229   :  { %5691 = vmatprep.subr.bf16.mxu0 %v8913_v54  ;;  %v8989_v54 = vld [vmem:[%s12404_s2 + $0xe64] ss:$16 sps:$4 sm:$0xff]   ;;  %v8987_v55 = vld [vmem:[%s12404_s2 + $0xe60] ss:$16 sps:$4 sm:$0xff]  }
 0x22b   :  { %6036 = vmatpush1.bf16.msra.mxu1 %v8914_v57  ;;  %v8995_v57 = vld [vmem:[%s12404_s2 + $0xe84] ss:$16 sps:$4 sm:$0xff]  }
 0x22c   :  { %5692 = vmatpush1.bf16.msra.mxu0 %v8911_v9  ;;  %6037 = vmatprep.subr.bf16.mxu1 %v8922_v58  ;;  %v8990_v9 = vld [vmem:[%s12404_s2 + $0xa68] ss:$16 sps:$4 sm:$0xff]   ;;  %v8993_v58 = vld [vmem:[%s12404_s2 + $0xe80] ss:$16 sps:$4 sm:$0xff]  }
 0x22d   :  { %5693 = vmatprep.subr.bf16.mxu0 %v8919_v59  ;;  %v8998_v59 = vld [vmem:[%s12404_s2 + $0xa8c] ss:$16 sps:$4 sm:$0xff]  }
 0x22f   :  { %6038 = vmatpush1.bf16.msra.mxu1 %v8920_v60  ;;  %v9001_v60 = vld [vmem:[%s12404_s2 + $0xea4] ss:$16 sps:$4 sm:$0xff]  }
 0x230   :  { %5694 = vmatpush1.bf16.msra.mxu0 %v8917_v61  ;;  %6039 = vmatprep.subr.bf16.mxu1 %v8928_v1  ;;  %v8996_v61 = vld [vmem:[%s12404_s2 + $0xa88] ss:$16 sps:$4 sm:$0xff]   ;;  %v8999_v1 = vld [vmem:[%s12404_s2 + $0xea0] ss:$16 sps:$4 sm:$0xff]  }
 0x231   :  { %5695 = vmatprep.subr.bf16.mxu0 %v8925_v63  ;;  %v9004_v63 = vld [vmem:[%s12404_s2 + $0xaac] ss:$16 sps:$4 sm:$0xff]  }
 0x233   :  { %6040 = vmatpush1.bf16.msra.mxu1 %v8926_v4  ;;  %v9007_v4 = vld [vmem:[%s12404_s2 + $0xec4] ss:$16 sps:$4 sm:$0xff]  }
 0x234   :  { %5696 = vmatpush1.bf16.msra.mxu0 %v8923_v30  ;;  %6041 = vmatprep.subr.bf16.mxu1 %v8934_v5  ;;  %v9002_v30 = vld [vmem:[%s12404_s2 + $0xaa8] ss:$16 sps:$4 sm:$0xff]   ;;  %v9005_v5 = vld [vmem:[%s12404_s2 + $0xec0] ss:$16 sps:$4 sm:$0xff]  }
 0x235   :  { %5697 = vmatprep.subr.bf16.mxu0 %v8931_v6  ;;  %v9010_v6 = vld [vmem:[%s12404_s2 + $0xacc] ss:$16 sps:$4 sm:$0xff]  }
 0x237   :  { %6042 = vmatpush1.bf16.msra.mxu1 %v8932_v11  ;;  %v9013_v11 = vld [vmem:[%s12404_s2 + $0xee4] ss:$16 sps:$4 sm:$0xff]  }
 0x238   :  { %5698 = vmatpush1.bf16.msra.mxu0 %v8929_v10  ;;  %6043 = vmatprep.subr.bf16.mxu1 %v8940_v31  ;;  %v9008_v10 = vld [vmem:[%s12404_s2 + $0xac8] ss:$16 sps:$4 sm:$0xff]   ;;  %v9011_v31 = vld [vmem:[%s12404_s2 + $0xee0] ss:$16 sps:$4 sm:$0xff]  }
 0x239   :  { %5699 = vmatprep.subr.bf16.mxu0 %v8937_v12  ;;  %v9016_v12 = vld [vmem:[%s12404_s2 + $0xaec] ss:$16 sps:$4 sm:$0xff]  }
 0x23b   :  { %6044 = vmatpush1.bf16.msra.mxu1 %v8938_v62  ;;  %v9019_v62 = vld [vmem:[%s12404_s2 + $0xf04] ss:$16 sps:$4 sm:$0xff]  }
 0x23c   :  { %5700 = vmatpush1.bf16.msra.mxu0 %v8935_v13  ;;  %6045 = vmatprep.subr.bf16.mxu1 %v8946_v8  ;;  %v9014_v13 = vld [vmem:[%s12404_s2 + $0xae8] ss:$16 sps:$4 sm:$0xff]   ;;  %v9017_v8 = vld [vmem:[%s12404_s2 + $0xf00] ss:$16 sps:$4 sm:$0xff]  }
 0x23d   :  { %5701 = vmatprep.subr.bf16.mxu0 %v8943_v14  ;;  %v9022_v14 = vld [vmem:[%s12404_s2 + $0xb0c] ss:$16 sps:$4 sm:$0xff]  }
 0x23f   :  { %6046 = vmatpush1.bf16.msra.mxu1 %v8944_v44  ;;  %v9025_v44 = vld [vmem:[%s12404_s2 + $0xf24] ss:$16 sps:$4 sm:$0xff]  }
 0x240   :  { %5702 = vmatpush1.bf16.msra.mxu0 %v8941_v15  ;;  %6047 = vmatprep.subr.bf16.mxu1 %v8952_v24  ;;  %v9020_v15 = vld [vmem:[%s12404_s2 + $0xb08] ss:$16 sps:$4 sm:$0xff]   ;;  %v9023_v24 = vld [vmem:[%s12404_s2 + $0xf20] ss:$16 sps:$4 sm:$0xff]  }
 0x241   :  { %5703 = vmatprep.subr.bf16.mxu0 %v8949_v16  ;;  %v9028_v16 = vld [vmem:[%s12404_s2 + $0xb2c] ss:$16 sps:$4 sm:$0xff]  }
 0x243   :  { %6048 = vmatpush1.bf16.msra.mxu1 %v8950_v27  ;;  %v9031_v27 = vld [vmem:[%s12404_s2 + $0xf44] ss:$16 sps:$4 sm:$0xff]  }
 0x244   :  { %5704 = vmatpush1.bf16.msra.mxu0 %v8947_v25  ;;  %6049 = vmatprep.subr.bf16.mxu1 %v8958_v32  ;;  %v9026_v25 = vld [vmem:[%s12404_s2 + $0xb28] ss:$16 sps:$4 sm:$0xff]   ;;  %v9029_v32 = vld [vmem:[%s12404_s2 + $0xf40] ss:$16 sps:$4 sm:$0xff]  }
 0x245   :  { %5705 = vmatprep.subr.bf16.mxu0 %v8955_v2  ;;  %v9034_v2 = vld [vmem:[%s12404_s2 + $0xb4c] ss:$16 sps:$4 sm:$0xff]  }
 0x247   :  { %6050 = vmatpush1.bf16.msra.mxu1 %v8956_v34  ;;  %v9037_v34 = vld [vmem:[%s12404_s2 + $0xf64] ss:$16 sps:$4 sm:$0xff]  }
 0x248   :  { %5706 = vmatpush1.bf16.msra.mxu0 %v8953_v33  ;;  %6051 = vmatprep.subr.bf16.mxu1 %v8964_v7  ;;  %v9032_v33 = vld [vmem:[%s12404_s2 + $0xb48] ss:$16 sps:$4 sm:$0xff]   ;;  %v9035_v7 = vld [vmem:[%s12404_s2 + $0xf60] ss:$16 sps:$4 sm:$0xff]  }
 0x249   :  { %5707 = vmatprep.subr.bf16.mxu0 %v8961_v47  ;;  %v9040_v47 = vld [vmem:[%s12404_s2 + $0xb6c] ss:$16 sps:$4 sm:$0xff]  }
 0x24b   :  { %6052 = vmatpush1.bf16.msra.mxu1 %v8962_v37  ;;  %v9041_v37 = vld [vmem:[%s12404_s2 + $0xf80] ss:$16 sps:$4 sm:$0xff]  }
 0x24c   :  { %5708 = vmatpush1.bf16.msra.mxu0 %v8959_v29  ;;  %6064 = vmatprep.subr.bf16.mxu1 %v8974_v38  ;;  %v9046_v29 = vld [vmem:[%s12404_s2 + $0xb8c] ss:$16 sps:$4 sm:$0xff]   ;;  %v9049_v38 = vld [vmem:[%s12404_s2 + $0xfa4] ss:$16 sps:$4 sm:$0xff]  }
 0x24d   :  { %5720 = vmatprep.subr.bf16.mxu0 %v8971_v0  ;;  %v9044_v0 = vld [vmem:[%s12404_s2 + $0xb88] ss:$16 sps:$4 sm:$0xff]  }
 0x24e   :  { %6054 = vmatmul.mubr.bf16.vlgmr.msra.gmra.mrb[4].mxu1 %v11022_v51  ;;  %v8986_v51 = vld [vmem:[%s12404_s2 + $0xa4c] ss:$16 sps:$4 sm:$0xff]  }
 0x24f   :  { %5710 = vmatmul.mubr.bf16.vlgmr.msra.gmra.mrb[0].mxu0 %v11454_v50  ;;  %6065 = vmatpush1.bf16.msra.mxu1 %v8972_v42  ;;  %v9047_v42 = vld [vmem:[%s12404_s2 + $0xfa0] ss:$16 sps:$4 sm:$0xff]  }
 0x250   :  { %5721 = vmatpush1.bf16.msra.mxu0 %v8969_v41  ;;  %6066 = vmatprep.subr.bf16.mxu1 %v8980_v17  ;;  %v9052_v41 = vld [vmem:[%s12404_s2 + $0xbac] ss:$16 sps:$4 sm:$0xff]   ;;  %v9055_v17 = vld [vmem:[%s12404_s2 + $0xfc4] ss:$16 sps:$4 sm:$0xff]  }
 0x251   :  { %5722 = vmatprep.subr.bf16.mxu0 %v8977_v43  ;;  %5752 = vmatprep.mubr.bf16.mxu0 %v11470_v19  ;;  %v9050_v43 = vld [vmem:[%s12404_s2 + $0xba8] ss:$16 sps:$4 sm:$0xff]  }
 0x252   :  { %6096 = vmatprep.mubr.bf16.mxu1 %v11038_v45  ;;  %v8992_v45 = vld [vmem:[%s12404_s2 + $0xa6c] ss:$16 sps:$4 sm:$0xff]  }
 0x253   :  { %6067 = vmatpush1.bf16.msra.mxu1 %v8978_v49  ;;  %v9053_v49 = vld [vmem:[%s12404_s2 + $0xfc0] ss:$16 sps:$4 sm:$0xff]  }
 0x254   :  { %5723 = vmatpush1.bf16.msra.mxu0 %v8975_v48  ;;  %6068 = vmatprep.subr.bf16.mxu1 %v8986_v51  ;;  %v9058_v48 = vld [vmem:[%s12404_s2 + $0xbcc] ss:$16 sps:$4 sm:$0xff]   ;;  %v9061_v51 = vld [vmem:[%s12404_s2 + $0xfe4] ss:$16 sps:$4 sm:$0xff]  }
 0x255   :  { %5724 = vmatprep.subr.bf16.mxu0 %v8983_v52  ;;  %v9056_v52 = vld [vmem:[%s12404_s2 + $0xbc8] ss:$16 sps:$4 sm:$0xff]  }
 0x257   :  { %6069 = vmatpush1.bf16.msra.mxu1 %v8984_v21  ;;  %v9163_v21 = vld [vmem:[%s12402_s0 + $0x20] ss:$38 sps:$4 sm:$0xff]  }
 0x258   :  { %5725 = vmatpush1.bf16.msra.mxu0 %v8981_v28  ;;  %6070 = vmatprep.subr.bf16.mxu1 %v8992_v45  ;;  %v9064_v28 = vld [vmem:[%s12404_s2 + $0xbec] ss:$16 sps:$4 sm:$0xff]   ;;  %v9059_v45 = vld [vmem:[%s12404_s2 + $0xfe0] ss:$16 sps:$4 sm:$0xff]  }
 0x259   :  { %5726 = vmatprep.subr.bf16.mxu0 %v8989_v54  ;;  %v9166_v54 = vld [vmem:[%s12402_s0 + $0x6c] ss:$38 sps:$4 sm:$0xff]  }
 0x25b   :  { %6071 = vmatpush1.bf16.msra.mxu1 %v8990_v9  ;;  %v9069_v9 = vld [vmem:[%s12404_s2 + $0x1004] ss:$16 sps:$4 sm:$0xff]  }
 0x25c   :  { %5727 = vmatpush1.bf16.msra.mxu0 %v8987_v55  ;;  %6072 = vmatprep.subr.bf16.mxu1 %v8998_v59  ;;  %v9062_v55 = vld [vmem:[%s12404_s2 + $0xbe8] ss:$16 sps:$4 sm:$0xff]   ;;  %v11663_v59 = vrot.slane %v9163_v21, %v9602_v53 }
 0x25d   :  { %5728 = vmatprep.subr.bf16.mxu0 %v8995_v57  ;;  %v9072_v57 = vld [vmem:[%s12404_s2 + $0xc0c] ss:$16 sps:$4 sm:$0xff]   ;;  %v9136_v21 = vld [vmem:[%s12404_s2 + $0xd68] ss:$16 sps:$4 sm:$0xff]  }
 0x25f   :  { %6073 = vmatpush1.bf16.msra.mxu1 %v8996_v61  ;;  %v11670_v61 = vcombine.low %v11447_v40, %v11450_v18  ;;  %v9078_v40 = vld [vmem:[%s12404_s2 + $0xc2c] ss:$16 sps:$4 sm:$0xff]  }
 0x260   :  { %5729 = vmatpush1.bf16.msra.mxu0 %v8993_v58  ;;  %6074 = vmatprep.subr.bf16.mxu1 %v9004_v63  ;;  %v11666_v58 = vrot.slane %v9166_v54, %v9602_v53  ;;  %v9070_v63 = vld [vmem:[%s12404_s2 + $0xc08] ss:$16 sps:$4 sm:$0xff]   ;;  %v9141_v54 = vld [vmem:[%s12404_s2 + $0x1184] ss:$16 sps:$4 sm:$0xff]  }
 0x261   :  { %5730 = vmatprep.subr.bf16.mxu0 %v9001_v60  ;;  %v9067_v60 = vld [vmem:[%s12404_s2 + $0x1000] ss:$16 sps:$4 sm:$0xff]  }
 0x262   :  { %v11686_v18 = vcombine.high %v11663_v59, %v11666_v58 }
 0x263   :  { %6075 = vmatpush1.bf16.msra.mxu1 %v9002_v30  ;;  %v9073_v30 = vld [vmem:[%s12404_s2 + $0x1020] ss:$16 sps:$4 sm:$0xff]  }
 0x264   :  { %5731 = vmatpush1.bf16.msra.mxu0 %v8999_v1  ;;  %6076 = vmatprep.subr.bf16.mxu1 %v9010_v6  ;;  %v9075_v1 = vld [vmem:[%s12404_s2 + $0x1024] ss:$16 sps:$4 sm:$0xff]  }
 0x265   :  { %5732 = vmatprep.subr.bf16.mxu0 %v9007_v4  ;;  %v9076_v4 = vld [vmem:[%s12404_s2 + $0xc28] ss:$16 sps:$4 sm:$0xff]   ;;  %v9081_v6 = vld [vmem:[%s12404_s2 + $0x1044] ss:$16 sps:$4 sm:$0xff]  }
 0x267   :  { %6077 = vmatpush1.bf16.msra.mxu1 %v9008_v10  ;;  %v9082_v10 = vld [vmem:[%s12404_s2 + $0xc48] ss:$16 sps:$4 sm:$0xff]  }
 0x268   :  { %5733 = vmatpush1.bf16.msra.mxu0 %v9005_v5  ;;  %6078 = vmatprep.subr.bf16.mxu1 %v9016_v12  ;;  %v9079_v5 = vld [vmem:[%s12404_s2 + $0x1040] ss:$16 sps:$4 sm:$0xff]  }
 0x269   :  { %5734 = vmatprep.subr.bf16.mxu0 %v9013_v11  ;;  %v9087_v11 = vld [vmem:[%s12404_s2 + $0x1064] ss:$16 sps:$4 sm:$0xff]   ;;  %v9085_v12 = vld [vmem:[%s12404_s2 + $0x1060] ss:$16 sps:$4 sm:$0xff]  }
 0x26b   :  { %6079 = vmatpush1.bf16.msra.mxu1 %v9014_v13  ;;  %v9093_v13 = vld [vmem:[%s12404_s2 + $0x1084] ss:$16 sps:$4 sm:$0xff]  }
 0x26c   :  { %5735 = vmatpush1.bf16.msra.mxu0 %v9011_v31  ;;  %6080 = vmatprep.subr.bf16.mxu1 %v9022_v14  ;;  %v9088_v31 = vld [vmem:[%s12404_s2 + $0xc68] ss:$16 sps:$4 sm:$0xff]   ;;  %v9091_v14 = vld [vmem:[%s12404_s2 + $0x1080] ss:$16 sps:$4 sm:$0xff]  }
 0x26d   :  { %5736 = vmatprep.subr.bf16.mxu0 %v9019_v62  ;;  %v9096_v62 = vld [vmem:[%s12404_s2 + $0xc8c] ss:$16 sps:$4 sm:$0xff]  }
 0x26f   :  { %6081 = vmatpush1.bf16.msra.mxu1 %v9020_v15  ;;  %v9099_v15 = vld [vmem:[%s12404_s2 + $0x10a4] ss:$16 sps:$4 sm:$0xff]  }
 0x270   :  { %5737 = vmatpush1.bf16.msra.mxu0 %v9017_v8  ;;  %6082 = vmatprep.subr.bf16.mxu1 %v9028_v16  ;;  %v9094_v8 = vld [vmem:[%s12404_s2 + $0xc88] ss:$16 sps:$4 sm:$0xff]   ;;  %v9097_v16 = vld [vmem:[%s12404_s2 + $0x10a0] ss:$16 sps:$4 sm:$0xff]  }
 0x271   :  { %5738 = vmatprep.subr.bf16.mxu0 %v9025_v44  ;;  %v9102_v44 = vld [vmem:[%s12404_s2 + $0xcac] ss:$16 sps:$4 sm:$0xff]  }
 0x273   :  { %6083 = vmatpush1.bf16.msra.mxu1 %v9026_v25  ;;  %v9105_v25 = vld [vmem:[%s12404_s2 + $0x10c4] ss:$16 sps:$4 sm:$0xff]  }
 0x274   :  { %5739 = vmatpush1.bf16.msra.mxu0 %v9023_v24  ;;  %6084 = vmatprep.subr.bf16.mxu1 %v9034_v2  ;;  %v9100_v24 = vld [vmem:[%s12404_s2 + $0xca8] ss:$16 sps:$4 sm:$0xff]   ;;  %v9103_v2 = vld [vmem:[%s12404_s2 + $0x10c0] ss:$16 sps:$4 sm:$0xff]  }
 0x275   :  { %5740 = vmatprep.subr.bf16.mxu0 %v9031_v27  ;;  %v9108_v27 = vld [vmem:[%s12404_s2 + $0xccc] ss:$16 sps:$4 sm:$0xff]  }
 0x277   :  { %6085 = vmatpush1.bf16.msra.mxu1 %v9032_v33  ;;  %v9111_v33 = vld [vmem:[%s12404_s2 + $0x10e4] ss:$16 sps:$4 sm:$0xff]  }
 0x278   :  { %5741 = vmatpush1.bf16.msra.mxu0 %v9029_v32  ;;  %6086 = vmatprep.subr.bf16.mxu1 %v9040_v47  ;;  %v9106_v32 = vld [vmem:[%s12404_s2 + $0xcc8] ss:$16 sps:$4 sm:$0xff]   ;;  %v9109_v47 = vld [vmem:[%s12404_s2 + $0x10e0] ss:$16 sps:$4 sm:$0xff]  }
 0x279   :  { %5742 = vmatprep.subr.bf16.mxu0 %v9037_v34  ;;  %v9114_v34 = vld [vmem:[%s12404_s2 + $0xcec] ss:$16 sps:$4 sm:$0xff]  }
 0x27b   :  { %6087 = vmatpush1.bf16.msra.mxu1 %v9038_v35  ;;  %v9117_v35 = vld [vmem:[%s12404_s2 + $0x1104] ss:$16 sps:$4 sm:$0xff]  }
 0x27c   :  { %5743 = vmatpush1.bf16.msra.mxu0 %v9035_v7  ;;  %6088 = vmatprep.subr.bf16.mxu1 %v9046_v29  ;;  %v9112_v7 = vld [vmem:[%s12404_s2 + $0xce8] ss:$16 sps:$4 sm:$0xff]   ;;  %v9115_v29 = vld [vmem:[%s12404_s2 + $0x1100] ss:$16 sps:$4 sm:$0xff]  }
 0x27d   :  { %5744 = vmatprep.subr.bf16.mxu0 %v9043_v36  ;;  %v9120_v36 = vld [vmem:[%s12404_s2 + $0xd0c] ss:$16 sps:$4 sm:$0xff]  }
 0x27f   :  { %6089 = vmatpush1.bf16.msra.mxu1 %v9044_v0  ;;  %v9123_v0 = vld [vmem:[%s12404_s2 + $0x1124] ss:$16 sps:$4 sm:$0xff]  }
 0x280   :  { %5745 = vmatpush1.bf16.msra.mxu0 %v9041_v37  ;;  %6090 = vmatprep.subr.bf16.mxu1 %v9052_v41  ;;  %v9118_v37 = vld [vmem:[%s12404_s2 + $0xd08] ss:$16 sps:$4 sm:$0xff]   ;;  %v9121_v41 = vld [vmem:[%s12404_s2 + $0x1120] ss:$16 sps:$4 sm:$0xff]  }
 0x281   :  { %5746 = vmatprep.subr.bf16.mxu0 %v9049_v38  ;;  %v9126_v38 = vld [vmem:[%s12404_s2 + $0xd2c] ss:$16 sps:$4 sm:$0xff]  }
 0x283   :  { %6091 = vmatpush1.bf16.msra.mxu1 %v9050_v43  ;;  %v9129_v43 = vld [vmem:[%s12404_s2 + $0x1144] ss:$16 sps:$4 sm:$0xff]  }
 0x284   :  { %5747 = vmatpush1.bf16.msra.mxu0 %v9047_v42  ;;  %6092 = vmatprep.subr.bf16.mxu1 %v9058_v48  ;;  %v9124_v42 = vld [vmem:[%s12404_s2 + $0xd28] ss:$16 sps:$4 sm:$0xff]   ;;  %v9127_v48 = vld [vmem:[%s12404_s2 + $0x1140] ss:$16 sps:$4 sm:$0xff]  }
 0x285   :  { %5748 = vmatprep.subr.bf16.mxu0 %v9055_v17  ;;  %v9132_v17 = vld [vmem:[%s12404_s2 + $0xd4c] ss:$16 sps:$4 sm:$0xff]  }
 0x287   :  { %6093 = vmatpush1.bf16.msra.mxu1 %v9056_v52  ;;  %v9135_v52 = vld [vmem:[%s12404_s2 + $0x1164] ss:$16 sps:$4 sm:$0xff]  }
 0x288   :  { %5749 = vmatpush1.bf16.msra.mxu0 %v9053_v49  ;;  %6094 = vmatprep.subr.bf16.mxu1 %v9064_v28  ;;  %v9130_v49 = vld [vmem:[%s12404_s2 + $0xd48] ss:$16 sps:$4 sm:$0xff]   ;;  %v9133_v28 = vld [vmem:[%s12404_s2 + $0x1160] ss:$16 sps:$4 sm:$0xff]  }
 0x289   :  { %5750 = vmatprep.subr.bf16.mxu0 %v9061_v51  ;;  %v9138_v51 = vld [vmem:[%s12404_s2 + $0xd6c] ss:$16 sps:$4 sm:$0xff]  }
 0x28b   :  { %6095 = vmatpush1.bf16.msra.mxu1 %v9062_v55  ;;  %v9139_v55 = vld [vmem:[%s12404_s2 + $0x1180] ss:$16 sps:$4 sm:$0xff]  }
 0x28c   :  { %5751 = vmatpush1.bf16.msra.mxu0 %v9059_v45  ;;  %6107 = vmatprep.subr.bf16.mxu1 %v9072_v57  ;;  %v9144_v45 = vld [vmem:[%s12404_s2 + $0xd8c] ss:$16 sps:$4 sm:$0xff]   ;;  %v9147_v57 = vld [vmem:[%s12404_s2 + $0x11a4] ss:$16 sps:$4 sm:$0xff]  }
 0x28d   :  { %5763 = vmatprep.subr.bf16.mxu0 %v9069_v9  ;;  %v9142_v9 = vld [vmem:[%s12404_s2 + $0xd88] ss:$16 sps:$4 sm:$0xff]  }
 0x28e   :  { %6097 = vmatmul.mubr.bf16.vlgmr.msra.gmra.mrb[4].mxu1 %v11238_v56  ;;  %v9084_v56 = vld [vmem:[%s12404_s2 + $0xc4c] ss:$16 sps:$4 sm:$0xff]  }
 0x28f   :  { %5753 = vmatmul.mubr.bf16.vlgmr.msra.gmra.mrb[0].mxu0 %v11670_v61  ;;  %6108 = vmatpush1.bf16.msra.mxu1 %v9070_v63  ;;  %v9145_v63 = vld [vmem:[%s12404_s2 + $0x11a0] ss:$16 sps:$4 sm:$0xff]  }
 0x290   :  { %5764 = vmatpush1.bf16.msra.mxu0 %v9067_v60  ;;  %6109 = vmatprep.subr.bf16.mxu1 %v9078_v40  ;;  %v9150_v60 = vld [vmem:[%s12404_s2 + $0xdac] ss:$16 sps:$4 sm:$0xff]   ;;  %v9153_v40 = vld [vmem:[%s12404_s2 + $0x11c4] ss:$16 sps:$4 sm:$0xff]  }
 0x291   :  { %5765 = vmatprep.subr.bf16.mxu0 %v9075_v1  ;;  %5795 = vmatprep.mubr.bf16.mxu0 %v11686_v18  ;;  %v9148_v1 = vld [vmem:[%s12404_s2 + $0xda8] ss:$16 sps:$4 sm:$0xff]  }
 0x292   :  { %6139 = vmatprep.mubr.bf16.mxu1 %v11254_v3  ;;  %v9090_v3 = vld [vmem:[%s12404_s2 + $0xc6c] ss:$16 sps:$4 sm:$0xff]  }
 0x293   :  { %6110 = vmatpush1.bf16.msra.mxu1 %v9076_v4  ;;  %v9151_v4 = vld [vmem:[%s12404_s2 + $0x11c0] ss:$16 sps:$4 sm:$0xff]  }
 0x294   :  { %5766 = vmatpush1.bf16.msra.mxu0 %v9073_v30  ;;  %6111 = vmatprep.subr.bf16.mxu1 %v9084_v56  ;;  %v9156_v30 = vld [vmem:[%s12404_s2 + $0xdcc] ss:$16 sps:$4 sm:$0xff]   ;;  %v9159_v56 = vld [vmem:[%s12404_s2 + $0x11e4] ss:$16 sps:$4 sm:$0xff]  }
 0x295   :  { %5767 = vmatprep.subr.bf16.mxu0 %v9081_v6  ;;  %v9154_v6 = vld [vmem:[%s12404_s2 + $0xdc8] ss:$16 sps:$4 sm:$0xff]  }
 0x297   :  { %6112 = vmatpush1.bf16.msra.mxu1 %v9082_v10  ;;  %v9157_v10 = vld [vmem:[%s12404_s2 + $0x11e0] ss:$16 sps:$4 sm:$0xff]  }
 0x298   :  { %5768 = vmatpush1.bf16.msra.mxu0 %v9079_v5  ;;  %6113 = vmatprep.subr.bf16.mxu1 %v9090_v3  ;;  %v9162_v5 = vld [vmem:[%s12404_s2 + $0xdec] ss:$16 sps:$4 sm:$0xff]   ;;  %v9171_v3 = vld [vmem:[%s12404_s2 + $0x1204] ss:$16 sps:$4 sm:$0xff]  }
 0x299   :  { %5769 = vmatprep.subr.bf16.mxu0 %v9087_v11  ;;  %v9160_v11 = vld [vmem:[%s12404_s2 + $0xde8] ss:$16 sps:$4 sm:$0xff]  }
 0x29b   :  { %6114 = vmatpush1.bf16.msra.mxu1 %v9088_v31  ;;  %v11874_v31 = vcombine.low %v11663_v59, %v11666_v58  ;;  %v9180_v59 = vld [vmem:[%s12404_s2 + $0xe2c] ss:$16 sps:$4 sm:$0xff]   ;;  %v9165_v58 = vld [vmem:[%s12402_s0 + $0x24] ss:$38 sps:$4 sm:$0x33]  }
 0x29c   :  { %5770 = vmatpush1.bf16.msra.mxu0 %v9085_v12  ;;  %6115 = vmatprep.subr.bf16.mxu1 %v9096_v62  ;;  %v9174_v12 = vld [vmem:[%s12404_s2 + $0xe0c] ss:$16 sps:$4 sm:$0xff]   ;;  %v9172_v62 = vld [vmem:[%s12404_s2 + $0xe08] ss:$16 sps:$4 sm:$0xff]  }
 0x29d   :  { %5771 = vmatprep.subr.bf16.mxu0 %v9093_v13  ;;  %v9169_v13 = vld [vmem:[%s12404_s2 + $0x1200] ss:$16 sps:$4 sm:$0xff]  }
 0x29f   :  { %6116 = vmatpush1.bf16.msra.mxu1 %v9094_v8  ;;  %v9168_v8 = vld [vmem:[%s12402_s0 + $0x70] ss:$38 sps:$4 sm:$0x33]  }
 0x2a0   :  { %5772 = vmatpush1.bf16.msra.mxu0 %v9091_v14  ;;  %6117 = vmatprep.subr.bf16.mxu1 %v9102_v44  ;;  %v9177_v14 = vld [vmem:[%s12404_s2 + $0x1224] ss:$16 sps:$4 sm:$0xff]   ;;  %v9178_v44 = vld [vmem:[%s12404_s2 + $0xe28] ss:$16 sps:$4 sm:$0xff]  }
 0x2a1   :  { %5773 = vmatprep.subr.bf16.mxu0 %v9099_v15  ;;  %v9175_v15 = vld [vmem:[%s12404_s2 + $0x1220] ss:$16 sps:$4 sm:$0xff]  }
 0x2a3   :  { %6118 = vmatpush1.bf16.msra.mxu1 %v9100_v24  ;;  %v2439_v24 = vrot.slane %v9165_v58, %v9602_v53  ;;  %v9309_v58 = vld [vmem:[%s12407_s5 + $0x84] ss:$8 sps:$4 sm:$0xff]  }
 0x2a4   :  { %5774 = vmatpush1.bf16.msra.mxu0 %v9097_v16  ;;  %6119 = vmatprep.subr.bf16.mxu1 %v9108_v27  ;;  %v9183_v16 = vld [vmem:[%s12404_s2 + $0x1244] ss:$16 sps:$4 sm:$0xff]   ;;  %v9181_v27 = vld [vmem:[%s12404_s2 + $0x1240] ss:$16 sps:$4 sm:$0xff]  }
 0x2a5   :  { %5775 = vmatprep.subr.bf16.mxu0 %v9105_v25  ;;  %v2453_v25 = vrot.slane %v9168_v8, %v9602_v53  ;;  %v9267_v53 = vld [vmem:[%s12404_s2 + $0x120c] ss:$16 sps:$4 sm:$0xff]   ;;  %v9220_v8 = vld [vmem:[%s12404_s2 + $0xfc8] ss:$16 sps:$4 sm:$0xff]  }
 0x2a7   :  { %6120 = vmatpush1.bf16.msra.mxu1 %v9106_v32  ;;  %v2456_v32 = vcombine.low %v2439_v24, %v2453_v25  ;;  %v9310_v24 = vld [vmem:[%s12407_s5 + $0x90] ss:$8 sps:$4 sm:$0xff]   ;;  %v9228_v25 = vld [vmem:[%s12404_s2 + $0x100c] ss:$16 sps:$4 sm:$0xff]  }
 0x2a8   :  { %5776 = vmatpush1.bf16.msra.mxu0 %v9103_v2  ;;  %6121 = vmatprep.subr.bf16.mxu1 %v9114_v34  ;;  %v9184_v2 = vld [vmem:[%s12404_s2 + $0xe48] ss:$16 sps:$4 sm:$0xff]  }
 0x2a9   :  { %5777 = vmatprep.subr.bf16.mxu0 %v9111_v33  ;;  %v9187_v33 = vld [vmem:[%s12404_s2 + $0xe68] ss:$16 sps:$4 sm:$0xff]  }
 0x2aa   :  { %v9265_v34 = vld [vmem:[%s12404_s2 + $0x1208] ss:$16 sps:$4 sm:$0xff]  }
 0x2ab   :  { %6122 = vmatpush1.bf16.msra.mxu1 %v9112_v7  ;;  %v9273_v7 = vld [vmem:[%s12404_s2 + $0x122c] ss:$16 sps:$4 sm:$0xff]  }
 0x2ac   :  { %5778 = vmatpush1.bf16.msra.mxu0 %v9109_v47  ;;  %6123 = vmatprep.subr.bf16.mxu1 %v9120_v36  ;;  %v9192_v47 = vld [vmem:[%s12404_s2 + $0xe8c] ss:$16 sps:$4 sm:$0xff]   ;;  %v9271_v36 = vld [vmem:[%s12404_s2 + $0x1228] ss:$16 sps:$4 sm:$0xff]  }
 0x2ad   :  { %5779 = vmatprep.subr.bf16.mxu0 %v9117_v35  ;;  %v9190_v35 = vld [vmem:[%s12404_s2 + $0xe88] ss:$16 sps:$4 sm:$0xff]  }
 0x2af   :  { %6124 = vmatpush1.bf16.msra.mxu1 %v9118_v37  ;;  %v9279_v37 = vld [vmem:[%s12404_s2 + $0x124c] ss:$16 sps:$4 sm:$0xff]  }
 0x2b0   :  { %5780 = vmatpush1.bf16.msra.mxu0 %v9115_v29  ;;  %6125 = vmatprep.subr.bf16.mxu1 %v9126_v38  ;;  %v9195_v29 = vld [vmem:[%s12404_s2 + $0xeac] ss:$16 sps:$4 sm:$0xff]   ;;  %v9277_v38 = vld [vmem:[%s12404_s2 + $0x1248] ss:$16 sps:$4 sm:$0xff]  }
 0x2b1   :  { %5781 = vmatprep.subr.bf16.mxu0 %v9123_v0  ;;  %v9193_v0 = vld [vmem:[%s12404_s2 + $0xea8] ss:$16 sps:$4 sm:$0xff]  }
 0x2b3   :  { %6126 = vmatpush1.bf16.msra.mxu1 %v9124_v42  ;;  %v9196_v42 = vld [vmem:[%s12404_s2 + $0xec8] ss:$16 sps:$4 sm:$0xff]  }
 0x2b4   :  { %5782 = vmatpush1.bf16.msra.mxu0 %v9121_v41  ;;  %6127 = vmatprep.subr.bf16.mxu1 %v9132_v17  ;;  %v9198_v41 = vld [vmem:[%s12404_s2 + $0xecc] ss:$16 sps:$4 sm:$0xff]  }
 0x2b5   :  { %5783 = vmatprep.subr.bf16.mxu0 %v9129_v43  ;;  %v9283_v43 = vld [vmem:[%s12407_s5] ss:$8 sps:$4 sm:$0xff]   ;;  %v9201_v17 = vld [vmem:[%s12404_s2 + $0xeec] ss:$16 sps:$4 sm:$0xff]  }
 0x2b7   :  { %6128 = vmatpush1.bf16.msra.mxu1 %v9130_v49  ;;  %v9199_v49 = vld [vmem:[%s12404_s2 + $0xee8] ss:$16 sps:$4 sm:$0xff]  }
 0x2b8   :  { %5784 = vmatpush1.bf16.msra.mxu0 %v9127_v48  ;;  %6129 = vmatprep.subr.bf16.mxu1 %v9138_v51  ;;  %v9288_v48 = vld [vmem:[%s12407_s5 + $0x14] ss:$8 sps:$4 sm:$0xff]  }
 0x2b9   :  { %5785 = vmatprep.subr.bf16.mxu0 %v9135_v52  ;;  %v9286_v52 = vld [vmem:[%s12407_s5 + $0x10] ss:$8 sps:$4 sm:$0xff]   ;;  %v9204_v51 = vld [vmem:[%s12404_s2 + $0xf0c] ss:$16 sps:$4 sm:$0xff]  }
 0x2bb   :  { %6130 = vmatpush1.bf16.msra.mxu1 %v9136_v21  ;;  %v9202_v21 = vld [vmem:[%s12404_s2 + $0xf08] ss:$16 sps:$4 sm:$0xff]  }
 0x2bc   :  { %5786 = vmatpush1.bf16.msra.mxu0 %v9133_v28  ;;  %6131 = vmatprep.subr.bf16.mxu1 %v9144_v45  ;;  %v9291_v28 = vld [vmem:[%s12407_s5 + $0x24] ss:$8 sps:$4 sm:$0xff]  }
 0x2bd   :  { %5787 = vmatprep.subr.bf16.mxu0 %v9141_v54  ;;  %v9289_v54 = vld [vmem:[%s12407_s5 + $0x20] ss:$8 sps:$4 sm:$0xff]   ;;  %v9207_v45 = vld [vmem:[%s12404_s2 + $0xf2c] ss:$16 sps:$4 sm:$0xff]  }
 0x2bf   :  { %6132 = vmatpush1.bf16.msra.mxu1 %v9142_v9  ;;  %v9205_v9 = vld [vmem:[%s12404_s2 + $0xf28] ss:$16 sps:$4 sm:$0xff]  }
 0x2c0   :  { %5788 = vmatpush1.bf16.msra.mxu0 %v9139_v55  ;;  %6133 = vmatprep.subr.bf16.mxu1 %v9150_v60  ;;  %v9294_v55 = vld [vmem:[%s12407_s5 + $0x34] ss:$8 sps:$4 sm:$0xff]  }
 0x2c1   :  { %5789 = vmatprep.subr.bf16.mxu0 %v9147_v57  ;;  %v9292_v57 = vld [vmem:[%s12407_s5 + $0x30] ss:$8 sps:$4 sm:$0xff]   ;;  %v9210_v60 = vld [vmem:[%s12404_s2 + $0xf4c] ss:$16 sps:$4 sm:$0xff]  }
 0x2c3   :  { %6134 = vmatpush1.bf16.msra.mxu1 %v9148_v1  ;;  %v9208_v1 = vld [vmem:[%s12404_s2 + $0xf48] ss:$16 sps:$4 sm:$0xff]  }
 0x2c4   :  { %5790 = vmatpush1.bf16.msra.mxu0 %v9145_v63  ;;  %6135 = vmatprep.subr.bf16.mxu1 %v9156_v30  ;;  %v9297_v63 = vld [vmem:[%s12407_s5 + $0x44] ss:$8 sps:$4 sm:$0xff]  }
 0x2c5   :  { %5791 = vmatprep.subr.bf16.mxu0 %v9153_v40  ;;  %v9295_v40 = vld [vmem:[%s12407_s5 + $0x40] ss:$8 sps:$4 sm:$0xff]   ;;  %v9213_v30 = vld [vmem:[%s12404_s2 + $0xf6c] ss:$16 sps:$4 sm:$0xff]  }
 0x2c7   :  { %6136 = vmatpush1.bf16.msra.mxu1 %v9154_v6  ;;  %v9211_v6 = vld [vmem:[%s12404_s2 + $0xf68] ss:$16 sps:$4 sm:$0xff]  }
 0x2c8   :  { %5792 = vmatpush1.bf16.msra.mxu0 %v9151_v4  ;;  %6137 = vmatprep.subr.bf16.mxu1 %v9162_v5  ;;  %v9300_v4 = vld [vmem:[%s12407_s5 + $0x54] ss:$8 sps:$4 sm:$0xff]  }
 0x2c9   :  { %5793 = vmatprep.subr.bf16.mxu0 %v9159_v56  ;;  %v9298_v56 = vld [vmem:[%s12407_s5 + $0x50] ss:$8 sps:$4 sm:$0xff]   ;;  %v9216_v5 = vld [vmem:[%s12404_s2 + $0xf8c] ss:$16 sps:$4 sm:$0xff]  }
 0x2cb   :  { %6138 = vmatpush1.bf16.msra.mxu1 %v9160_v11  ;;  %v9214_v11 = vld [vmem:[%s12404_s2 + $0xf88] ss:$16 sps:$4 sm:$0xff]  }
 0x2cc   :  { %5794 = vmatpush1.bf16.msra.mxu0 %v9157_v10  ;;  %6150 = vmatprep.subr.bf16.mxu1 %v9174_v12  ;;  %v9303_v10 = vld [vmem:[%s12407_s5 + $0x64] ss:$8 sps:$4 sm:$0xff]  }
 0x2cd   :  { %5806 = vmatprep.subr.bf16.mxu0 %v9171_v3  ;;  %v9301_v3 = vld [vmem:[%s12407_s5 + $0x60] ss:$8 sps:$4 sm:$0xff]   ;;  %v9219_v12 = vld [vmem:[%s12404_s2 + $0xfac] ss:$16 sps:$4 sm:$0xff]  }
 0x2ce   :  { %6140 = vmatmul.mubr.bf16.vlgmr.msra.gmra.mrb[4].mxu1 %v11454_v50  ;;  %v9186_v50 = vld [vmem:[%s12404_s2 + $0xe4c] ss:$16 sps:$4 sm:$0xff]  }
 0x2cf   :  { %5796 = vmatmul.mubr.bf16.vlgmr.msra.gmra.mrb[0].mxu0 %v11874_v31  ;;  %6151 = vmatpush1.bf16.msra.mxu1 %v9172_v62  ;;  %v9217_v62 = vld [vmem:[%s12404_s2 + $0xfa8] ss:$16 sps:$4 sm:$0xff]  }
 0x2d0   :  { %5807 = vmatpush1.bf16.msra.mxu0 %v9169_v13  ;;  %6152 = vmatprep.subr.bf16.mxu1 %v9180_v59  ;;  %v9306_v13 = vld [vmem:[%s12407_s5 + $0x74] ss:$8 sps:$4 sm:$0xff]  }
 0x2d1   :  { %5808 = vmatprep.subr.bf16.mxu0 %v9177_v14  ;;  %5838 = vmatprep.mubr.bf16.mxu0 %v9404_v39  ;;  %v9304_v14 = vld [vmem:[%s12407_s5 + $0x70] ss:$8 sps:$4 sm:$0xff]   ;;  %v9222_v59 = vld [vmem:[%s12404_s2 + $0xfcc] ss:$16 sps:$4 sm:$0xff]  }
 0x2d2   :  { %6182 = vmatprep.mubr.bf16.mxu1 %v11470_v19  ;;  %v9189_v19 = vld [vmem:[%s12404_s2 + $0xe6c] ss:$16 sps:$4 sm:$0xff]  }
 0x2d3   :  { %6153 = vmatpush1.bf16.msra.mxu1 %v9178_v44  ;;  %v9225_v44 = vld [vmem:[%s12404_s2 + $0xfec] ss:$16 sps:$4 sm:$0xff]  }
 0x2d4   :  { %5809 = vmatpush1.bf16.msra.mxu0 %v9175_v15  ;;  %6154 = vmatprep.subr.bf16.mxu1 %v9186_v50  ;;  %v9307_v15 = vld [vmem:[%s12407_s5 + $0x80] ss:$8 sps:$4 sm:$0xff]  }
 0x2d5   :  { %5810 = vmatprep.subr.bf16.mxu0 %v9183_v16  ;;  %v9312_v16 = vld [vmem:[%s12407_s5 + $0x94] ss:$8 sps:$4 sm:$0xff]   ;;  %v9223_v50 = vld [vmem:[%s12404_s2 + $0xfe8] ss:$16 sps:$4 sm:$0xff]  }
 0x2d7   :  { %6155 = vmatpush1.bf16.msra.mxu1 %v9184_v2  ;;  %v9226_v2 = vld [vmem:[%s12404_s2 + $0x1008] ss:$16 sps:$4 sm:$0xff]  }
 0x2d8   :  { %5811 = vmatpush1.bf16.msra.mxu0 %v9181_v27  ;;  %6156 = vmatprep.subr.bf16.mxu1 %v9189_v19  ;;  %v9315_v27 = vld [vmem:[%s12407_s5 + $0xa4] ss:$8 sps:$4 sm:$0xff]  }
 0x2d9   :  { %6236 = vmatprep.subr.bf16.mxu0 %v9267_v53  ;;  %v9231_v19 = vld [vmem:[%s12404_s2 + $0x102c] ss:$16 sps:$4 sm:$0xff]   ;;  %v9313_v53 = vld [vmem:[%s12407_s5 + $0xa0] ss:$8 sps:$4 sm:$0xff]  }
 0x2db   :  { %7846 = vmatmul.mubr.msk.bf16.vlgmr.msra.gmra.mrb[0].mxu0 %vm5415_vm1, %v2456_v32  ;;  %6157 = vmatpush1.bf16.msra.mxu1 %v9187_v33  ;;  %v9229_v33 = vld [vmem:[%s12404_s2 + $0x1028] ss:$16 sps:$4 sm:$0xff]  }
 0x2dc   :  { %6237 = vmatpush1.bf16.msra.mxu0 %v9265_v34  ;;  %6158 = vmatprep.subr.bf16.mxu1 %v9192_v47  ;;  %v9234_v34 = vld [vmem:[%s12404_s2 + $0x104c] ss:$16 sps:$4 sm:$0xff]   ;;  %v9316_v47 = vld [vmem:[%s12407_s5 + $0xb0] ss:$8 sps:$4 sm:$0xff]  }
 0x2dd   :  { %6238 = vmatprep.subr.bf16.mxu0 %v9273_v7  ;;  %6268 = vmatprep.mubr.bf16.mxu0 %v9404_v39  ;;  %v9285_v39 = vld [vmem:[%s12407_s5 + $0x4] ss:$8 sps:$4 sm:$0xff]  }
 0x2de   :  { %v9237_v7 = vld [vmem:[%s12404_s2 + $0x106c] ss:$16 sps:$4 sm:$0xff]  }
 0x2df   :  { %6159 = vmatpush1.bf16.msra.mxu1 %v9190_v35  ;;  %v9319_v35 = vld [vmem:[%s12407_s5 + $0xc0] ss:$8 sps:$4 sm:$0xff]  }
 0x2e0   :  { %6239 = vmatpush1.bf16.msra.mxu0 %v9271_v36  ;;  %6160 = vmatprep.subr.bf16.mxu1 %v9195_v29  ;;  %v9235_v36 = vld [vmem:[%s12404_s2 + $0x1068] ss:$16 sps:$4 sm:$0xff]   ;;  %v9240_v29 = vld [vmem:[%s12404_s2 + $0x108c] ss:$16 sps:$4 sm:$0xff]  }
 0x2e1   :  { %6240 = vmatprep.subr.bf16.mxu0 %v9279_v37  ;;  %v9238_v37 = vld [vmem:[%s12404_s2 + $0x1088] ss:$16 sps:$4 sm:$0xff]  }
 0x2e3   :  { %6161 = vmatpush1.bf16.msra.mxu1 %v9193_v0  ;;  %v9243_v0 = vld [vmem:[%s12404_s2 + $0x10ac] ss:$16 sps:$4 sm:$0xff]  }
 0x2e4   :  { %6241 = vmatpush1.bf16.msra.mxu0 %v9277_v38  ;;  %6162 = vmatprep.subr.bf16.mxu1 %v9198_v41  ;;  %v9241_v38 = vld [vmem:[%s12404_s2 + $0x10a8] ss:$16 sps:$4 sm:$0xff]   ;;  %v9246_v41 = vld [vmem:[%s12404_s2 + $0x10cc] ss:$16 sps:$4 sm:$0xff]  }
 0x2e5   :  { %6733 = vmatprep.subr.bf16.mxu0 %v9285_v39  ;;  %v9244_v39 = vld [vmem:[%s12404_s2 + $0x10c8] ss:$16 sps:$4 sm:$0xff]  }
 0x2e7   :  { %7847 = vmatmul.mubr.msk.bf16.vlgmr.msra.gmra.mrb[4].mxu0 %vm5415_vm1, %v2456_v32  ;;  %6163 = vmatpush1.bf16.msra.mxu1 %v9196_v42  ;;  %v9318_v32 = vld [vmem:[%s12407_s5 + $0xb4] ss:$8 sps:$4 sm:$0xff]  }
 0x2e8   :  { %6734 = vmatpush1.bf16.msra.mxu0 %v9283_v43  ;;  %6164 = vmatprep.subr.bf16.mxu1 %v9201_v17  ;;  %v9249_v42 = vld [vmem:[%s12404_s2 + $0x10ec] ss:$16 sps:$4 sm:$0xff]   ;;  %v9247_v43 = vld [vmem:[%s12404_s2 + $0x10e8] ss:$16 sps:$4 sm:$0xff]  }
 0x2e9   :  { %6735 = vmatprep.subr.bf16.mxu0 %v9288_v48  ;;  %v9252_v17 = vld [vmem:[%s12404_s2 + $0x110c] ss:$16 sps:$4 sm:$0xff]   ;;  %v9250_v48 = vld [vmem:[%s12404_s2 + $0x1108] ss:$16 sps:$4 sm:$0xff]  }
 0x2eb   :  { %6165 = vmatpush1.bf16.msra.mxu1 %v9199_v49  ;;  %v9255_v49 = vld [vmem:[%s12404_s2 + $0x112c] ss:$16 sps:$4 sm:$0xff]  }
 0x2ec   :  { %6736 = vmatpush1.bf16.msra.mxu0 %v9286_v52  ;;  %6166 = vmatprep.subr.bf16.mxu1 %v9204_v51  ;;  %v9324_v52 = vld [vmem:[%s12407_s5 + $0xd4] ss:$8 sps:$4 sm:$0xff]   ;;  %v9322_v51 = vld [vmem:[%s12407_s5 + $0xd0] ss:$8 sps:$4 sm:$0xff]  }
 0x2ed   :  { %6737 = vmatprep.subr.bf16.mxu0 %v9291_v28  ;;  %v9253_v28 = vld [vmem:[%s12404_s2 + $0x1128] ss:$16 sps:$4 sm:$0xff]  }
 0x2ef   :  { %6167 = vmatpush1.bf16.msra.mxu1 %v9202_v21  ;;  %v9258_v21 = vld [vmem:[%s12404_s2 + $0x114c] ss:$16 sps:$4 sm:$0xff]  }
 0x2f0   :  { %6738 = vmatpush1.bf16.msra.mxu0 %v9289_v54  ;;  %6168 = vmatprep.subr.bf16.mxu1 %v9207_v45  ;;  %v9327_v54 = vld [vmem:[%s12407_s5 + $0xe4] ss:$8 sps:$4 sm:$0xff]   ;;  %v9325_v45 = vld [vmem:[%s12407_s5 + $0xe0] ss:$8 sps:$4 sm:$0xff]  }
 0x2f1   :  { %6739 = vmatprep.subr.bf16.mxu0 %v9294_v55  ;;  %v9256_v55 = vld [vmem:[%s12404_s2 + $0x1148] ss:$16 sps:$4 sm:$0xff]  }
 0x2f3   :  { %6169 = vmatpush1.bf16.msra.mxu1 %v9205_v9  ;;  %v9261_v9 = vld [vmem:[%s12404_s2 + $0x116c] ss:$16 sps:$4 sm:$0xff]  }
 0x2f4   :  { %6740 = vmatpush1.bf16.msra.mxu0 %v9292_v57  ;;  %6170 = vmatprep.subr.bf16.mxu1 %v9210_v60  ;;  %v9330_v57 = vld [vmem:[%s12407_s5 + $0xf4] ss:$8 sps:$4 sm:$0xff]   ;;  %v9328_v60 = vld [vmem:[%s12407_s5 + $0xf0] ss:$8 sps:$4 sm:$0xff]  }
 0x2f5   :  { %6741 = vmatprep.subr.bf16.mxu0 %v9297_v63  ;;  %v9259_v63 = vld [vmem:[%s12404_s2 + $0x1168] ss:$16 sps:$4 sm:$0xff]  }
 0x2f7   :  { %6171 = vmatpush1.bf16.msra.mxu1 %v9208_v1  ;;  %v9264_v1 = vld [vmem:[%s12404_s2 + $0x118c] ss:$16 sps:$4 sm:$0xff]  }
 0x2f8   :  { %6742 = vmatpush1.bf16.msra.mxu0 %v9295_v40  ;;  %6172 = vmatprep.subr.bf16.mxu1 %v9213_v30  ;;  %v9262_v40 = vld [vmem:[%s12404_s2 + $0x1188] ss:$16 sps:$4 sm:$0xff]   ;;  %v9333_v30 = vld [vmem:[%s12407_s5 + $0x104] ss:$8 sps:$4 sm:$0xff]  }
 0x2f9   :  { %6743 = vmatprep.subr.bf16.mxu0 %v9300_v4  ;;  %v9270_v4 = vld [vmem:[%s12404_s2 + $0x11ac] ss:$16 sps:$4 sm:$0xff]  }
 0x2fb   :  { %6173 = vmatpush1.bf16.msra.mxu1 %v9211_v6  ;;  %v9268_v6 = vld [vmem:[%s12404_s2 + $0x11a8] ss:$16 sps:$4 sm:$0xff]  }
 0x2fc   :  { %6744 = vmatpush1.bf16.msra.mxu0 %v9298_v56  ;;  %6174 = vmatprep.subr.bf16.mxu1 %v9216_v5  ;;  %v9276_v56 = vld [vmem:[%s12404_s2 + $0x11cc] ss:$16 sps:$4 sm:$0xff]   ;;  %v9274_v5 = vld [vmem:[%s12404_s2 + $0x11c8] ss:$16 sps:$4 sm:$0xff]  }
 0x2fd   :  { %6745 = vmatprep.subr.bf16.mxu0 %v9303_v10  ;;  %v9282_v10 = vld [vmem:[%s12404_s2 + $0x11ec] ss:$16 sps:$4 sm:$0xff]  }
 0x2ff   :  { %6175 = vmatpush1.bf16.msra.mxu1 %v9214_v11  ;;  %v9280_v11 = vld [vmem:[%s12404_s2 + $0x11e8] ss:$16 sps:$4 sm:$0xff]  }
 0x300   :  { %6746 = vmatpush1.bf16.msra.mxu0 %v9301_v3  ;;  %6176 = vmatprep.subr.bf16.mxu1 %v9219_v12  ;;  %v6283_v3 = vsub.s32 0, %v9581_v46  ;;  %v12219_v12 = vld [vmem:[%s12406_s4] sm:$0xf] }
 0x301   :  { %6747 = vmatprep.subr.bf16.mxu0 %v9306_v13  ;;  %v6287_v13 = vsub.s32 1, %v9581_v46 }
 0x303   :  { %6177 = vmatpush1.bf16.msra.mxu1 %v9217_v62  ;;  %v6284_v62 = vrot.slane %v12219_v12, %v6283_v3 }
 0x304   :  { %6748 = vmatpush1.bf16.msra.mxu0 %v9304_v14  ;;  %6178 = vmatprep.subr.bf16.mxu1 %v9222_v59  ;;  %v6288_v59 = vrot.slane %v12219_v12, %v6287_v13 }
 0x305   :  { %6749 = vmatprep.subr.bf16.mxu0 %v9309_v58 }
 0x307   :  { %6179 = vmatpush1.bf16.msra.mxu1 %v9220_v8 }
 0x308   :  { %6750 = vmatpush1.bf16.msra.mxu0 %v9307_v15  ;;  %6180 = vmatprep.subr.bf16.mxu1 %v9225_v44  ;;  %v9379_v44 = vld [vmem:[%s12409_s7 + $0x40] sm:$0xff]  }
 0x309   :  { %6751 = vmatprep.subr.bf16.mxu0 %v9312_v16  ;;  %v9380_v16 = vld [vmem:[%s12409_s7] sm:$0xff]  }
 0x30b   :  { %6181 = vmatpush1.bf16.msra.mxu1 %v9223_v50  ;;  %v9381_v50 = vld [vmem:[%s12409_s7 + $0x48] sm:$0xff]  }
 0x30c   :  { %6752 = vmatpush1.bf16.msra.mxu0 %v9310_v24  ;;  %6193 = vmatprep.subr.bf16.mxu1 %v9228_v25 }
 0x30d   :  { %6753 = vmatprep.subr.bf16.mxu0 %v9315_v27 }
 0x30e   :  { %6183 = vmatmul.mubr.bf16.vlgmr.msra.gmra.mrb[4].mxu1 %v11670_v61  ;;  %v9321_v61 = vld [vmem:[%s12407_s5 + $0xc4] ss:$8 sps:$4 sm:$0xff]  }
 0x30f   :  { %6194 = vmatpush1.bf16.msra.mxu1 %v9226_v2  ;;  %6225 = vmatprep.mubr.bf16.mxu1 %v11686_v18  ;;  %v9232_v18 = vld [vmem:[%s12404_s2 + $0x1048] ss:$16 sps:$4 sm:$0xff]  }
 0x310   :  { %6195 = vmatprep.subr.bf16.mxu1 %v9231_v19  ;;  %6754 = vmatpush1.bf16.msra.mxu0 %v9313_v53  ;;  %v9382_v53 = vld [vmem:[%s12409_s7 + $0x8] sm:$0xff]  }
 0x311   :  { %6755 = vmatprep.subr.bf16.mxu0 %v9318_v32 }
 0x313   :  { %6196 = vmatpush1.bf16.msra.mxu1 %v9229_v33 }
 0x314   :  { %6197 = vmatprep.subr.bf16.mxu1 %v9234_v34  ;;  %6756 = vmatpush1.bf16.msra.mxu0 %v9316_v47 }
 0x315   :  { %6757 = vmatprep.subr.bf16.mxu0 %v9321_v61 }
 0x317   :  { %6198 = vmatpush1.bf16.msra.mxu1 %v9232_v18  ;;  %v9384_v18 = vld [vmem:[%s12409_s7 + $0x10] sm:$0xff]  }
 0x318   :  { %6199 = vmatprep.subr.bf16.mxu1 %v9237_v7  ;;  %6758 = vmatpush1.bf16.msra.mxu0 %v9319_v35 }
 0x319   :  { %6759 = vmatprep.subr.bf16.mxu0 %v9324_v52  ;;  %v9339_v52 = vld [vmem:[%s12407_s5 + $0x124] ss:$8 sps:$4 sm:$0xff]  }
 0x31b   :  { %6200 = vmatpush1.bf16.msra.mxu1 %v9235_v36 }
 0x31c   :  { %6201 = vmatprep.subr.bf16.mxu1 %v9240_v29  ;;  %6760 = vmatpush1.bf16.msra.mxu0 %v9322_v51  ;;  %v9385_v29 = vld [vmem:[%s12409_s7 + $0x58] sm:$0xff]   ;;  %v9388_v51 = vld [vmem:[%s12409_s7 + $0x20] sm:$0xff]  }
 0x31d   :  { %6761 = vmatprep.subr.bf16.mxu0 %v9327_v54  ;;  %v9340_v54 = vld [vmem:[%s12407_s5 + $0x130] ss:$8 sps:$4 sm:$0xff]  }
 0x31f   :  { %6202 = vmatpush1.bf16.msra.mxu1 %v9238_v37 }
 0x320   :  { %6203 = vmatprep.subr.bf16.mxu1 %v9243_v0  ;;  %6762 = vmatpush1.bf16.msra.mxu0 %v9325_v45  ;;  %v9331_v0 = vld [vmem:[%s12407_s5 + $0x100] ss:$8 sps:$4 sm:$0xff]   ;;  %v9345_v45 = vld [vmem:[%s12407_s5 + $0x144] ss:$8 sps:$4 sm:$0xff]  }
 0x321   :  { %6763 = vmatprep.subr.bf16.mxu0 %v9330_v57  ;;  %v9346_v57 = vld [vmem:[%s12407_s5 + $0x150] ss:$8 sps:$4 sm:$0xff]  }
 0x323   :  { %6204 = vmatpush1.bf16.msra.mxu1 %v9241_v38  ;;  %v9336_v38 = vld [vmem:[%s12407_s5 + $0x114] ss:$8 sps:$4 sm:$0xff]  }
 0x324   :  { %6205 = vmatprep.subr.bf16.mxu1 %v9246_v41  ;;  %6764 = vmatpush1.bf16.msra.mxu0 %v9328_v60  ;;  %v9351_v60 = vld [vmem:[%s12407_s5 + $0x164] ss:$8 sps:$4 sm:$0xff]  }
 0x325   :  { %6776 = vmatprep.subr.bf16.mxu0 %v9333_v30  ;;  %v9357_v30 = vld [vmem:[%s12407_s5 + $0x184] ss:$8 sps:$4 sm:$0xff]  }
 0x327   :  { %6206 = vmatpush1.bf16.msra.mxu1 %v9244_v39 }
 0x328   :  { %6207 = vmatprep.subr.bf16.mxu1 %v9249_v42  ;;  %v9386_v42 = vld [vmem:[%s12409_s7 + $0x18] sm:$0xff]  }
 0x32b   :  { %6208 = vmatpush1.bf16.msra.mxu1 %v9247_v43 }
 0x32c   :  { %6209 = vmatprep.subr.bf16.mxu1 %v9252_v17  ;;  %v9387_v17 = vld [vmem:[%s12409_s7 + $0x60] sm:$0xff]  }
 0x32f   :  { %6210 = vmatpush1.bf16.msra.mxu1 %v9250_v48  ;;  %v9334_v48 = vld [vmem:[%s12407_s5 + $0x110] ss:$8 sps:$4 sm:$0xff]  }
 0x330   :  { %6211 = vmatprep.subr.bf16.mxu1 %v9255_v49 }
 0x333   :  { %6212 = vmatpush1.bf16.msra.mxu1 %v9253_v28  ;;  %v9337_v28 = vld [vmem:[%s12407_s5 + $0x120] ss:$8 sps:$4 sm:$0xff]  }
 0x334   :  { %6213 = vmatprep.subr.bf16.mxu1 %v9258_v21  ;;  %v9342_v21 = vld [vmem:[%s12407_s5 + $0x134] ss:$8 sps:$4 sm:$0xff]  }
 0x337   :  { %6214 = vmatpush1.bf16.msra.mxu1 %v9256_v55  ;;  %v9343_v55 = vld [vmem:[%s12407_s5 + $0x140] ss:$8 sps:$4 sm:$0xff]  }
 0x338   :  { %6215 = vmatprep.subr.bf16.mxu1 %v9261_v9  ;;  %v9348_v9 = vld [vmem:[%s12407_s5 + $0x154] ss:$8 sps:$4 sm:$0xff]  }
 0x33b   :  { %6216 = vmatpush1.bf16.msra.mxu1 %v9259_v63  ;;  %v9349_v63 = vld [vmem:[%s12407_s5 + $0x160] ss:$8 sps:$4 sm:$0xff]  }
 0x33c   :  { %6217 = vmatprep.subr.bf16.mxu1 %v9264_v1  ;;  %v9354_v1 = vld [vmem:[%s12407_s5 + $0x174] ss:$8 sps:$4 sm:$0xff]  }
 0x33f   :  { %6218 = vmatpush1.bf16.msra.mxu1 %v9262_v40  ;;  %v9352_v40 = vld [vmem:[%s12407_s5 + $0x170] ss:$8 sps:$4 sm:$0xff]  }
 0x340   :  { %6219 = vmatprep.subr.bf16.mxu1 %v9270_v4  ;;  %v9355_v4 = vld [vmem:[%s12407_s5 + $0x180] ss:$8 sps:$4 sm:$0xff]  }
 0x343   :  { %6220 = vmatpush1.bf16.msra.mxu1 %v9268_v6  ;;  %v9360_v6 = vld [vmem:[%s12407_s5 + $0x194] ss:$8 sps:$4 sm:$0xff]  }
 0x344   :  { %6221 = vmatprep.subr.bf16.mxu1 %v9276_v56  ;;  %v9358_v56 = vld [vmem:[%s12407_s5 + $0x190] ss:$8 sps:$4 sm:$0xff]  }
 0x347   :  { %6222 = vmatpush1.bf16.msra.mxu1 %v9274_v5  ;;  %v9363_v5 = vld [vmem:[%s12407_s5 + $0x1a4] ss:$8 sps:$4 sm:$0xff]  }
 0x348   :  { %6223 = vmatprep.subr.bf16.mxu1 %v9282_v10  ;;  %v9361_v10 = vld [vmem:[%s12407_s5 + $0x1a0] ss:$8 sps:$4 sm:$0xff]  }
 0x34b   :  { %6224 = vmatpush1.bf16.msra.mxu1 %v9280_v11  ;;  %v9366_v11 = vld [vmem:[%s12407_s5 + $0x1b4] ss:$8 sps:$4 sm:$0xff]  }
 0x34c   :  { %7929 = vmatprep.subr.bf16.mxu1 %v9379_v44  ;;  %v9378_v44 = vld [vmem:[%s12407_s5 + $0x1f4] ss:$8 sps:$4 sm:$0xff]  }
 0x34e   :  { %6226 = vmatmul.mubr.bf16.vlgmr.msra.gmra.mrb[4].mxu1 %v11874_v31 }
 0x34f   :  { %7930 = vmatpush3.bf16.msra.mxu1 %v9380_v16  ;;  %v9376_v16 = vld [vmem:[%s12407_s5 + $0x1f0] ss:$8 sps:$4 sm:$0xff]  }
 0x350   :  { %7931 = vmatprep.subr.bf16.mxu1 %v9381_v50  ;;  %v6291_v50 = vsub.s32 2, %v9581_v46 }
 0x353   :  { %7932 = vmatpush3.bf16.msra.mxu1 %v9382_v53 }
 0x3ae   :  { %v5840_v14 = vpop.f32.mrb[0].mxu0 }
 0x3af   :  { %v7951_v31 = vadd.f32 %v5840_v14, %v10412_v20  ;;  %v5842_v58 = vpop.f32.mrb[1].mxu0  ;;  %v9369_v14 = vld [vmem:[%s12407_s5 + $0x1c4] ss:$8 sps:$4 sm:$0xff]  }
 0x3b0   :  { %v7952_v8 = vadd.f32 %v5842_v58, %v10414_v22  ;;  %v5844_v15 = vpop.f32.mrb[2].mxu0  ;;  %v9370_v58 = vld [vmem:[%s12407_s5 + $0x1d0] ss:$8 sps:$4 sm:$0xff]  }
 0x3b1   :  { %v6301_v24 = vadd.f32 %v7951_v31, %v6284_v62  ;;  %v7953_v25 = vadd.f32 %v5844_v15, %v10416_v23  ;;  %v5846_v20 = vpop.f32.mrb[3].mxu0  ;;  %v9383_v23 = vld [vmem:[%s12409_s7 + $0x50] sm:$0xff]   ;;  %v9373_v15 = vld [vmem:[%s12407_s5 + $0x1e0] ss:$8 sps:$4 sm:$0xff]  }
 0x3b2   :  { %v6302_v27 = vadd.f32 %v7952_v8, %v6288_v59  ;;  %v7954_v22 = vadd.f32 %v5846_v20, %v10424_v26  ;;  %7933 = vmatprep.subr.bf16.mxu1 %v9383_v23  ;;  %v9372_v31 = vld [vmem:[%s12407_s5 + $0x1d4] ss:$8 sps:$4 sm:$0xff]   ;;  %v9375_v8 = vld [vmem:[%s12407_s5 + $0x1e4] ss:$8 sps:$4 sm:$0xff]  }
 0x3b3   :  { %v6317_v2 = vmul.f32 0.2, %v6301_v24  ;;  %v6305_v19 = vadd.f32 %v7953_v25, %v6284_v62  ;;  %vm6309_vm2 = vcmp.gt.f32.partialorder %v6301_v24, 0.0  ;;  %7934 = vmatpush3.bf16.msra.mxu1 %v9384_v18  ;;  %v9364_v62 = vld [vmem:[%s12407_s5 + $0x1b0] ss:$8 sps:$4 sm:$0xff]   ;;  %v6292_v25 = vrot.slane %v12219_v12, %v6291_v50 }
 0x3b4   :  { %v6318_v32 = vmul.f32 0.2, %v6302_v27  ;;  %v6306_v33 = vadd.f32 %v7954_v22, %v6288_v59  ;;  %vm6310_vm3 = vcmp.gt.f32.partialorder %v6302_v27, 0.0  ;;  %7935 = vmatprep.subr.bf16.mxu1 %v9385_v29  ;;  %v9367_v59 = vld [vmem:[%s12407_s5 + $0x1c0] ss:$8 sps:$4 sm:$0xff]  }
 0x3b5   :  { %vm6313_vm4 = vcmp.gt.f32.partialorder %v6305_v19, 0.0  ;;  %v6321_v34 = vmul.f32 0.2, %v6305_v19  ;;  %v6325_v47 = vsel %vm6309_vm2, %v6301_v24, %v6317_v2  ;;  %v6295_v24 = vsub.s32 3, %v9581_v46 }
 0x3b6   :  { %vm6314_vm5 = vcmp.gt.f32.partialorder %v6306_v33, 0.0  ;;  %v6322_v26 = vmul.f32 0.2, %v6306_v33  ;;  %v6326_v7 = vsel %vm6310_vm3, %v6302_v27, %v6318_v32 }
 0x3b7   :  { %v6329_v61 = vsel %vm6313_vm4, %v6305_v19, %v6321_v34  ;;  %7936 = vmatpush3.bf16.msra.mxu1 %v9386_v42  ;;  %v6296_v27 = vrot.slane %v12219_v12, %v6295_v24  ;;  %v9390_v42 = vld [vmem:[%s12409_s7 + $0x28] sm:$0xff]  }
 0x3b8   :  { %v6330_v35 = vsel %vm6314_vm5, %v6306_v33, %v6322_v26  ;;  %v6333_v36 = vpack.c.bf16 %v6329_v61, %v6325_v47  ;;  %7937 = vmatprep.subr.bf16.mxu1 %v9387_v17  ;;  %v9392_v17 = vld [vmem:[%s12409_s7 + $0x30] sm:$0xff]  }
 0x3b9   :  { %v6334_v37 = vpack.c.bf16 %v6330_v35, %v6326_v7 }
 0x3ba   :  { %v12259_v41 = vpop.f32.mrb[4].mxu0 }
 0x3bb   :  { %6765 = vmatprep.mubr.bf16.mxu0 %v6334_v37  ;;  %v12261_v39 = vpop.f32.mrb[5].mxu0  ;;  %7938 = vmatpush3.bf16.msra.mxu1 %v9388_v51 }
 0x3bc   :  { %6766 = vmatmul.mubr.bf16.vlgmr.msra.gmra.mrb[8].mxu0 %v6333_v36  ;;  %v12266_v43 = vpop.f32.mrb[6].mxu0 }
 0x3bd   :  { %6777 = vmatpush1.bf16.msra.mxu0 %v9331_v0  ;;  %v12274_v49 = vpop.f32.mrb[7].mxu0 }
 0x3be   :  { %6778 = vmatprep.subr.bf16.mxu0 %v9336_v38 }
 0x3c1   :  { %6779 = vmatpush1.bf16.msra.mxu0 %v9334_v48  ;;  %v9393_v48 = vld [vmem:[%s12409_s7 + $0x78] sm:$0xff]  }
 0x3c2   :  { %6780 = vmatprep.subr.bf16.mxu0 %v9339_v52  ;;  %v6401_v52 = vld [vmem:[%s12408_s6] sm:$0x3] }
 0x3c3   :  { %v6406_v51 = vrot.slane %v6401_v52, %v6283_v3 }
 0x3c5   :  { %6781 = vmatpush1.bf16.msra.mxu0 %v9337_v28  ;;  %v6410_v28 = vrot.slane %v6401_v52, %v6287_v13 }
 0x3c6   :  { %6782 = vmatprep.subr.bf16.mxu0 %v9342_v21 }
 0x3c9   :  { %6783 = vmatpush1.bf16.msra.mxu0 %v9340_v54 }
 0x3ca   :  { %6784 = vmatprep.subr.bf16.mxu0 %v9345_v45 }
 0x3cd   :  { %6785 = vmatpush1.bf16.msra.mxu0 %v9343_v55 }
 0x3ce   :  { %6786 = vmatprep.subr.bf16.mxu0 %v9348_v9 }
 0x3d1   :  { %6787 = vmatpush1.bf16.msra.mxu0 %v9346_v57 }
 0x3d2   :  { %6788 = vmatprep.subr.bf16.mxu0 %v9351_v60 }
 0x3d5   :  { %6789 = vmatpush1.bf16.msra.mxu0 %v9349_v63 }
 0x3d6   :  { %6790 = vmatprep.subr.bf16.mxu0 %v9354_v1 }
 0x3d9   :  { %6791 = vmatpush1.bf16.msra.mxu0 %v9352_v40 }
 0x3da   :  { %6792 = vmatprep.subr.bf16.mxu0 %v9357_v30 }
 0x3dd   :  { %6793 = vmatpush1.bf16.msra.mxu0 %v9355_v4 }
 0x3de   :  { %6794 = vmatprep.subr.bf16.mxu0 %v9360_v6 }
 0x3e1   :  { %6795 = vmatpush1.bf16.msra.mxu0 %v9358_v56 }
 0x3e2   :  { %6796 = vmatprep.subr.bf16.mxu0 %v9363_v5 }
 0x3e5   :  { %6797 = vmatpush1.bf16.msra.mxu0 %v9361_v10 }
 0x3e6   :  { %6798 = vmatprep.subr.bf16.mxu0 %v9366_v11  ;;  %v7912_v11 = vld [vmem:[%s12410_s8] ss:$0 sm:$0xff] }
 0x3e9   :  { %6799 = vmatpush1.bf16.msra.mxu0 %v9364_v62 }
 0x3ea   :  { %6800 = vmatprep.subr.bf16.mxu0 %v9369_v14 }
 0x3ed   :  { %6801 = vmatpush1.bf16.msra.mxu0 %v9367_v59 }
 0x3ee   :  { %6802 = vmatprep.subr.bf16.mxu0 %v9372_v31 }
 0x3f1   :  { %6803 = vmatpush1.bf16.msra.mxu0 %v9370_v58 }
 0x3f2   :  { %6804 = vmatprep.subr.bf16.mxu0 %v9375_v8 }
 0x3f5   :  { %6805 = vmatpush1.bf16.msra.mxu0 %v9373_v15 }
 0x3f6   :  { %6806 = vmatprep.subr.bf16.mxu0 %v9378_v44 }
 0x3f9   :  { %6807 = vmatpush1.bf16.msra.mxu0 %v9376_v16 }
 0x421   :  { %v6227_v20 = vpop.f32.mrb[4].mxu1 }
 0x422   :  { %v7955_v22 = vadd.f32 %v12259_v41, %v6227_v20  ;;  %v6229_v2 = vpop.f32.mrb[5].mxu1 }
 0x423   :  { %v7956_v19 = vadd.f32 %v12261_v39, %v6229_v2  ;;  %v6231_v53 = vpop.f32.mrb[6].mxu1  ;;  %v9389_v39 = vld [vmem:[%s12409_s7 + $0x68] sm:$0xff]  }
 0x424   :  { %v6303_v32 = vadd.f32 %v7955_v22, %v6292_v25  ;;  %v7957_v33 = vadd.f32 %v12266_v43, %v6231_v53  ;;  %v6233_v23 = vpop.f32.mrb[7].mxu1  ;;  %7939 = vmatprep.subr.bf16.mxu1 %v9389_v39  ;;  %v9391_v43 = vld [vmem:[%s12409_s7 + $0x70] sm:$0xff]  }
 0x425   :  { %v6304_v34 = vadd.f32 %v7956_v19, %v6296_v27  ;;  %v7958_v26 = vadd.f32 %v12274_v49, %v6233_v23  ;;  %7940 = vmatpush3.bf16.msra.mxu1 %v9390_v42  ;;  %v9394_v49 = vld [vmem:[%s12409_s7 + $0x38] sm:$0xff]  }
 0x426   :  { %v6319_v47 = vmul.f32 0.2, %v6303_v32  ;;  %v6307_v61 = vadd.f32 %v7957_v33, %v6292_v25  ;;  %vm6311_vm6 = vcmp.gt.f32.partialorder %v6303_v32, 0.0  ;;  %7941 = vmatprep.subr.bf16.mxu1 %v9391_v43 }
 0x427   :  { %v6320_v18 = vmul.f32 0.2, %v6304_v34  ;;  %v6308_v7 = vadd.f32 %v7958_v26, %v6296_v27  ;;  %vm6312_vm7 = vcmp.gt.f32.partialorder %v6304_v34, 0.0 }
 0x428   :  { %vm6315_vm8 = vcmp.gt.f32.partialorder %v6307_v61, 0.0  ;;  %v6323_v12 = vmul.f32 0.2, %v6307_v61  ;;  %v6327_v36 = vsel %vm6311_vm6, %v6303_v32, %v6319_v47 }
 0x429   :  { %vm6316_vm9 = vcmp.gt.f32.partialorder %v6308_v7, 0.0  ;;  %v6324_v35 = vmul.f32 0.2, %v6308_v7  ;;  %v6328_v37 = vsel %vm6312_vm7, %v6304_v34, %v6320_v18  ;;  %7942 = vmatpush3.bf16.msra.mxu1 %v9392_v17 }
 0x42a   :  { %v6331_v29 = vsel %vm6315_vm8, %v6307_v61, %v6323_v12  ;;  %7943 = vmatprep.subr.bf16.mxu1 %v9393_v48 }
 0x42b   :  { %v6332_v0 = vsel %vm6316_vm9, %v6308_v7, %v6324_v35  ;;  %v6335_v38 = vpack.c.bf16 %v6331_v29, %v6327_v36 }
 0x42c   :  { %v6336_v41 = vpack.c.bf16 %v6332_v0, %v6328_v37 }
 0x42d   :  { %7944 = vmatpush3.bf16.msra.mxu1 %v9394_v49 }
 0x42e   :  { %6808 = vmatprep.mubr.bf16.mxu0 %v6336_v41 }
 0x42f   :  { %6809 = vmatmul.mubr.bf16.vlgmr.msra.gmra.mrb[8].mxu0 %v6335_v38 }
 0x502   :  { %v6810_v21 = vpop.f32.mrb[8].mxu0 }
 0x503   :  { %v7959_v54 = vadd.f32 %v6810_v21, %v6406_v51  ;;  %v6812_v45 = vpop.f32.mrb[9].mxu0 }
 0x504   :  { %v7960_v55 = vadd.f32 %v6812_v45, %v6410_v28  ;;  %v6814_v9 = vpop.f32.mrb[10].mxu0 }
 0x505   :  { %v6823_v57 = vmul.f32 0.2, %v7959_v54  ;;  %v7961_v60 = vadd.f32 %v6814_v9, %v6406_v51  ;;  %v6816_v63 = vpop.f32.mrb[11].mxu0  ;;  %vm6819_vm10 = vcmp.gt.f32.partialorder %v7959_v54, 0.0 }
 0x506   :  { %v6824_v1 = vmul.f32 0.2, %v7960_v55  ;;  %v7962_v40 = vadd.f32 %v6816_v63, %v6410_v28  ;;  %vm6820_vm11 = vcmp.gt.f32.partialorder %v7960_v55, 0.0 }
 0x507   :  { %vm6821_vm12 = vcmp.gt.f32.partialorder %v7961_v60, 0.0  ;;  %v6825_v30 = vmul.f32 0.2, %v7961_v60  ;;  %v6827_v3 = vsel %vm6819_vm10, %v7959_v54, %v6823_v57 }
 0x508   :  { %vm6822_vm13 = vcmp.gt.f32.partialorder %v7962_v40, 0.0  ;;  %v6826_v4 = vmul.f32 0.2, %v7962_v40  ;;  %v6828_v13 = vsel %vm6820_vm11, %v7960_v55, %v6824_v1 }
 0x509   :  { %v6829_v6 = vsel %vm6821_vm12, %v7961_v60, %v6825_v30 }
 0x50a   :  { %v6831_v46 = vpack.c.bf16 %v6829_v6, %v6827_v3  ;;  %v6830_v56 = vsel %vm6822_vm13, %v7962_v40, %v6826_v4 }
 0x50b   :  { %v6832_v5 = vpack.c.bf16 %v6830_v56, %v6828_v13 }
 0x50d   :  { %7000 = vmatprep.mubr.bf16.mxu1 %v6832_v5 }
 0x50e   :  { %7001 = vmatmul.mubr.bf16.vlgmr.msra.gmra.mrb[8].mxu1 %v6831_v46 }
 0x5e1   :  { %v7945_v10 = vpop.f32.mrb[8].mxu1 }
 0x5e2   :  { %v7946_v62 = vpop.f32.mrb[9].mxu1 }
 0x5e3   :  { %v7947_v14 = vadd.f32 %v7946_v62, %v7945_v10  ;;  %v7948_v59 = vpop.f32.mrb[10].mxu1 }
 0x5e4   :  { %v7949_v31 = vpop.f32.mrb[11].mxu1 }
 0x5e5   :  { %v7003_v58 = vadd.f32 %v7947_v14, %v7912_v11  ;;  %v7950_v8 = vadd.f32 %v7949_v31, %v7948_v59 }
 0x5e7   :  { %v7009_v15 = vsub.f32 0.0, %v7003_v58  ;;  %v7006_v44 = vadd.f32 %v7950_v8, %v7912_v11 }
 0x5e9   :  { %v7011_v16 = vmul.f32 1.442695, %v7009_v15  ;;  %v7010_v50 = vsub.f32 0.0, %v7006_v44 }
 0x5eb   :  { %9395 = vpow2.f32 %v7011_v16  ;;  %v7013_v24 = vmul.f32 1.442695, %v7010_v50 }
 0x5ed   :  { %9397 = vpow2.f32 %v7013_v24 }
 0x5f5   :  { %v9396_v25 = vpop.eup %9395 }
 0x5f6   :  { %v7015_v20 = vadd.f32 1.0, %v9396_v25 }
 0x5f7   :  { %v9398_v27 = vpop.eup %9397 }
 0x5f8   :  { %9399 = vrcp.f32 %v7015_v20  ;;  %v7016_v22 = vadd.f32 1.0, %v9398_v27 }
 0x5fa   :  { %9401 = vrcp.f32 %v7016_v22 }
 0x602   :  { %v9400_v2 = vpop.eup %9399 }
 0x603   :  { %7019 = vst [vmem:[#allocation2] sm:$0xff] %v9400_v2 }
 0x604   :  { %v9402_v19 = vpop.eup %9401 }
 0x60a   :  { %v7038_v53 = vld [vmem:[#allocation2] sm:$0xf] }
 0x60b   :  { %7039 = vst [vmem:[%s12411_s9] sm:$0xf] %v7038_v53 }

</bundles_post_ra>
